<compile_context>
chip_gen: v7x
topology: tpu7x:2x2x1
jax: 0.10.0
libtpu: 0.0.40
codegen_flags: <defaults>
</compile_context>

<pallas_src>
import functools

import jax
import jax.numpy as jnp
import numpy as np
from jax.experimental import pallas as pl
from jax.experimental.pallas import tpu as pltpu


def _round_up(x, m):
    return (x + m - 1) // m * m


def _pick_vmem_limit():
    """Scoped-VMEM request tuned per generation (3/4 of capacity, <= 100 MiB):
    ~48 MiB on v7x (64 MiB/core), ~96 MiB on v5e/v6e (128 MiB)."""
    cap = 64 * 1024 * 1024
    try:
        cap = int(pltpu.get_tpu_info().vmem_capacity_bytes)
    except Exception:
        pass
    return min(cap * 3 // 4, 100 * 1024 * 1024)


def _sigmoid(x):
    # Exact identity sigmoid(x) = 0.5*tanh(x/2) + 0.5 -> single EUP push.
    return 0.5 * jnp.tanh(0.5 * x) + 0.5


# -----------------------------------------------------------------------------
# Fused kernel: per-chunk input projection + serial LSTM recurrence.
# Grid: (direction, time-chunk).  Direction is "parallel" (megacore-shardable
# on v7x), the time axis is the serial recurrence ("arbitrary").
# -----------------------------------------------------------------------------
def _lstm_fused_kernel(TC, T_pad, H_pad, Bp,
                       len_ref, x_ref, wih_ref, b_ref, whh_ref, h0_ref, c0_ref,
                       out_ref, hn_ref, cn_ref,
                       h_s, c_s, g_s):
    d = pl.program_id(0)                     # 0 = forward, 1 = backward
    c = pl.program_id(1)                     # chunk index, recurrence order
    nc = pl.num_programs(1)

    @pl.when(c == 0)
    def _():                                 # (re)initialize state per direction
        h_s[...] = h0_ref[0]
        c_s[...] = c0_ref[0]

    # ---- fused input projection for the whole chunk: one MXU matmul --------
    # x_ref: (TC*Bp, C) bf16, rows in *original* time order within the chunk.
    g_s[...] = jnp.dot(x_ref[...], wih_ref[0],
                       preferred_element_type=jnp.float32) + b_ref[0]

    lengths = len_ref[...]                   # (Bp, 1) int32
    whh = whh_ref[0]                         # (Hp, 4Hp) bf16, chunk-resident
    # TODO(synk): hold W_hh weight-stationary in the MXU across the unrolled
    # chunk (pltpu.matmul_push_rhs / matmul_acc_lhs / matmul_pop).

    h = h_s[...]
    cc = c_s[...]
    for j in range(TC):                      # static, fully-unrolled chunk
        s = c * TC + j                                     # recurrence step
        t_orig = jnp.where(d == 0, s, T_pad - 1 - s)       # original timestep
        # hoisted mask, reused by all three selects below (no re-broadcast)
        valid = jnp.broadcast_to(t_orig < lengths, (Bp, H_pad))

        # gate rows of this step; the backward direction walks the chunk in
        # reverse, so the sublane offset is direction dependent.
        row = jnp.where(d == 0, j * Bp, (TC - 1 - j) * Bp)
        row = pl.multiple_of(row, Bp)
        gates = g_s[pl.ds(row, Bp), :] + jnp.dot(
            h.astype(jnp.bfloat16), whh, preferred_element_type=jnp.float32)

        i_g = _sigmoid(gates[:, 0 * H_pad:1 * H_pad])      # lane-aligned slices
        f_g = _sigmoid(gates[:, 1 * H_pad:2 * H_pad])
        g_g = jnp.tanh(gates[:, 2 * H_pad:3 * H_pad])
        o_g = _sigmoid(gates[:, 3 * H_pad:4 * H_pad])
        c_new = f_g * cc + i_g * g_g
        h_new = o_g * jnp.tanh(c_new)

        h = jnp.where(valid, h_new, h)                     # packed-seq masking
        cc = jnp.where(valid, c_new, cc)
        out_ref[0, j] = jnp.where(valid, h_new, 0.0)       # full (8, Hp) store

    h_s[...] = h
    c_s[...] = cc

    @pl.when(c == nc - 1)
    def _():                                 # final states (last valid step)
        hn_ref[0] = h_s[...]
        cn_ref[0] = c_s[...]


# -----------------------------------------------------------------------------
# Wrapper (PyTorch EncoderRNN.forward semantics, batch-first).
# -----------------------------------------------------------------------------
def encoder_rnn_forward(inputs, hidden, cell, input_lengths, params,
                        *, time_chunk=16):
    """inputs: (B, T, C) batch-first.  hidden/cell: (2, B, H).  lengths: (B,)."""
    B, T, C = inputs.shape
    H = params["w_hh_f"].shape[1]

    Bp = _round_up(max(B, 8), 8)             # full sublane group
    Hp = _round_up(H, 128)                   # lane-dense gates / outputs
    TC = time_chunk                          # TC*Bp = 128 -> full MXU M tile
    Tp = _round_up(T, TC)
    nc = Tp // TC

    # ---- padded operands -----------------------------------------------------
    # Single copy of x, time-major, flattened to a 2-D bf16 slab; the backward
    # direction is handled inside the kernel (no flipped duplicate).
    x_tm = jnp.transpose(inputs, (1, 0, 2)).astype(jnp.float32)       # (T, B, C)
    x_tm = jnp.pad(x_tm, ((0, Tp - T), (0, Bp - B), (0, 0)))          # (Tp, Bp, C)
    x_flat = x_tm.reshape(Tp * Bp, C).astype(jnp.bfloat16)            # (Tp*Bp, C)

    lengths = jnp.zeros((Bp, 1), jnp.int32).at[:B, 0].set(
        jnp.asarray(input_lengths, jnp.int32))

    def pad_state(s):                                   # (2, B, H) -> (2, Bp, Hp)
        return jnp.pad(s.astype(jnp.float32),
                       ((0, 0), (0, Bp - B), (0, Hp - H)))

    h0 = pad_state(hidden)
    c0 = pad_state(cell)

    def pad_gate_cols(w):                               # (rows, 4H) -> (rows, 4Hp)
        r = w.shape[0]
        return jnp.pad(w.reshape(r, 4, H),
                       ((0, 0), (0, 0), (0, Hp - H))).reshape(r, 4 * Hp)

    def prep_dir(w_ih, w_hh, b_ih, b_hh):
        wih = pad_gate_cols(w_ih.T).astype(jnp.bfloat16)                  # (C, 4Hp)
        whh = jnp.pad(pad_gate_cols(w_hh.T),
                      ((0, Hp - H), (0, 0))).astype(jnp.bfloat16)         # (Hp, 4Hp)
        b = pad_gate_cols((b_ih + b_hh)[None, :]).astype(jnp.float32)     # (1, 4Hp)
        return wih, whh, b

    wih_f, whh_f, b_f = prep_dir(params["w_ih_f"], params["w_hh_f"],
                                 params["b_ih_f"], params["b_hh_f"])
    wih_b, whh_b, b_b = prep_dir(params["w_ih_b"], params["w_hh_b"],
                                 params["b_ih_b"], params["b_hh_b"])
    wih2 = jnp.stack([wih_f, wih_b], axis=0)            # (2, C, 4Hp)  bf16
    whh2 = jnp.stack([whh_f, whh_b], axis=0)            # (2, Hp, 4Hp) bf16
    b2 = jnp.stack([b_f, b_b], axis=0)                  # (2, 1, 4Hp)  f32

    kernel = functools.partial(_lstm_fused_kernel, TC, Tp, Hp, Bp)

    out_rec, h_n, c_n = pl.pallas_call(
        kernel,
        grid=(2, nc),
        in_specs=[
            pl.BlockSpec((Bp, 1), lambda d, c: (0, 0)),                      # lengths
            # x chunk: original-time chunk c (fwd) / nc-1-c (bwd)
            pl.BlockSpec((TC * Bp, C),
                         lambda d, c: (c + d * (nc - 1 - 2 * c), 0)),        # x
            pl.BlockSpec((1, C, 4 * Hp), lambda d, c: (d, 0, 0)),            # W_ih
            pl.BlockSpec((1, 1, 4 * Hp), lambda d, c: (d, 0, 0)),            # bias
            pl.BlockSpec((1, Hp, 4 * Hp), lambda d, c: (d, 0, 0)),           # W_hh
            pl.BlockSpec((1, Bp, Hp), lambda d, c: (d, 0, 0)),               # h0
            pl.BlockSpec((1, Bp, Hp), lambda d, c: (d, 0, 0)),               # c0
        ],
        out_specs=(
            pl.BlockSpec((1, TC, Bp, Hp), lambda d, c: (d, c, 0, 0)),        # outputs
            pl.BlockSpec((1, Bp, Hp), lambda d, c: (d, 0, 0)),               # h_n
            pl.BlockSpec((1, Bp, Hp), lambda d, c: (d, 0, 0)),               # c_n
        ),
        out_shape=(
            jax.ShapeDtypeStruct((2, Tp, Bp, Hp), jnp.float32),
            jax.ShapeDtypeStruct((2, Bp, Hp), jnp.float32),
            jax.ShapeDtypeStruct((2, Bp, Hp), jnp.float32),
        ),
        scratch_shapes=[pltpu.VMEM((Bp, Hp), jnp.float32),          # carried h
                        pltpu.VMEM((Bp, Hp), jnp.float32),          # carried c
                        pltpu.VMEM((TC * Bp, 4 * Hp), jnp.float32)],  # chunk gates
        compiler_params=pltpu.CompilerParams(
            dimension_semantics=("parallel", "arbitrary"),
            vmem_limit_bytes=_pick_vmem_limit()),
    )(lengths, x_flat, wih2, b2, whh2, h0, c0)

    # ---- back to PyTorch layout ----------------------------------------------
    # out_rec[1] is in recurrence (time-reversed) order; un-reverse, drop the
    # padding, batch-first + direction concat (fused by XLA into one copy).
    # NOTE: t_out (pad_packed_sequence semantics) needs host-concrete lengths.
    t_out = int(np.max(np.asarray(input_lengths)))
    out_f = out_rec[0, :, :B, :H]                           # (Tp, B, H)
    out_b = jnp.flip(out_rec[1], axis=0)[:, :B, :H]         # (Tp, B, H)
    out = jnp.concatenate([out_f, out_b], axis=-1)          # (Tp, B, 2H)
    out = jnp.transpose(out, (1, 0, 2))[:, :t_out]          # (B, t_out, 2H)
    hidden_state = h_n[:, :B, :H]                           # (2, B, H)
    cell_state = c_n[:, :B, :H]                             # (2, B, H)
    return out, hidden_state, cell_state


# -----------------------------------------------------------------------------
# Params (raw PyTorch nn.LSTM layout) and a pure-JAX reference.
# -----------------------------------------------------------------------------
def init_params(key, n_channels, hidden_size):
    H, C = hidden_size, n_channels
    k = 1.0 / np.sqrt(H)
    keys = jax.random.split(key, 8)

    def u(kk, shape):
        return jax.random.uniform(kk, shape, jnp.float32, minval=-k, maxval=k)

    return {
        "w_ih_f": u(keys[0], (4 * H, C)), "w_hh_f": u(keys[1], (4 * H, H)),
        "b_ih_f": u(keys[2], (4 * H,)),   "b_hh_f": u(keys[3], (4 * H,)),
        "w_ih_b": u(keys[4], (4 * H, C)), "w_hh_b": u(keys[5], (4 * H, H)),
        "b_ih_b": u(keys[6], (4 * H,)),   "b_hh_b": u(keys[7], (4 * H,)),
    }


def _reference_bilstm(x, lengths, hidden, cell, params, H):
    """Pure-JAX reference mirroring the kernel math (bf16 matmuls, f32 acc)."""
    B, T, _ = x.shape
    lengths = jnp.asarray(lengths, jnp.int32)

    def mm(a, b):
        return jnp.dot(a.astype(jnp.bfloat16), b.astype(jnp.bfloat16),
                       preferred_element_type=jnp.float32)

    def step(x_t, h, c, w_ih, w_hh, b):
        gates = mm(x_t, w_ih.T) + mm(h, w_hh.T) + b
        i = jax.nn.sigmoid(gates[:, :H])
        f = jax.nn.sigmoid(gates[:, H:2 * H])
        g = jnp.tanh(gates[:, 2 * H:3 * H])
        o = jax.nn.sigmoid(gates[:, 3 * H:])
        c2 = f * c + i * g
        return o * jnp.tanh(c2), c2

    b_f = params["b_ih_f"] + params["b_hh_f"]
    b_b = params["b_ih_b"] + params["b_hh_b"]

    hf, cf = hidden[0], cell[0]
    outs_f = []
    for t in range(T):
        hn, cn = step(x[:, t], hf, cf, params["w_ih_f"], params["w_hh_f"], b_f)
        m = (t < lengths)[:, None]
        hf = jnp.where(m, hn, hf)
        cf = jnp.where(m, cn, cf)
        outs_f.append(jnp.where(m, hn, 0.0))

    hb, cb = hidden[1], cell[1]
    outs_b = [None] * T
    for t in range(T - 1, -1, -1):
        hn, cn = step(x[:, t], hb, cb, params["w_ih_b"], params["w_hh_b"], b_b)
        m = (t < lengths)[:, None]
        hb = jnp.where(m, hn, hb)
        cb = jnp.where(m, cn, cb)
        outs_b[t] = jnp.where(m, hn, 0.0)

    out = jnp.concatenate([jnp.stack(outs_f, 1), jnp.stack(outs_b, 1)], axis=-1)
    t_out = int(np.max(np.asarray(lengths)))
    return out[:, :t_out], jnp.stack([hf, hb]), jnp.stack([cf, cb])


if __name__ == "__main__":
    B, T, C, H = 2, 8, 4, 32       # batch, seq, n_channels, hidden_size

    key = jax.random.PRNGKey(0)
    k_x, k_p = jax.random.split(key)

    inputs = jax.random.normal(k_x, (B, T, C), jnp.float32)
    input_lengths = np.array([8, 5], dtype=np.int32)          # variable lengths
    params = init_params(k_p, C, H)

    # init_hidden_lstm(batch_size): zeros of shape (2*layers, B, H)
    hidden = jnp.zeros((2, B, H), jnp.float32)
    cell = jnp.zeros((2, B, H), jnp.float32)

    out, h_n, c_n = encoder_rnn_forward(inputs, hidden, cell, input_lengths, params)
    jax.block_until_ready((out, h_n, c_n))

    out_r, h_r, c_r = _reference_bilstm(inputs, input_lengths, hidden, cell, params, H)
    np.testing.assert_allclose(np.asarray(out), np.asarray(out_r), rtol=1e-3, atol=1e-4)
    np.testing.assert_allclose(np.asarray(h_n), np.asarray(h_r), rtol=1e-3, atol=1e-4)
    np.testing.assert_allclose(np.asarray(c_n), np.asarray(c_r), rtol=1e-3, atol=1e-4)

    assert out.shape == (B, int(input_lengths.max()), 2 * H)
    assert h_n.shape == (2, B, H) and c_n.shape == (2, B, H)
    print("KERNEL_OK")
</pallas_src>

<mosaic_0001>
module attributes {stable_mosaic.version = 11 : i64} {
  func.func @_lstm_fused_kernel(%arg0: i32, %arg1: i32, %arg2: memref<8x1xi32, #tpu.memory_space<vmem>>, %arg3: memref<128x4xbf16, #tpu.memory_space<vmem>>, %arg4: memref<1x4x512xbf16, #tpu.memory_space<vmem>>, %arg5: memref<1x1x512xf32, #tpu.memory_space<vmem>>, %arg6: memref<1x128x512xbf16, #tpu.memory_space<vmem>>, %arg7: memref<1x8x128xf32, #tpu.memory_space<vmem>>, %arg8: memref<1x8x128xf32, #tpu.memory_space<vmem>>, %arg9: memref<1x16x8x128xf32, #tpu.memory_space<vmem>>, %arg10: memref<1x8x128xf32, #tpu.memory_space<vmem>>, %arg11: memref<1x8x128xf32, #tpu.memory_space<vmem>>, %arg12: memref<8x128xf32, #tpu.memory_space<vmem>>, %arg13: memref<8x128xf32, #tpu.memory_space<vmem>>, %arg14: memref<128x512xf32, #tpu.memory_space<vmem>>) attributes {dimension_semantics = [#tpu.dimension_semantics<parallel>, #tpu.dimension_semantics<arbitrary>], iteration_bounds = array<i64: 2, 1>, scalar_prefetch = 0 : i64, scratch_operands = 3 : i64, tpu.core_type = #tpu.core_type<tc>, window_params = [{pipeline_mode = #tpu.pipeline_mode<synchronous>, transform_indices = @transform_0, window_bounds = array<i64: 8, 1>}, {transform_indices = @transform_1, window_bounds = array<i64: 128, 4>}, {transform_indices = @transform_2, window_bounds = array<i64: 1, 4, 512>}, {transform_indices = @transform_3, window_bounds = array<i64: 1, 1, 512>}, {transform_indices = @transform_4, window_bounds = array<i64: 1, 128, 512>}, {transform_indices = @transform_5, window_bounds = array<i64: 1, 8, 128>}, {transform_indices = @transform_6, window_bounds = array<i64: 1, 8, 128>}, {transform_indices = @transform_7, window_bounds = array<i64: 1, 16, 8, 128>}, {transform_indices = @transform_8, window_bounds = array<i64: 1, 8, 128>}, {transform_indices = @transform_9, window_bounds = array<i64: 1, 8, 128>}]} {
    %c0_i32 = arith.constant 0 : i32
    %0 = arith.cmpi eq, %arg1, %c0_i32 : i32
    %1 = arith.extui %0 : i1 to i32
    %c0_i32_0 = arith.constant 0 : i32
    %2 = arith.cmpi ne, %1, %c0_i32_0 : i32
    scf.if %2 {
      %c0_349 = arith.constant 0 : index
      %c0_350 = arith.constant 0 : index
      %c0_351 = arith.constant 0 : index
      %902 = vector.load %arg7[%c0_349, %c0_350, %c0_351] : memref<1x8x128xf32, #tpu.memory_space<vmem>>, vector<1x8x128xf32>
      %903 = vector.shape_cast %902 : vector<1x8x128xf32> to vector<8x128xf32>
      %c0_352 = arith.constant 0 : index
      %c0_353 = arith.constant 0 : index
      %904 = vector.load %arg12[%c0_352, %c0_353] : memref<8x128xf32, #tpu.memory_space<vmem>>, vector<8x128xf32>
      tpu.vector_store %arg12[%c0_352, %c0_353], %903 {strides = array<i32>} : memref<8x128xf32, #tpu.memory_space<vmem>>, vector<8x128xf32>,
      %c0_354 = arith.constant 0 : index
      %c0_355 = arith.constant 0 : index
      %c0_356 = arith.constant 0 : index
      %905 = vector.load %arg8[%c0_354, %c0_355, %c0_356] : memref<1x8x128xf32, #tpu.memory_space<vmem>>, vector<1x8x128xf32>
      %906 = vector.shape_cast %905 : vector<1x8x128xf32> to vector<8x128xf32>
      %c0_357 = arith.constant 0 : index
      %c0_358 = arith.constant 0 : index
      %907 = vector.load %arg13[%c0_357, %c0_358] : memref<8x128xf32, #tpu.memory_space<vmem>>, vector<8x128xf32>
      tpu.vector_store %arg13[%c0_357, %c0_358], %906 {strides = array<i32>} : memref<8x128xf32, #tpu.memory_space<vmem>>, vector<8x128xf32>,
    } else {
    }
    %c0 = arith.constant 0 : index
    %c0_1 = arith.constant 0 : index
    %3 = vector.load %arg3[%c0, %c0_1] : memref<128x4xbf16, #tpu.memory_space<vmem>>, vector<128x4xbf16>
    %c0_2 = arith.constant 0 : index
    %c0_3 = arith.constant 0 : index
    %c0_4 = arith.constant 0 : index
    %4 = vector.load %arg4[%c0_2, %c0_3, %c0_4] : memref<1x4x512xbf16, #tpu.memory_space<vmem>>, vector<1x4x512xbf16>
    %5 = vector.shape_cast %4 : vector<1x4x512xbf16> to vector<4x512xbf16>
    %cst = arith.constant dense<0.000000e+00> : vector<128x512xf32>
    %6 = tpu.matmul %3, %5, %cst {dimension_numbers = #tpu.dot_dimension_numbers<[1], [0], [0], [1], [0, 0, 1, 1], [], []>} : vector<128x4xbf16>, vector<4x512xbf16>, vector<128x512xf32> -> vector<128x512xf32>
    %c0_5 = arith.constant 0 : index
    %c0_6 = arith.constant 0 : index
    %c0_7 = arith.constant 0 : index
    %7 = vector.load %arg5[%c0_5, %c0_6, %c0_7] : memref<1x1x512xf32, #tpu.memory_space<vmem>>, vector<1x1x512xf32>
    %8 = vector.shape_cast %7 : vector<1x1x512xf32> to vector<1x512xf32>
    %9 = vector.broadcast %8 : vector<1x512xf32> to vector<128x512xf32>
    %10 = arith.addf %6, %9 : vector<128x512xf32>
    %c0_8 = arith.constant 0 : index
    %c0_9 = arith.constant 0 : index
    %11 = vector.load %arg14[%c0_8, %c0_9] : memref<128x512xf32, #tpu.memory_space<vmem>>, vector<128x512xf32>
    tpu.vector_store %arg14[%c0_8, %c0_9], %10 {strides = array<i32>} : memref<128x512xf32, #tpu.memory_space<vmem>>, vector<128x512xf32>,
    %c0_10 = arith.constant 0 : index
    %c0_11 = arith.constant 0 : index
    %12 = vector.load %arg2[%c0_10, %c0_11] : memref<8x1xi32, #tpu.memory_space<vmem>>, vector<8x1xi32>
    %c0_12 = arith.constant 0 : index
    %c0_13 = arith.constant 0 : index
    %c0_14 = arith.constant 0 : index
    %13 = vector.load %arg6[%c0_12, %c0_13, %c0_14] : memref<1x128x512xbf16, #tpu.memory_space<vmem>>, vector<1x128x512xbf16>
    %14 = vector.shape_cast %13 : vector<1x128x512xbf16> to vector<128x512xbf16>
    %c0_15 = arith.constant 0 : index
    %c0_16 = arith.constant 0 : index
    %15 = vector.load %arg12[%c0_15, %c0_16] : memref<8x128xf32, #tpu.memory_space<vmem>>, vector<8x128xf32>
    %c0_17 = arith.constant 0 : index
    %c0_18 = arith.constant 0 : index
    %16 = vector.load %arg13[%c0_17, %c0_18] : memref<8x128xf32, #tpu.memory_space<vmem>>, vector<8x128xf32>
    %c16_i32 = arith.constant 16 : i32
    %17 = arith.muli %arg1, %c16_i32 : i32
    %c0_i32_19 = arith.constant 0 : i32
    %18 = arith.addi %17, %c0_i32_19 : i32
    %c0_i32_20 = arith.constant 0 : i32
    %19 = arith.cmpi eq, %arg0, %c0_i32_20 : i32
    %c15_i32 = arith.constant 15 : i32
    %20 = arith.subi %c15_i32, %18 : i32
    %21 = arith.select %19, %18, %20 : i32
    %22 = vector.broadcast %21 : i32 to vector<8x1xi32>
    %23 = arith.cmpi slt, %22, %12 : vector<8x1xi32>
    %24 = vector.shape_cast %23 : vector<8x1xi1> to vector<8x1xi1>
    %25 = vector.broadcast %24 : vector<8x1xi1> to vector<8x128xi1>
    %c0_i32_21 = arith.constant 0 : i32
    %26 = arith.cmpi eq, %arg0, %c0_i32_21 : i32
    %c0_i32_22 = arith.constant 0 : i32
    %c120_i32 = arith.constant 120 : i32
    %27 = arith.select %26, %c0_i32_22, %c120_i32 : i32
    %28 = tpu.assume_multiple %27, 8 : i32
    %29 = arith.index_cast %28 : i32 to index
    %c0_23 = arith.constant 0 : index
    %30 = vector.load %arg14[%29, %c0_23] : memref<128x512xf32, #tpu.memory_space<vmem>>, vector<8x512xf32>
    %31 = arith.truncf %15 : vector<8x128xf32> to vector<8x128xbf16>
    %cst_24 = arith.constant dense<0.000000e+00> : vector<8x512xf32>
    %32 = tpu.matmul %31, %14, %cst_24 {dimension_numbers = #tpu.dot_dimension_numbers<[1], [0], [0], [1], [0, 0, 1, 1], [], []>} : vector<8x128xbf16>, vector<128x512xbf16>, vector<8x512xf32> -> vector<8x512xf32>
    %33 = arith.addf %30, %32 : vector<8x512xf32>
    %34 = vector.extract_strided_slice %33 {offsets = [0, 0], sizes = [8, 128], strides = [1, 1]} : vector<8x512xf32> to vector<8x128xf32>
    %cst_25 = arith.constant 5.000000e-01 : f32
    %35 = vector.broadcast %cst_25 : f32 to vector<8x128xf32>
    %36 = arith.mulf %35, %34 : vector<8x128xf32>
    %37 = math.tanh %36 : vector<8x128xf32>
    %cst_26 = arith.constant 5.000000e-01 : f32
    %38 = vector.broadcast %cst_26 : f32 to vector<8x128xf32>
    %39 = arith.mulf %38, %37 : vector<8x128xf32>
    %cst_27 = arith.constant 5.000000e-01 : f32
    %40 = vector.broadcast %cst_27 : f32 to vector<8x128xf32>
    %41 = arith.addf %39, %40 : vector<8x128xf32>
    %42 = vector.extract_strided_slice %33 {offsets = [0, 128], sizes = [8, 128], strides = [1, 1]} : vector<8x512xf32> to vector<8x128xf32>
    %cst_28 = arith.constant 5.000000e-01 : f32
    %43 = vector.broadcast %cst_28 : f32 to vector<8x128xf32>
    %44 = arith.mulf %43, %42 : vector<8x128xf32>
    %45 = math.tanh %44 : vector<8x128xf32>
    %cst_29 = arith.constant 5.000000e-01 : f32
    %46 = vector.broadcast %cst_29 : f32 to vector<8x128xf32>
    %47 = arith.mulf %46, %45 : vector<8x128xf32>
    %cst_30 = arith.constant 5.000000e-01 : f32
    %48 = vector.broadcast %cst_30 : f32 to vector<8x128xf32>
    %49 = arith.addf %47, %48 : vector<8x128xf32>
    %50 = vector.extract_strided_slice %33 {offsets = [0, 256], sizes = [8, 128], strides = [1, 1]} : vector<8x512xf32> to vector<8x128xf32>
    %51 = math.tanh %50 : vector<8x128xf32>
    %52 = vector.extract_strided_slice %33 {offsets = [0, 384], sizes = [8, 128], strides = [1, 1]} : vector<8x512xf32> to vector<8x128xf32>
    %cst_31 = arith.constant 5.000000e-01 : f32
    %53 = vector.broadcast %cst_31 : f32 to vector<8x128xf32>
    %54 = arith.mulf %53, %52 : vector<8x128xf32>
    %55 = math.tanh %54 : vector<8x128xf32>
    %cst_32 = arith.constant 5.000000e-01 : f32
    %56 = vector.broadcast %cst_32 : f32 to vector<8x128xf32>
    %57 = arith.mulf %56, %55 : vector<8x128xf32>
    %cst_33 = arith.constant 5.000000e-01 : f32
    %58 = vector.broadcast %cst_33 : f32 to vector<8x128xf32>
    %59 = arith.addf %57, %58 : vector<8x128xf32>
    %60 = arith.mulf %49, %16 : vector<8x128xf32>
    %61 = arith.mulf %41, %51 : vector<8x128xf32>
    %62 = arith.addf %60, %61 : vector<8x128xf32>
    %63 = math.tanh %62 : vector<8x128xf32>
    %64 = arith.mulf %59, %63 : vector<8x128xf32>
    %65 = arith.select %25, %64, %15 : vector<8x128xi1>, vector<8x128xf32>
    %66 = arith.select %25, %62, %16 : vector<8x128xi1>, vector<8x128xf32>
    %cst_34 = arith.constant 0.000000e+00 : f32
    %67 = vector.broadcast %cst_34 : f32 to vector<8x128xf32>
    %68 = arith.select %25, %64, %67 : vector<8x128xi1>, vector<8x128xf32>
    %c0_35 = arith.constant 0 : index
    %c0_36 = arith.constant 0 : index
    %c0_37 = arith.constant 0 : index
    %c0_38 = arith.constant 0 : index
    %69 = vector.load %arg9[%c0_35, %c0_36, %c0_37, %c0_38] : memref<1x16x8x128xf32, #tpu.memory_space<vmem>>, vector<1x1x8x128xf32>
    %70 = vector.shape_cast %69 : vector<1x1x8x128xf32> to vector<8x128xf32>
    %71 = vector.shape_cast %68 : vector<8x128xf32> to vector<1x1x8x128xf32>
    tpu.vector_store %arg9[%c0_35, %c0_36, %c0_37, %c0_38], %71 {strides = array<i32>} : memref<1x16x8x128xf32, #tpu.memory_space<vmem>>, vector<1x1x8x128xf32>,
    %c16_i32_39 = arith.constant 16 : i32
    %72 = arith.muli %arg1, %c16_i32_39 : i32
    %c1_i32 = arith.constant 1 : i32
    %73 = arith.addi %72, %c1_i32 : i32
    %c0_i32_40 = arith.constant 0 : i32
    %74 = arith.cmpi eq, %arg0, %c0_i32_40 : i32
    %c15_i32_41 = arith.constant 15 : i32
    %75 = arith.subi %c15_i32_41, %73 : i32
    %76 = arith.select %74, %73, %75 : i32
    %77 = vector.broadcast %76 : i32 to vector<8x1xi32>
    %78 = arith.cmpi slt, %77, %12 : vector<8x1xi32>
    %79 = vector.shape_cast %78 : vector<8x1xi1> to vector<8x1xi1>
    %80 = vector.broadcast %79 : vector<8x1xi1> to vector<8x128xi1>
    %c0_i32_42 = arith.constant 0 : i32
    %81 = arith.cmpi eq, %arg0, %c0_i32_42 : i32
    %c8_i32 = arith.constant 8 : i32
    %c112_i32 = arith.constant 112 : i32
    %82 = arith.select %81, %c8_i32, %c112_i32 : i32
    %83 = tpu.assume_multiple %82, 8 : i32
    %84 = arith.index_cast %83 : i32 to index
    %c0_43 = arith.constant 0 : index
    %85 = vector.load %arg14[%84, %c0_43] : memref<128x512xf32, #tpu.memory_space<vmem>>, vector<8x512xf32>
    %86 = arith.truncf %65 : vector<8x128xf32> to vector<8x128xbf16>
    %cst_44 = arith.constant dense<0.000000e+00> : vector<8x512xf32>
    %87 = tpu.matmul %86, %14, %cst_44 {dimension_numbers = #tpu.dot_dimension_numbers<[1], [0], [0], [1], [0, 0, 1, 1], [], []>} : vector<8x128xbf16>, vector<128x512xbf16>, vector<8x512xf32> -> vector<8x512xf32>
    %88 = arith.addf %85, %87 : vector<8x512xf32>
    %89 = vector.extract_strided_slice %88 {offsets = [0, 0], sizes = [8, 128], strides = [1, 1]} : vector<8x512xf32> to vector<8x128xf32>
    %cst_45 = arith.constant 5.000000e-01 : f32
    %90 = vector.broadcast %cst_45 : f32 to vector<8x128xf32>
    %91 = arith.mulf %90, %89 : vector<8x128xf32>
    %92 = math.tanh %91 : vector<8x128xf32>
    %cst_46 = arith.constant 5.000000e-01 : f32
    %93 = vector.broadcast %cst_46 : f32 to vector<8x128xf32>
    %94 = arith.mulf %93, %92 : vector<8x128xf32>
    %cst_47 = arith.constant 5.000000e-01 : f32
    %95 = vector.broadcast %cst_47 : f32 to vector<8x128xf32>
    %96 = arith.addf %94, %95 : vector<8x128xf32>
    %97 = vector.extract_strided_slice %88 {offsets = [0, 128], sizes = [8, 128], strides = [1, 1]} : vector<8x512xf32> to vector<8x128xf32>
    %cst_48 = arith.constant 5.000000e-01 : f32
    %98 = vector.broadcast %cst_48 : f32 to vector<8x128xf32>
    %99 = arith.mulf %98, %97 : vector<8x128xf32>
    %100 = math.tanh %99 : vector<8x128xf32>
    %cst_49 = arith.constant 5.000000e-01 : f32
    %101 = vector.broadcast %cst_49 : f32 to vector<8x128xf32>
    %102 = arith.mulf %101, %100 : vector<8x128xf32>
    %cst_50 = arith.constant 5.000000e-01 : f32
    %103 = vector.broadcast %cst_50 : f32 to vector<8x128xf32>
    %104 = arith.addf %102, %103 : vector<8x128xf32>
    %105 = vector.extract_strided_slice %88 {offsets = [0, 256], sizes = [8, 128], strides = [1, 1]} : vector<8x512xf32> to vector<8x128xf32>
    %106 = math.tanh %105 : vector<8x128xf32>
    %107 = vector.extract_strided_slice %88 {offsets = [0, 384], sizes = [8, 128], strides = [1, 1]} : vector<8x512xf32> to vector<8x128xf32>
    %cst_51 = arith.constant 5.000000e-01 : f32
    %108 = vector.broadcast %cst_51 : f32 to vector<8x128xf32>
    %109 = arith.mulf %108, %107 : vector<8x128xf32>
    %110 = math.tanh %109 : vector<8x128xf32>
    %cst_52 = arith.constant 5.000000e-01 : f32
    %111 = vector.broadcast %cst_52 : f32 to vector<8x128xf32>
    %112 = arith.mulf %111, %110 : vector<8x128xf32>
    %cst_53 = arith.constant 5.000000e-01 : f32
    %113 = vector.broadcast %cst_53 : f32 to vector<8x128xf32>
    %114 = arith.addf %112, %113 : vector<8x128xf32>
    %115 = arith.mulf %104, %66 : vector<8x128xf32>
    %116 = arith.mulf %96, %106 : vector<8x128xf32>
    %117 = arith.addf %115, %116 : vector<8x128xf32>
    %118 = math.tanh %117 : vector<8x128xf32>
    %119 = arith.mulf %114, %118 : vector<8x128xf32>
    %120 = arith.select %80, %119, %65 : vector<8x128xi1>, vector<8x128xf32>
    %121 = arith.select %80, %117, %66 : vector<8x128xi1>, vector<8x128xf32>
    %cst_54 = arith.constant 0.000000e+00 : f32
    %122 = vector.broadcast %cst_54 : f32 to vector<8x128xf32>
    %123 = arith.select %80, %119, %122 : vector<8x128xi1>, vector<8x128xf32>
    %c0_55 = arith.constant 0 : index
    %c1 = arith.constant 1 : index
    %c0_56 = arith.constant 0 : index
    %c0_57 = arith.constant 0 : index
    %124 = vector.load %arg9[%c0_55, %c1, %c0_56, %c0_57] : memref<1x16x8x128xf32, #tpu.memory_space<vmem>>, vector<1x1x8x128xf32>
    %125 = vector.shape_cast %124 : vector<1x1x8x128xf32> to vector<8x128xf32>
    %126 = vector.shape_cast %123 : vector<8x128xf32> to vector<1x1x8x128xf32>
    tpu.vector_store %arg9[%c0_55, %c1, %c0_56, %c0_57], %126 {strides = array<i32>} : memref<1x16x8x128xf32, #tpu.memory_space<vmem>>, vector<1x1x8x128xf32>,
    %c16_i32_58 = arith.constant 16 : i32
    %127 = arith.muli %arg1, %c16_i32_58 : i32
    %c2_i32 = arith.constant 2 : i32
    %128 = arith.addi %127, %c2_i32 : i32
    %c0_i32_59 = arith.constant 0 : i32
    %129 = arith.cmpi eq, %arg0, %c0_i32_59 : i32
    %c15_i32_60 = arith.constant 15 : i32
    %130 = arith.subi %c15_i32_60, %128 : i32
    %131 = arith.select %129, %128, %130 : i32
    %132 = vector.broadcast %131 : i32 to vector<8x1xi32>
    %133 = arith.cmpi slt, %132, %12 : vector<8x1xi32>
    %134 = vector.shape_cast %133 : vector<8x1xi1> to vector<8x1xi1>
    %135 = vector.broadcast %134 : vector<8x1xi1> to vector<8x128xi1>
    %c0_i32_61 = arith.constant 0 : i32
    %136 = arith.cmpi eq, %arg0, %c0_i32_61 : i32
    %c16_i32_62 = arith.constant 16 : i32
    %c104_i32 = arith.constant 104 : i32
    %137 = arith.select %136, %c16_i32_62, %c104_i32 : i32
    %138 = tpu.assume_multiple %137, 8 : i32
    %139 = arith.index_cast %138 : i32 to index
    %c0_63 = arith.constant 0 : index
    %140 = vector.load %arg14[%139, %c0_63] : memref<128x512xf32, #tpu.memory_space<vmem>>, vector<8x512xf32>
    %141 = arith.truncf %120 : vector<8x128xf32> to vector<8x128xbf16>
    %cst_64 = arith.constant dense<0.000000e+00> : vector<8x512xf32>
    %142 = tpu.matmul %141, %14, %cst_64 {dimension_numbers = #tpu.dot_dimension_numbers<[1], [0], [0], [1], [0, 0, 1, 1], [], []>} : vector<8x128xbf16>, vector<128x512xbf16>, vector<8x512xf32> -> vector<8x512xf32>
    %143 = arith.addf %140, %142 : vector<8x512xf32>
    %144 = vector.extract_strided_slice %143 {offsets = [0, 0], sizes = [8, 128], strides = [1, 1]} : vector<8x512xf32> to vector<8x128xf32>
    %cst_65 = arith.constant 5.000000e-01 : f32
    %145 = vector.broadcast %cst_65 : f32 to vector<8x128xf32>
    %146 = arith.mulf %145, %144 : vector<8x128xf32>
    %147 = math.tanh %146 : vector<8x128xf32>
    %cst_66 = arith.constant 5.000000e-01 : f32
    %148 = vector.broadcast %cst_66 : f32 to vector<8x128xf32>
    %149 = arith.mulf %148, %147 : vector<8x128xf32>
    %cst_67 = arith.constant 5.000000e-01 : f32
    %150 = vector.broadcast %cst_67 : f32 to vector<8x128xf32>
    %151 = arith.addf %149, %150 : vector<8x128xf32>
    %152 = vector.extract_strided_slice %143 {offsets = [0, 128], sizes = [8, 128], strides = [1, 1]} : vector<8x512xf32> to vector<8x128xf32>
    %cst_68 = arith.constant 5.000000e-01 : f32
    %153 = vector.broadcast %cst_68 : f32 to vector<8x128xf32>
    %154 = arith.mulf %153, %152 : vector<8x128xf32>
    %155 = math.tanh %154 : vector<8x128xf32>
    %cst_69 = arith.constant 5.000000e-01 : f32
    %156 = vector.broadcast %cst_69 : f32 to vector<8x128xf32>
    %157 = arith.mulf %156, %155 : vector<8x128xf32>
    %cst_70 = arith.constant 5.000000e-01 : f32
    %158 = vector.broadcast %cst_70 : f32 to vector<8x128xf32>
    %159 = arith.addf %157, %158 : vector<8x128xf32>
    %160 = vector.extract_strided_slice %143 {offsets = [0, 256], sizes = [8, 128], strides = [1, 1]} : vector<8x512xf32> to vector<8x128xf32>
    %161 = math.tanh %160 : vector<8x128xf32>
    %162 = vector.extract_strided_slice %143 {offsets = [0, 384], sizes = [8, 128], strides = [1, 1]} : vector<8x512xf32> to vector<8x128xf32>
    %cst_71 = arith.constant 5.000000e-01 : f32
    %163 = vector.broadcast %cst_71 : f32 to vector<8x128xf32>
    %164 = arith.mulf %163, %162 : vector<8x128xf32>
    %165 = math.tanh %164 : vector<8x128xf32>
    %cst_72 = arith.constant 5.000000e-01 : f32
    %166 = vector.broadcast %cst_72 : f32 to vector<8x128xf32>
    %167 = arith.mulf %166, %165 : vector<8x128xf32>
    %cst_73 = arith.constant 5.000000e-01 : f32
    %168 = vector.broadcast %cst_73 : f32 to vector<8x128xf32>
    %169 = arith.addf %167, %168 : vector<8x128xf32>
    %170 = arith.mulf %159, %121 : vector<8x128xf32>
    %171 = arith.mulf %151, %161 : vector<8x128xf32>
    %172 = arith.addf %170, %171 : vector<8x128xf32>
    %173 = math.tanh %172 : vector<8x128xf32>
    %174 = arith.mulf %169, %173 : vector<8x128xf32>
    %175 = arith.select %135, %174, %120 : vector<8x128xi1>, vector<8x128xf32>
    %176 = arith.select %135, %172, %121 : vector<8x128xi1>, vector<8x128xf32>
    %cst_74 = arith.constant 0.000000e+00 : f32
    %177 = vector.broadcast %cst_74 : f32 to vector<8x128xf32>
    %178 = arith.select %135, %174, %177 : vector<8x128xi1>, vector<8x128xf32>
    %c0_75 = arith.constant 0 : index
    %c2 = arith.constant 2 : index
    %c0_76 = arith.constant 0 : index
    %c0_77 = arith.constant 0 : index
    %179 = vector.load %arg9[%c0_75, %c2, %c0_76, %c0_77] : memref<1x16x8x128xf32, #tpu.memory_space<vmem>>, vector<1x1x8x128xf32>
    %180 = vector.shape_cast %179 : vector<1x1x8x128xf32> to vector<8x128xf32>
    %181 = vector.shape_cast %178 : vector<8x128xf32> to vector<1x1x8x128xf32>
    tpu.vector_store %arg9[%c0_75, %c2, %c0_76, %c0_77], %181 {strides = array<i32>} : memref<1x16x8x128xf32, #tpu.memory_space<vmem>>, vector<1x1x8x128xf32>,
    %c16_i32_78 = arith.constant 16 : i32
    %182 = arith.muli %arg1, %c16_i32_78 : i32
    %c3_i32 = arith.constant 3 : i32
    %183 = arith.addi %182, %c3_i32 : i32
    %c0_i32_79 = arith.constant 0 : i32
    %184 = arith.cmpi eq, %arg0, %c0_i32_79 : i32
    %c15_i32_80 = arith.constant 15 : i32
    %185 = arith.subi %c15_i32_80, %183 : i32
    %186 = arith.select %184, %183, %185 : i32
    %187 = vector.broadcast %186 : i32 to vector<8x1xi32>
    %188 = arith.cmpi slt, %187, %12 : vector<8x1xi32>
    %189 = vector.shape_cast %188 : vector<8x1xi1> to vector<8x1xi1>
    %190 = vector.broadcast %189 : vector<8x1xi1> to vector<8x128xi1>
    %c0_i32_81 = arith.constant 0 : i32
    %191 = arith.cmpi eq, %arg0, %c0_i32_81 : i32
    %c24_i32 = arith.constant 24 : i32
    %c96_i32 = arith.constant 96 : i32
    %192 = arith.select %191, %c24_i32, %c96_i32 : i32
    %193 = tpu.assume_multiple %192, 8 : i32
    %194 = arith.index_cast %193 : i32 to index
    %c0_82 = arith.constant 0 : index
    %195 = vector.load %arg14[%194, %c0_82] : memref<128x512xf32, #tpu.memory_space<vmem>>, vector<8x512xf32>
    %196 = arith.truncf %175 : vector<8x128xf32> to vector<8x128xbf16>
    %cst_83 = arith.constant dense<0.000000e+00> : vector<8x512xf32>
    %197 = tpu.matmul %196, %14, %cst_83 {dimension_numbers = #tpu.dot_dimension_numbers<[1], [0], [0], [1], [0, 0, 1, 1], [], []>} : vector<8x128xbf16>, vector<128x512xbf16>, vector<8x512xf32> -> vector<8x512xf32>
    %198 = arith.addf %195, %197 : vector<8x512xf32>
    %199 = vector.extract_strided_slice %198 {offsets = [0, 0], sizes = [8, 128], strides = [1, 1]} : vector<8x512xf32> to vector<8x128xf32>
    %cst_84 = arith.constant 5.000000e-01 : f32
    %200 = vector.broadcast %cst_84 : f32 to vector<8x128xf32>
    %201 = arith.mulf %200, %199 : vector<8x128xf32>
    %202 = math.tanh %201 : vector<8x128xf32>
    %cst_85 = arith.constant 5.000000e-01 : f32
    %203 = vector.broadcast %cst_85 : f32 to vector<8x128xf32>
    %204 = arith.mulf %203, %202 : vector<8x128xf32>
    %cst_86 = arith.constant 5.000000e-01 : f32
    %205 = vector.broadcast %cst_86 : f32 to vector<8x128xf32>
    %206 = arith.addf %204, %205 : vector<8x128xf32>
    %207 = vector.extract_strided_slice %198 {offsets = [0, 128], sizes = [8, 128], strides = [1, 1]} : vector<8x512xf32> to vector<8x128xf32>
    %cst_87 = arith.constant 5.000000e-01 : f32
    %208 = vector.broadcast %cst_87 : f32 to vector<8x128xf32>
    %209 = arith.mulf %208, %207 : vector<8x128xf32>
    %210 = math.tanh %209 : vector<8x128xf32>
    %cst_88 = arith.constant 5.000000e-01 : f32
    %211 = vector.broadcast %cst_88 : f32 to vector<8x128xf32>
    %212 = arith.mulf %211, %210 : vector<8x128xf32>
    %cst_89 = arith.constant 5.000000e-01 : f32
    %213 = vector.broadcast %cst_89 : f32 to vector<8x128xf32>
    %214 = arith.addf %212, %213 : vector<8x128xf32>
    %215 = vector.extract_strided_slice %198 {offsets = [0, 256], sizes = [8, 128], strides = [1, 1]} : vector<8x512xf32> to vector<8x128xf32>
    %216 = math.tanh %215 : vector<8x128xf32>
    %217 = vector.extract_strided_slice %198 {offsets = [0, 384], sizes = [8, 128], strides = [1, 1]} : vector<8x512xf32> to vector<8x128xf32>
    %cst_90 = arith.constant 5.000000e-01 : f32
    %218 = vector.broadcast %cst_90 : f32 to vector<8x128xf32>
    %219 = arith.mulf %218, %217 : vector<8x128xf32>
    %220 = math.tanh %219 : vector<8x128xf32>
    %cst_91 = arith.constant 5.000000e-01 : f32
    %221 = vector.broadcast %cst_91 : f32 to vector<8x128xf32>
    %222 = arith.mulf %221, %220 : vector<8x128xf32>
    %cst_92 = arith.constant 5.000000e-01 : f32
    %223 = vector.broadcast %cst_92 : f32 to vector<8x128xf32>
    %224 = arith.addf %222, %223 : vector<8x128xf32>
    %225 = arith.mulf %214, %176 : vector<8x128xf32>
    %226 = arith.mulf %206, %216 : vector<8x128xf32>
    %227 = arith.addf %225, %226 : vector<8x128xf32>
    %228 = math.tanh %227 : vector<8x128xf32>
    %229 = arith.mulf %224, %228 : vector<8x128xf32>
    %230 = arith.select %190, %229, %175 : vector<8x128xi1>, vector<8x128xf32>
    %231 = arith.select %190, %227, %176 : vector<8x128xi1>, vector<8x128xf32>
    %cst_93 = arith.constant 0.000000e+00 : f32
    %232 = vector.broadcast %cst_93 : f32 to vector<8x128xf32>
    %233 = arith.select %190, %229, %232 : vector<8x128xi1>, vector<8x128xf32>
    %c0_94 = arith.constant 0 : index
    %c3 = arith.constant 3 : index
    %c0_95 = arith.constant 0 : index
    %c0_96 = arith.constant 0 : index
    %234 = vector.load %arg9[%c0_94, %c3, %c0_95, %c0_96] : memref<1x16x8x128xf32, #tpu.memory_space<vmem>>, vector<1x1x8x128xf32>
    %235 = vector.shape_cast %234 : vector<1x1x8x128xf32> to vector<8x128xf32>
    %236 = vector.shape_cast %233 : vector<8x128xf32> to vector<1x1x8x128xf32>
    tpu.vector_store %arg9[%c0_94, %c3, %c0_95, %c0_96], %236 {strides = array<i32>} : memref<1x16x8x128xf32, #tpu.memory_space<vmem>>, vector<1x1x8x128xf32>,
    %c16_i32_97 = arith.constant 16 : i32
    %237 = arith.muli %arg1, %c16_i32_97 : i32
    %c4_i32 = arith.constant 4 : i32
    %238 = arith.addi %237, %c4_i32 : i32
    %c0_i32_98 = arith.constant 0 : i32
    %239 = arith.cmpi eq, %arg0, %c0_i32_98 : i32
    %c15_i32_99 = arith.constant 15 : i32
    %240 = arith.subi %c15_i32_99, %238 : i32
    %241 = arith.select %239, %238, %240 : i32
    %242 = vector.broadcast %241 : i32 to vector<8x1xi32>
    %243 = arith.cmpi slt, %242, %12 : vector<8x1xi32>
    %244 = vector.shape_cast %243 : vector<8x1xi1> to vector<8x1xi1>
    %245 = vector.broadcast %244 : vector<8x1xi1> to vector<8x128xi1>
    %c0_i32_100 = arith.constant 0 : i32
    %246 = arith.cmpi eq, %arg0, %c0_i32_100 : i32
    %c32_i32 = arith.constant 32 : i32
    %c88_i32 = arith.constant 88 : i32
    %247 = arith.select %246, %c32_i32, %c88_i32 : i32
    %248 = tpu.assume_multiple %247, 8 : i32
    %249 = arith.index_cast %248 : i32 to index
    %c0_101 = arith.constant 0 : index
    %250 = vector.load %arg14[%249, %c0_101] : memref<128x512xf32, #tpu.memory_space<vmem>>, vector<8x512xf32>
    %251 = arith.truncf %230 : vector<8x128xf32> to vector<8x128xbf16>
    %cst_102 = arith.constant dense<0.000000e+00> : vector<8x512xf32>
    %252 = tpu.matmul %251, %14, %cst_102 {dimension_numbers = #tpu.dot_dimension_numbers<[1], [0], [0], [1], [0, 0, 1, 1], [], []>} : vector<8x128xbf16>, vector<128x512xbf16>, vector<8x512xf32> -> vector<8x512xf32>
    %253 = arith.addf %250, %252 : vector<8x512xf32>
    %254 = vector.extract_strided_slice %253 {offsets = [0, 0], sizes = [8, 128], strides = [1, 1]} : vector<8x512xf32> to vector<8x128xf32>
    %cst_103 = arith.constant 5.000000e-01 : f32
    %255 = vector.broadcast %cst_103 : f32 to vector<8x128xf32>
    %256 = arith.mulf %255, %254 : vector<8x128xf32>
    %257 = math.tanh %256 : vector<8x128xf32>
    %cst_104 = arith.constant 5.000000e-01 : f32
    %258 = vector.broadcast %cst_104 : f32 to vector<8x128xf32>
    %259 = arith.mulf %258, %257 : vector<8x128xf32>
    %cst_105 = arith.constant 5.000000e-01 : f32
    %260 = vector.broadcast %cst_105 : f32 to vector<8x128xf32>
    %261 = arith.addf %259, %260 : vector<8x128xf32>
    %262 = vector.extract_strided_slice %253 {offsets = [0, 128], sizes = [8, 128], strides = [1, 1]} : vector<8x512xf32> to vector<8x128xf32>
    %cst_106 = arith.constant 5.000000e-01 : f32
    %263 = vector.broadcast %cst_106 : f32 to vector<8x128xf32>
    %264 = arith.mulf %263, %262 : vector<8x128xf32>
    %265 = math.tanh %264 : vector<8x128xf32>
    %cst_107 = arith.constant 5.000000e-01 : f32
    %266 = vector.broadcast %cst_107 : f32 to vector<8x128xf32>
    %267 = arith.mulf %266, %265 : vector<8x128xf32>
    %cst_108 = arith.constant 5.000000e-01 : f32
    %268 = vector.broadcast %cst_108 : f32 to vector<8x128xf32>
    %269 = arith.addf %267, %268 : vector<8x128xf32>
    %270 = vector.extract_strided_slice %253 {offsets = [0, 256], sizes = [8, 128], strides = [1, 1]} : vector<8x512xf32> to vector<8x128xf32>
    %271 = math.tanh %270 : vector<8x128xf32>
    %272 = vector.extract_strided_slice %253 {offsets = [0, 384], sizes = [8, 128], strides = [1, 1]} : vector<8x512xf32> to vector<8x128xf32>
    %cst_109 = arith.constant 5.000000e-01 : f32
    %273 = vector.broadcast %cst_109 : f32 to vector<8x128xf32>
    %274 = arith.mulf %273, %272 : vector<8x128xf32>
    %275 = math.tanh %274 : vector<8x128xf32>
    %cst_110 = arith.constant 5.000000e-01 : f32
    %276 = vector.broadcast %cst_110 : f32 to vector<8x128xf32>
    %277 = arith.mulf %276, %275 : vector<8x128xf32>
    %cst_111 = arith.constant 5.000000e-01 : f32
    %278 = vector.broadcast %cst_111 : f32 to vector<8x128xf32>
    %279 = arith.addf %277, %278 : vector<8x128xf32>
    %280 = arith.mulf %269, %231 : vector<8x128xf32>
    %281 = arith.mulf %261, %271 : vector<8x128xf32>
    %282 = arith.addf %280, %281 : vector<8x128xf32>
    %283 = math.tanh %282 : vector<8x128xf32>
    %284 = arith.mulf %279, %283 : vector<8x128xf32>
    %285 = arith.select %245, %284, %230 : vector<8x128xi1>, vector<8x128xf32>
    %286 = arith.select %245, %282, %231 : vector<8x128xi1>, vector<8x128xf32>
    %cst_112 = arith.constant 0.000000e+00 : f32
    %287 = vector.broadcast %cst_112 : f32 to vector<8x128xf32>
    %288 = arith.select %245, %284, %287 : vector<8x128xi1>, vector<8x128xf32>
    %c0_113 = arith.constant 0 : index
    %c4 = arith.constant 4 : index
    %c0_114 = arith.constant 0 : index
    %c0_115 = arith.constant 0 : index
    %289 = vector.load %arg9[%c0_113, %c4, %c0_114, %c0_115] : memref<1x16x8x128xf32, #tpu.memory_space<vmem>>, vector<1x1x8x128xf32>
    %290 = vector.shape_cast %289 : vector<1x1x8x128xf32> to vector<8x128xf32>
    %291 = vector.shape_cast %288 : vector<8x128xf32> to vector<1x1x8x128xf32>
    tpu.vector_store %arg9[%c0_113, %c4, %c0_114, %c0_115], %291 {strides = array<i32>} : memref<1x16x8x128xf32, #tpu.memory_space<vmem>>, vector<1x1x8x128xf32>,
    %c16_i32_116 = arith.constant 16 : i32
    %292 = arith.muli %arg1, %c16_i32_116 : i32
    %c5_i32 = arith.constant 5 : i32
    %293 = arith.addi %292, %c5_i32 : i32
    %c0_i32_117 = arith.constant 0 : i32
    %294 = arith.cmpi eq, %arg0, %c0_i32_117 : i32
    %c15_i32_118 = arith.constant 15 : i32
    %295 = arith.subi %c15_i32_118, %293 : i32
    %296 = arith.select %294, %293, %295 : i32
    %297 = vector.broadcast %296 : i32 to vector<8x1xi32>
    %298 = arith.cmpi slt, %297, %12 : vector<8x1xi32>
    %299 = vector.shape_cast %298 : vector<8x1xi1> to vector<8x1xi1>
    %300 = vector.broadcast %299 : vector<8x1xi1> to vector<8x128xi1>
    %c0_i32_119 = arith.constant 0 : i32
    %301 = arith.cmpi eq, %arg0, %c0_i32_119 : i32
    %c40_i32 = arith.constant 40 : i32
    %c80_i32 = arith.constant 80 : i32
    %302 = arith.select %301, %c40_i32, %c80_i32 : i32
    %303 = tpu.assume_multiple %302, 8 : i32
    %304 = arith.index_cast %303 : i32 to index
    %c0_120 = arith.constant 0 : index
    %305 = vector.load %arg14[%304, %c0_120] : memref<128x512xf32, #tpu.memory_space<vmem>>, vector<8x512xf32>
    %306 = arith.truncf %285 : vector<8x128xf32> to vector<8x128xbf16>
    %cst_121 = arith.constant dense<0.000000e+00> : vector<8x512xf32>
    %307 = tpu.matmul %306, %14, %cst_121 {dimension_numbers = #tpu.dot_dimension_numbers<[1], [0], [0], [1], [0, 0, 1, 1], [], []>} : vector<8x128xbf16>, vector<128x512xbf16>, vector<8x512xf32> -> vector<8x512xf32>
    %308 = arith.addf %305, %307 : vector<8x512xf32>
    %309 = vector.extract_strided_slice %308 {offsets = [0, 0], sizes = [8, 128], strides = [1, 1]} : vector<8x512xf32> to vector<8x128xf32>
    %cst_122 = arith.constant 5.000000e-01 : f32
    %310 = vector.broadcast %cst_122 : f32 to vector<8x128xf32>
    %311 = arith.mulf %310, %309 : vector<8x128xf32>
    %312 = math.tanh %311 : vector<8x128xf32>
    %cst_123 = arith.constant 5.000000e-01 : f32
    %313 = vector.broadcast %cst_123 : f32 to vector<8x128xf32>
    %314 = arith.mulf %313, %312 : vector<8x128xf32>
    %cst_124 = arith.constant 5.000000e-01 : f32
    %315 = vector.broadcast %cst_124 : f32 to vector<8x128xf32>
    %316 = arith.addf %314, %315 : vector<8x128xf32>
    %317 = vector.extract_strided_slice %308 {offsets = [0, 128], sizes = [8, 128], strides = [1, 1]} : vector<8x512xf32> to vector<8x128xf32>
    %cst_125 = arith.constant 5.000000e-01 : f32
    %318 = vector.broadcast %cst_125 : f32 to vector<8x128xf32>
    %319 = arith.mulf %318, %317 : vector<8x128xf32>
    %320 = math.tanh %319 : vector<8x128xf32>
    %cst_126 = arith.constant 5.000000e-01 : f32
    %321 = vector.broadcast %cst_126 : f32 to vector<8x128xf32>
    %322 = arith.mulf %321, %320 : vector<8x128xf32>
    %cst_127 = arith.constant 5.000000e-01 : f32
    %323 = vector.broadcast %cst_127 : f32 to vector<8x128xf32>
    %324 = arith.addf %322, %323 : vector<8x128xf32>
    %325 = vector.extract_strided_slice %308 {offsets = [0, 256], sizes = [8, 128], strides = [1, 1]} : vector<8x512xf32> to vector<8x128xf32>
    %326 = math.tanh %325 : vector<8x128xf32>
    %327 = vector.extract_strided_slice %308 {offsets = [0, 384], sizes = [8, 128], strides = [1, 1]} : vector<8x512xf32> to vector<8x128xf32>
    %cst_128 = arith.constant 5.000000e-01 : f32
    %328 = vector.broadcast %cst_128 : f32 to vector<8x128xf32>
    %329 = arith.mulf %328, %327 : vector<8x128xf32>
    %330 = math.tanh %329 : vector<8x128xf32>
    %cst_129 = arith.constant 5.000000e-01 : f32
    %331 = vector.broadcast %cst_129 : f32 to vector<8x128xf32>
    %332 = arith.mulf %331, %330 : vector<8x128xf32>
    %cst_130 = arith.constant 5.000000e-01 : f32
    %333 = vector.broadcast %cst_130 : f32 to vector<8x128xf32>
    %334 = arith.addf %332, %333 : vector<8x128xf32>
    %335 = arith.mulf %324, %286 : vector<8x128xf32>
    %336 = arith.mulf %316, %326 : vector<8x128xf32>
    %337 = arith.addf %335, %336 : vector<8x128xf32>
    %338 = math.tanh %337 : vector<8x128xf32>
    %339 = arith.mulf %334, %338 : vector<8x128xf32>
    %340 = arith.select %300, %339, %285 : vector<8x128xi1>, vector<8x128xf32>
    %341 = arith.select %300, %337, %286 : vector<8x128xi1>, vector<8x128xf32>
    %cst_131 = arith.constant 0.000000e+00 : f32
    %342 = vector.broadcast %cst_131 : f32 to vector<8x128xf32>
    %343 = arith.select %300, %339, %342 : vector<8x128xi1>, vector<8x128xf32>
    %c0_132 = arith.constant 0 : index
    %c5 = arith.constant 5 : index
    %c0_133 = arith.constant 0 : index
    %c0_134 = arith.constant 0 : index
    %344 = vector.load %arg9[%c0_132, %c5, %c0_133, %c0_134] : memref<1x16x8x128xf32, #tpu.memory_space<vmem>>, vector<1x1x8x128xf32>
    %345 = vector.shape_cast %344 : vector<1x1x8x128xf32> to vector<8x128xf32>
    %346 = vector.shape_cast %343 : vector<8x128xf32> to vector<1x1x8x128xf32>
    tpu.vector_store %arg9[%c0_132, %c5, %c0_133, %c0_134], %346 {strides = array<i32>} : memref<1x16x8x128xf32, #tpu.memory_space<vmem>>, vector<1x1x8x128xf32>,
    %c16_i32_135 = arith.constant 16 : i32
    %347 = arith.muli %arg1, %c16_i32_135 : i32
    %c6_i32 = arith.constant 6 : i32
    %348 = arith.addi %347, %c6_i32 : i32
    %c0_i32_136 = arith.constant 0 : i32
    %349 = arith.cmpi eq, %arg0, %c0_i32_136 : i32
    %c15_i32_137 = arith.constant 15 : i32
    %350 = arith.subi %c15_i32_137, %348 : i32
    %351 = arith.select %349, %348, %350 : i32
    %352 = vector.broadcast %351 : i32 to vector<8x1xi32>
    %353 = arith.cmpi slt, %352, %12 : vector<8x1xi32>
    %354 = vector.shape_cast %353 : vector<8x1xi1> to vector<8x1xi1>
    %355 = vector.broadcast %354 : vector<8x1xi1> to vector<8x128xi1>
    %c0_i32_138 = arith.constant 0 : i32
    %356 = arith.cmpi eq, %arg0, %c0_i32_138 : i32
    %c48_i32 = arith.constant 48 : i32
    %c72_i32 = arith.constant 72 : i32
    %357 = arith.select %356, %c48_i32, %c72_i32 : i32
    %358 = tpu.assume_multiple %357, 8 : i32
    %359 = arith.index_cast %358 : i32 to index
    %c0_139 = arith.constant 0 : index
    %360 = vector.load %arg14[%359, %c0_139] : memref<128x512xf32, #tpu.memory_space<vmem>>, vector<8x512xf32>
    %361 = arith.truncf %340 : vector<8x128xf32> to vector<8x128xbf16>
    %cst_140 = arith.constant dense<0.000000e+00> : vector<8x512xf32>
    %362 = tpu.matmul %361, %14, %cst_140 {dimension_numbers = #tpu.dot_dimension_numbers<[1], [0], [0], [1], [0, 0, 1, 1], [], []>} : vector<8x128xbf16>, vector<128x512xbf16>, vector<8x512xf32> -> vector<8x512xf32>
    %363 = arith.addf %360, %362 : vector<8x512xf32>
    %364 = vector.extract_strided_slice %363 {offsets = [0, 0], sizes = [8, 128], strides = [1, 1]} : vector<8x512xf32> to vector<8x128xf32>
    %cst_141 = arith.constant 5.000000e-01 : f32
    %365 = vector.broadcast %cst_141 : f32 to vector<8x128xf32>
    %366 = arith.mulf %365, %364 : vector<8x128xf32>
    %367 = math.tanh %366 : vector<8x128xf32>
    %cst_142 = arith.constant 5.000000e-01 : f32
    %368 = vector.broadcast %cst_142 : f32 to vector<8x128xf32>
    %369 = arith.mulf %368, %367 : vector<8x128xf32>
    %cst_143 = arith.constant 5.000000e-01 : f32
    %370 = vector.broadcast %cst_143 : f32 to vector<8x128xf32>
    %371 = arith.addf %369, %370 : vector<8x128xf32>
    %372 = vector.extract_strided_slice %363 {offsets = [0, 128], sizes = [8, 128], strides = [1, 1]} : vector<8x512xf32> to vector<8x128xf32>
    %cst_144 = arith.constant 5.000000e-01 : f32
    %373 = vector.broadcast %cst_144 : f32 to vector<8x128xf32>
    %374 = arith.mulf %373, %372 : vector<8x128xf32>
    %375 = math.tanh %374 : vector<8x128xf32>
    %cst_145 = arith.constant 5.000000e-01 : f32
    %376 = vector.broadcast %cst_145 : f32 to vector<8x128xf32>
    %377 = arith.mulf %376, %375 : vector<8x128xf32>
    %cst_146 = arith.constant 5.000000e-01 : f32
    %378 = vector.broadcast %cst_146 : f32 to vector<8x128xf32>
    %379 = arith.addf %377, %378 : vector<8x128xf32>
    %380 = vector.extract_strided_slice %363 {offsets = [0, 256], sizes = [8, 128], strides = [1, 1]} : vector<8x512xf32> to vector<8x128xf32>
    %381 = math.tanh %380 : vector<8x128xf32>
    %382 = vector.extract_strided_slice %363 {offsets = [0, 384], sizes = [8, 128], strides = [1, 1]} : vector<8x512xf32> to vector<8x128xf32>
    %cst_147 = arith.constant 5.000000e-01 : f32
    %383 = vector.broadcast %cst_147 : f32 to vector<8x128xf32>
    %384 = arith.mulf %383, %382 : vector<8x128xf32>
    %385 = math.tanh %384 : vector<8x128xf32>
    %cst_148 = arith.constant 5.000000e-01 : f32
    %386 = vector.broadcast %cst_148 : f32 to vector<8x128xf32>
    %387 = arith.mulf %386, %385 : vector<8x128xf32>
    %cst_149 = arith.constant 5.000000e-01 : f32
    %388 = vector.broadcast %cst_149 : f32 to vector<8x128xf32>
    %389 = arith.addf %387, %388 : vector<8x128xf32>
    %390 = arith.mulf %379, %341 : vector<8x128xf32>
    %391 = arith.mulf %371, %381 : vector<8x128xf32>
    %392 = arith.addf %390, %391 : vector<8x128xf32>
    %393 = math.tanh %392 : vector<8x128xf32>
    %394 = arith.mulf %389, %393 : vector<8x128xf32>
    %395 = arith.select %355, %394, %340 : vector<8x128xi1>, vector<8x128xf32>
    %396 = arith.select %355, %392, %341 : vector<8x128xi1>, vector<8x128xf32>
    %cst_150 = arith.constant 0.000000e+00 : f32
    %397 = vector.broadcast %cst_150 : f32 to vector<8x128xf32>
    %398 = arith.select %355, %394, %397 : vector<8x128xi1>, vector<8x128xf32>
    %c0_151 = arith.constant 0 : index
    %c6 = arith.constant 6 : index
    %c0_152 = arith.constant 0 : index
    %c0_153 = arith.constant 0 : index
    %399 = vector.load %arg9[%c0_151, %c6, %c0_152, %c0_153] : memref<1x16x8x128xf32, #tpu.memory_space<vmem>>, vector<1x1x8x128xf32>
    %400 = vector.shape_cast %399 : vector<1x1x8x128xf32> to vector<8x128xf32>
    %401 = vector.shape_cast %398 : vector<8x128xf32> to vector<1x1x8x128xf32>
    tpu.vector_store %arg9[%c0_151, %c6, %c0_152, %c0_153], %401 {strides = array<i32>} : memref<1x16x8x128xf32, #tpu.memory_space<vmem>>, vector<1x1x8x128xf32>,
    %c16_i32_154 = arith.constant 16 : i32
    %402 = arith.muli %arg1, %c16_i32_154 : i32
    %c7_i32 = arith.constant 7 : i32
    %403 = arith.addi %402, %c7_i32 : i32
    %c0_i32_155 = arith.constant 0 : i32
    %404 = arith.cmpi eq, %arg0, %c0_i32_155 : i32
    %c15_i32_156 = arith.constant 15 : i32
    %405 = arith.subi %c15_i32_156, %403 : i32
    %406 = arith.select %404, %403, %405 : i32
    %407 = vector.broadcast %406 : i32 to vector<8x1xi32>
    %408 = arith.cmpi slt, %407, %12 : vector<8x1xi32>
    %409 = vector.shape_cast %408 : vector<8x1xi1> to vector<8x1xi1>
    %410 = vector.broadcast %409 : vector<8x1xi1> to vector<8x128xi1>
    %c0_i32_157 = arith.constant 0 : i32
    %411 = arith.cmpi eq, %arg0, %c0_i32_157 : i32
    %c56_i32 = arith.constant 56 : i32
    %c64_i32 = arith.constant 64 : i32
    %412 = arith.select %411, %c56_i32, %c64_i32 : i32
    %413 = tpu.assume_multiple %412, 8 : i32
    %414 = arith.index_cast %413 : i32 to index
    %c0_158 = arith.constant 0 : index
    %415 = vector.load %arg14[%414, %c0_158] : memref<128x512xf32, #tpu.memory_space<vmem>>, vector<8x512xf32>
    %416 = arith.truncf %395 : vector<8x128xf32> to vector<8x128xbf16>
    %cst_159 = arith.constant dense<0.000000e+00> : vector<8x512xf32>
    %417 = tpu.matmul %416, %14, %cst_159 {dimension_numbers = #tpu.dot_dimension_numbers<[1], [0], [0], [1], [0, 0, 1, 1], [], []>} : vector<8x128xbf16>, vector<128x512xbf16>, vector<8x512xf32> -> vector<8x512xf32>
    %418 = arith.addf %415, %417 : vector<8x512xf32>
    %419 = vector.extract_strided_slice %418 {offsets = [0, 0], sizes = [8, 128], strides = [1, 1]} : vector<8x512xf32> to vector<8x128xf32>
    %cst_160 = arith.constant 5.000000e-01 : f32
    %420 = vector.broadcast %cst_160 : f32 to vector<8x128xf32>
    %421 = arith.mulf %420, %419 : vector<8x128xf32>
    %422 = math.tanh %421 : vector<8x128xf32>
    %cst_161 = arith.constant 5.000000e-01 : f32
    %423 = vector.broadcast %cst_161 : f32 to vector<8x128xf32>
    %424 = arith.mulf %423, %422 : vector<8x128xf32>
    %cst_162 = arith.constant 5.000000e-01 : f32
    %425 = vector.broadcast %cst_162 : f32 to vector<8x128xf32>
    %426 = arith.addf %424, %425 : vector<8x128xf32>
    %427 = vector.extract_strided_slice %418 {offsets = [0, 128], sizes = [8, 128], strides = [1, 1]} : vector<8x512xf32> to vector<8x128xf32>
    %cst_163 = arith.constant 5.000000e-01 : f32
    %428 = vector.broadcast %cst_163 : f32 to vector<8x128xf32>
    %429 = arith.mulf %428, %427 : vector<8x128xf32>
    %430 = math.tanh %429 : vector<8x128xf32>
    %cst_164 = arith.constant 5.000000e-01 : f32
    %431 = vector.broadcast %cst_164 : f32 to vector<8x128xf32>
    %432 = arith.mulf %431, %430 : vector<8x128xf32>
    %cst_165 = arith.constant 5.000000e-01 : f32
    %433 = vector.broadcast %cst_165 : f32 to vector<8x128xf32>
    %434 = arith.addf %432, %433 : vector<8x128xf32>
    %435 = vector.extract_strided_slice %418 {offsets = [0, 256], sizes = [8, 128], strides = [1, 1]} : vector<8x512xf32> to vector<8x128xf32>
    %436 = math.tanh %435 : vector<8x128xf32>
    %437 = vector.extract_strided_slice %418 {offsets = [0, 384], sizes = [8, 128], strides = [1, 1]} : vector<8x512xf32> to vector<8x128xf32>
    %cst_166 = arith.constant 5.000000e-01 : f32
    %438 = vector.broadcast %cst_166 : f32 to vector<8x128xf32>
    %439 = arith.mulf %438, %437 : vector<8x128xf32>
    %440 = math.tanh %439 : vector<8x128xf32>
    %cst_167 = arith.constant 5.000000e-01 : f32
    %441 = vector.broadcast %cst_167 : f32 to vector<8x128xf32>
    %442 = arith.mulf %441, %440 : vector<8x128xf32>
    %cst_168 = arith.constant 5.000000e-01 : f32
    %443 = vector.broadcast %cst_168 : f32 to vector<8x128xf32>
    %444 = arith.addf %442, %443 : vector<8x128xf32>
    %445 = arith.mulf %434, %396 : vector<8x128xf32>
    %446 = arith.mulf %426, %436 : vector<8x128xf32>
    %447 = arith.addf %445, %446 : vector<8x128xf32>
    %448 = math.tanh %447 : vector<8x128xf32>
    %449 = arith.mulf %444, %448 : vector<8x128xf32>
    %450 = arith.select %410, %449, %395 : vector<8x128xi1>, vector<8x128xf32>
    %451 = arith.select %410, %447, %396 : vector<8x128xi1>, vector<8x128xf32>
    %cst_169 = arith.constant 0.000000e+00 : f32
    %452 = vector.broadcast %cst_169 : f32 to vector<8x128xf32>
    %453 = arith.select %410, %449, %452 : vector<8x128xi1>, vector<8x128xf32>
    %c0_170 = arith.constant 0 : index
    %c7 = arith.constant 7 : index
    %c0_171 = arith.constant 0 : index
    %c0_172 = arith.constant 0 : index
    %454 = vector.load %arg9[%c0_170, %c7, %c0_171, %c0_172] : memref<1x16x8x128xf32, #tpu.memory_space<vmem>>, vector<1x1x8x128xf32>
    %455 = vector.shape_cast %454 : vector<1x1x8x128xf32> to vector<8x128xf32>
    %456 = vector.shape_cast %453 : vector<8x128xf32> to vector<1x1x8x128xf32>
    tpu.vector_store %arg9[%c0_170, %c7, %c0_171, %c0_172], %456 {strides = array<i32>} : memref<1x16x8x128xf32, #tpu.memory_space<vmem>>, vector<1x1x8x128xf32>,
    %c16_i32_173 = arith.constant 16 : i32
    %457 = arith.muli %arg1, %c16_i32_173 : i32
    %c8_i32_174 = arith.constant 8 : i32
    %458 = arith.addi %457, %c8_i32_174 : i32
    %c0_i32_175 = arith.constant 0 : i32
    %459 = arith.cmpi eq, %arg0, %c0_i32_175 : i32
    %c15_i32_176 = arith.constant 15 : i32
    %460 = arith.subi %c15_i32_176, %458 : i32
    %461 = arith.select %459, %458, %460 : i32
    %462 = vector.broadcast %461 : i32 to vector<8x1xi32>
    %463 = arith.cmpi slt, %462, %12 : vector<8x1xi32>
    %464 = vector.shape_cast %463 : vector<8x1xi1> to vector<8x1xi1>
    %465 = vector.broadcast %464 : vector<8x1xi1> to vector<8x128xi1>
    %c0_i32_177 = arith.constant 0 : i32
    %466 = arith.cmpi eq, %arg0, %c0_i32_177 : i32
    %c64_i32_178 = arith.constant 64 : i32
    %c56_i32_179 = arith.constant 56 : i32
    %467 = arith.select %466, %c64_i32_178, %c56_i32_179 : i32
    %468 = tpu.assume_multiple %467, 8 : i32
    %469 = arith.index_cast %468 : i32 to index
    %c0_180 = arith.constant 0 : index
    %470 = vector.load %arg14[%469, %c0_180] : memref<128x512xf32, #tpu.memory_space<vmem>>, vector<8x512xf32>
    %471 = arith.truncf %450 : vector<8x128xf32> to vector<8x128xbf16>
    %cst_181 = arith.constant dense<0.000000e+00> : vector<8x512xf32>
    %472 = tpu.matmul %471, %14, %cst_181 {dimension_numbers = #tpu.dot_dimension_numbers<[1], [0], [0], [1], [0, 0, 1, 1], [], []>} : vector<8x128xbf16>, vector<128x512xbf16>, vector<8x512xf32> -> vector<8x512xf32>
    %473 = arith.addf %470, %472 : vector<8x512xf32>
    %474 = vector.extract_strided_slice %473 {offsets = [0, 0], sizes = [8, 128], strides = [1, 1]} : vector<8x512xf32> to vector<8x128xf32>
    %cst_182 = arith.constant 5.000000e-01 : f32
    %475 = vector.broadcast %cst_182 : f32 to vector<8x128xf32>
    %476 = arith.mulf %475, %474 : vector<8x128xf32>
    %477 = math.tanh %476 : vector<8x128xf32>
    %cst_183 = arith.constant 5.000000e-01 : f32
    %478 = vector.broadcast %cst_183 : f32 to vector<8x128xf32>
    %479 = arith.mulf %478, %477 : vector<8x128xf32>
    %cst_184 = arith.constant 5.000000e-01 : f32
    %480 = vector.broadcast %cst_184 : f32 to vector<8x128xf32>
    %481 = arith.addf %479, %480 : vector<8x128xf32>
    %482 = vector.extract_strided_slice %473 {offsets = [0, 128], sizes = [8, 128], strides = [1, 1]} : vector<8x512xf32> to vector<8x128xf32>
    %cst_185 = arith.constant 5.000000e-01 : f32
    %483 = vector.broadcast %cst_185 : f32 to vector<8x128xf32>
    %484 = arith.mulf %483, %482 : vector<8x128xf32>
    %485 = math.tanh %484 : vector<8x128xf32>
    %cst_186 = arith.constant 5.000000e-01 : f32
    %486 = vector.broadcast %cst_186 : f32 to vector<8x128xf32>
    %487 = arith.mulf %486, %485 : vector<8x128xf32>
    %cst_187 = arith.constant 5.000000e-01 : f32
    %488 = vector.broadcast %cst_187 : f32 to vector<8x128xf32>
    %489 = arith.addf %487, %488 : vector<8x128xf32>
    %490 = vector.extract_strided_slice %473 {offsets = [0, 256], sizes = [8, 128], strides = [1, 1]} : vector<8x512xf32> to vector<8x128xf32>
    %491 = math.tanh %490 : vector<8x128xf32>
    %492 = vector.extract_strided_slice %473 {offsets = [0, 384], sizes = [8, 128], strides = [1, 1]} : vector<8x512xf32> to vector<8x128xf32>
    %cst_188 = arith.constant 5.000000e-01 : f32
    %493 = vector.broadcast %cst_188 : f32 to vector<8x128xf32>
    %494 = arith.mulf %493, %492 : vector<8x128xf32>
    %495 = math.tanh %494 : vector<8x128xf32>
    %cst_189 = arith.constant 5.000000e-01 : f32
    %496 = vector.broadcast %cst_189 : f32 to vector<8x128xf32>
    %497 = arith.mulf %496, %495 : vector<8x128xf32>
    %cst_190 = arith.constant 5.000000e-01 : f32
    %498 = vector.broadcast %cst_190 : f32 to vector<8x128xf32>
    %499 = arith.addf %497, %498 : vector<8x128xf32>
    %500 = arith.mulf %489, %451 : vector<8x128xf32>
    %501 = arith.mulf %481, %491 : vector<8x128xf32>
    %502 = arith.addf %500, %501 : vector<8x128xf32>
    %503 = math.tanh %502 : vector<8x128xf32>
    %504 = arith.mulf %499, %503 : vector<8x128xf32>
    %505 = arith.select %465, %504, %450 : vector<8x128xi1>, vector<8x128xf32>
    %506 = arith.select %465, %502, %451 : vector<8x128xi1>, vector<8x128xf32>
    %cst_191 = arith.constant 0.000000e+00 : f32
    %507 = vector.broadcast %cst_191 : f32 to vector<8x128xf32>
    %508 = arith.select %465, %504, %507 : vector<8x128xi1>, vector<8x128xf32>
    %c0_192 = arith.constant 0 : index
    %c8 = arith.constant 8 : index
    %c0_193 = arith.constant 0 : index
    %c0_194 = arith.constant 0 : index
    %509 = vector.load %arg9[%c0_192, %c8, %c0_193, %c0_194] : memref<1x16x8x128xf32, #tpu.memory_space<vmem>>, vector<1x1x8x128xf32>
    %510 = vector.shape_cast %509 : vector<1x1x8x128xf32> to vector<8x128xf32>
    %511 = vector.shape_cast %508 : vector<8x128xf32> to vector<1x1x8x128xf32>
    tpu.vector_store %arg9[%c0_192, %c8, %c0_193, %c0_194], %511 {strides = array<i32>} : memref<1x16x8x128xf32, #tpu.memory_space<vmem>>, vector<1x1x8x128xf32>,
    %c16_i32_195 = arith.constant 16 : i32
    %512 = arith.muli %arg1, %c16_i32_195 : i32
    %c9_i32 = arith.constant 9 : i32
    %513 = arith.addi %512, %c9_i32 : i32
    %c0_i32_196 = arith.constant 0 : i32
    %514 = arith.cmpi eq, %arg0, %c0_i32_196 : i32
    %c15_i32_197 = arith.constant 15 : i32
    %515 = arith.subi %c15_i32_197, %513 : i32
    %516 = arith.select %514, %513, %515 : i32
    %517 = vector.broadcast %516 : i32 to vector<8x1xi32>
    %518 = arith.cmpi slt, %517, %12 : vector<8x1xi32>
    %519 = vector.shape_cast %518 : vector<8x1xi1> to vector<8x1xi1>
    %520 = vector.broadcast %519 : vector<8x1xi1> to vector<8x128xi1>
    %c0_i32_198 = arith.constant 0 : i32
    %521 = arith.cmpi eq, %arg0, %c0_i32_198 : i32
    %c72_i32_199 = arith.constant 72 : i32
    %c48_i32_200 = arith.constant 48 : i32
    %522 = arith.select %521, %c72_i32_199, %c48_i32_200 : i32
    %523 = tpu.assume_multiple %522, 8 : i32
    %524 = arith.index_cast %523 : i32 to index
    %c0_201 = arith.constant 0 : index
    %525 = vector.load %arg14[%524, %c0_201] : memref<128x512xf32, #tpu.memory_space<vmem>>, vector<8x512xf32>
    %526 = arith.truncf %505 : vector<8x128xf32> to vector<8x128xbf16>
    %cst_202 = arith.constant dense<0.000000e+00> : vector<8x512xf32>
    %527 = tpu.matmul %526, %14, %cst_202 {dimension_numbers = #tpu.dot_dimension_numbers<[1], [0], [0], [1], [0, 0, 1, 1], [], []>} : vector<8x128xbf16>, vector<128x512xbf16>, vector<8x512xf32> -> vector<8x512xf32>
    %528 = arith.addf %525, %527 : vector<8x512xf32>
    %529 = vector.extract_strided_slice %528 {offsets = [0, 0], sizes = [8, 128], strides = [1, 1]} : vector<8x512xf32> to vector<8x128xf32>
    %cst_203 = arith.constant 5.000000e-01 : f32
    %530 = vector.broadcast %cst_203 : f32 to vector<8x128xf32>
    %531 = arith.mulf %530, %529 : vector<8x128xf32>
    %532 = math.tanh %531 : vector<8x128xf32>
    %cst_204 = arith.constant 5.000000e-01 : f32
    %533 = vector.broadcast %cst_204 : f32 to vector<8x128xf32>
    %534 = arith.mulf %533, %532 : vector<8x128xf32>
    %cst_205 = arith.constant 5.000000e-01 : f32
    %535 = vector.broadcast %cst_205 : f32 to vector<8x128xf32>
    %536 = arith.addf %534, %535 : vector<8x128xf32>
    %537 = vector.extract_strided_slice %528 {offsets = [0, 128], sizes = [8, 128], strides = [1, 1]} : vector<8x512xf32> to vector<8x128xf32>
    %cst_206 = arith.constant 5.000000e-01 : f32
    %538 = vector.broadcast %cst_206 : f32 to vector<8x128xf32>
    %539 = arith.mulf %538, %537 : vector<8x128xf32>
    %540 = math.tanh %539 : vector<8x128xf32>
    %cst_207 = arith.constant 5.000000e-01 : f32
    %541 = vector.broadcast %cst_207 : f32 to vector<8x128xf32>
    %542 = arith.mulf %541, %540 : vector<8x128xf32>
    %cst_208 = arith.constant 5.000000e-01 : f32
    %543 = vector.broadcast %cst_208 : f32 to vector<8x128xf32>
    %544 = arith.addf %542, %543 : vector<8x128xf32>
    %545 = vector.extract_strided_slice %528 {offsets = [0, 256], sizes = [8, 128], strides = [1, 1]} : vector<8x512xf32> to vector<8x128xf32>
    %546 = math.tanh %545 : vector<8x128xf32>
    %547 = vector.extract_strided_slice %528 {offsets = [0, 384], sizes = [8, 128], strides = [1, 1]} : vector<8x512xf32> to vector<8x128xf32>
    %cst_209 = arith.constant 5.000000e-01 : f32
    %548 = vector.broadcast %cst_209 : f32 to vector<8x128xf32>
    %549 = arith.mulf %548, %547 : vector<8x128xf32>
    %550 = math.tanh %549 : vector<8x128xf32>
    %cst_210 = arith.constant 5.000000e-01 : f32
    %551 = vector.broadcast %cst_210 : f32 to vector<8x128xf32>
    %552 = arith.mulf %551, %550 : vector<8x128xf32>
    %cst_211 = arith.constant 5.000000e-01 : f32
    %553 = vector.broadcast %cst_211 : f32 to vector<8x128xf32>
    %554 = arith.addf %552, %553 : vector<8x128xf32>
    %555 = arith.mulf %544, %506 : vector<8x128xf32>
    %556 = arith.mulf %536, %546 : vector<8x128xf32>
    %557 = arith.addf %555, %556 : vector<8x128xf32>
    %558 = math.tanh %557 : vector<8x128xf32>
    %559 = arith.mulf %554, %558 : vector<8x128xf32>
    %560 = arith.select %520, %559, %505 : vector<8x128xi1>, vector<8x128xf32>
    %561 = arith.select %520, %557, %506 : vector<8x128xi1>, vector<8x128xf32>
    %cst_212 = arith.constant 0.000000e+00 : f32
    %562 = vector.broadcast %cst_212 : f32 to vector<8x128xf32>
    %563 = arith.select %520, %559, %562 : vector<8x128xi1>, vector<8x128xf32>
    %c0_213 = arith.constant 0 : index
    %c9 = arith.constant 9 : index
    %c0_214 = arith.constant 0 : index
    %c0_215 = arith.constant 0 : index
    %564 = vector.load %arg9[%c0_213, %c9, %c0_214, %c0_215] : memref<1x16x8x128xf32, #tpu.memory_space<vmem>>, vector<1x1x8x128xf32>
    %565 = vector.shape_cast %564 : vector<1x1x8x128xf32> to vector<8x128xf32>
    %566 = vector.shape_cast %563 : vector<8x128xf32> to vector<1x1x8x128xf32>
    tpu.vector_store %arg9[%c0_213, %c9, %c0_214, %c0_215], %566 {strides = array<i32>} : memref<1x16x8x128xf32, #tpu.memory_space<vmem>>, vector<1x1x8x128xf32>,
    %c16_i32_216 = arith.constant 16 : i32
    %567 = arith.muli %arg1, %c16_i32_216 : i32
    %c10_i32 = arith.constant 10 : i32
    %568 = arith.addi %567, %c10_i32 : i32
    %c0_i32_217 = arith.constant 0 : i32
    %569 = arith.cmpi eq, %arg0, %c0_i32_217 : i32
    %c15_i32_218 = arith.constant 15 : i32
    %570 = arith.subi %c15_i32_218, %568 : i32
    %571 = arith.select %569, %568, %570 : i32
    %572 = vector.broadcast %571 : i32 to vector<8x1xi32>
    %573 = arith.cmpi slt, %572, %12 : vector<8x1xi32>
    %574 = vector.shape_cast %573 : vector<8x1xi1> to vector<8x1xi1>
    %575 = vector.broadcast %574 : vector<8x1xi1> to vector<8x128xi1>
    %c0_i32_219 = arith.constant 0 : i32
    %576 = arith.cmpi eq, %arg0, %c0_i32_219 : i32
    %c80_i32_220 = arith.constant 80 : i32
    %c40_i32_221 = arith.constant 40 : i32
    %577 = arith.select %576, %c80_i32_220, %c40_i32_221 : i32
    %578 = tpu.assume_multiple %577, 8 : i32
    %579 = arith.index_cast %578 : i32 to index
    %c0_222 = arith.constant 0 : index
    %580 = vector.load %arg14[%579, %c0_222] : memref<128x512xf32, #tpu.memory_space<vmem>>, vector<8x512xf32>
    %581 = arith.truncf %560 : vector<8x128xf32> to vector<8x128xbf16>
    %cst_223 = arith.constant dense<0.000000e+00> : vector<8x512xf32>
    %582 = tpu.matmul %581, %14, %cst_223 {dimension_numbers = #tpu.dot_dimension_numbers<[1], [0], [0], [1], [0, 0, 1, 1], [], []>} : vector<8x128xbf16>, vector<128x512xbf16>, vector<8x512xf32> -> vector<8x512xf32>
    %583 = arith.addf %580, %582 : vector<8x512xf32>
    %584 = vector.extract_strided_slice %583 {offsets = [0, 0], sizes = [8, 128], strides = [1, 1]} : vector<8x512xf32> to vector<8x128xf32>
    %cst_224 = arith.constant 5.000000e-01 : f32
    %585 = vector.broadcast %cst_224 : f32 to vector<8x128xf32>
    %586 = arith.mulf %585, %584 : vector<8x128xf32>
    %587 = math.tanh %586 : vector<8x128xf32>
    %cst_225 = arith.constant 5.000000e-01 : f32
    %588 = vector.broadcast %cst_225 : f32 to vector<8x128xf32>
    %589 = arith.mulf %588, %587 : vector<8x128xf32>
    %cst_226 = arith.constant 5.000000e-01 : f32
    %590 = vector.broadcast %cst_226 : f32 to vector<8x128xf32>
    %591 = arith.addf %589, %590 : vector<8x128xf32>
    %592 = vector.extract_strided_slice %583 {offsets = [0, 128], sizes = [8, 128], strides = [1, 1]} : vector<8x512xf32> to vector<8x128xf32>
    %cst_227 = arith.constant 5.000000e-01 : f32
    %593 = vector.broadcast %cst_227 : f32 to vector<8x128xf32>
    %594 = arith.mulf %593, %592 : vector<8x128xf32>
    %595 = math.tanh %594 : vector<8x128xf32>
    %cst_228 = arith.constant 5.000000e-01 : f32
    %596 = vector.broadcast %cst_228 : f32 to vector<8x128xf32>
    %597 = arith.mulf %596, %595 : vector<8x128xf32>
    %cst_229 = arith.constant 5.000000e-01 : f32
    %598 = vector.broadcast %cst_229 : f32 to vector<8x128xf32>
    %599 = arith.addf %597, %598 : vector<8x128xf32>
    %600 = vector.extract_strided_slice %583 {offsets = [0, 256], sizes = [8, 128], strides = [1, 1]} : vector<8x512xf32> to vector<8x128xf32>
    %601 = math.tanh %600 : vector<8x128xf32>
    %602 = vector.extract_strided_slice %583 {offsets = [0, 384], sizes = [8, 128], strides = [1, 1]} : vector<8x512xf32> to vector<8x128xf32>
    %cst_230 = arith.constant 5.000000e-01 : f32
    %603 = vector.broadcast %cst_230 : f32 to vector<8x128xf32>
    %604 = arith.mulf %603, %602 : vector<8x128xf32>
    %605 = math.tanh %604 : vector<8x128xf32>
    %cst_231 = arith.constant 5.000000e-01 : f32
    %606 = vector.broadcast %cst_231 : f32 to vector<8x128xf32>
    %607 = arith.mulf %606, %605 : vector<8x128xf32>
    %cst_232 = arith.constant 5.000000e-01 : f32
    %608 = vector.broadcast %cst_232 : f32 to vector<8x128xf32>
    %609 = arith.addf %607, %608 : vector<8x128xf32>
    %610 = arith.mulf %599, %561 : vector<8x128xf32>
    %611 = arith.mulf %591, %601 : vector<8x128xf32>
    %612 = arith.addf %610, %611 : vector<8x128xf32>
    %613 = math.tanh %612 : vector<8x128xf32>
    %614 = arith.mulf %609, %613 : vector<8x128xf32>
    %615 = arith.select %575, %614, %560 : vector<8x128xi1>, vector<8x128xf32>
    %616 = arith.select %575, %612, %561 : vector<8x128xi1>, vector<8x128xf32>
    %cst_233 = arith.constant 0.000000e+00 : f32
    %617 = vector.broadcast %cst_233 : f32 to vector<8x128xf32>
    %618 = arith.select %575, %614, %617 : vector<8x128xi1>, vector<8x128xf32>
    %c0_234 = arith.constant 0 : index
    %c10 = arith.constant 10 : index
    %c0_235 = arith.constant 0 : index
    %c0_236 = arith.constant 0 : index
    %619 = vector.load %arg9[%c0_234, %c10, %c0_235, %c0_236] : memref<1x16x8x128xf32, #tpu.memory_space<vmem>>, vector<1x1x8x128xf32>
    %620 = vector.shape_cast %619 : vector<1x1x8x128xf32> to vector<8x128xf32>
    %621 = vector.shape_cast %618 : vector<8x128xf32> to vector<1x1x8x128xf32>
    tpu.vector_store %arg9[%c0_234, %c10, %c0_235, %c0_236], %621 {strides = array<i32>} : memref<1x16x8x128xf32, #tpu.memory_space<vmem>>, vector<1x1x8x128xf32>,
    %c16_i32_237 = arith.constant 16 : i32
    %622 = arith.muli %arg1, %c16_i32_237 : i32
    %c11_i32 = arith.constant 11 : i32
    %623 = arith.addi %622, %c11_i32 : i32
    %c0_i32_238 = arith.constant 0 : i32
    %624 = arith.cmpi eq, %arg0, %c0_i32_238 : i32
    %c15_i32_239 = arith.constant 15 : i32
    %625 = arith.subi %c15_i32_239, %623 : i32
    %626 = arith.select %624, %623, %625 : i32
    %627 = vector.broadcast %626 : i32 to vector<8x1xi32>
    %628 = arith.cmpi slt, %627, %12 : vector<8x1xi32>
    %629 = vector.shape_cast %628 : vector<8x1xi1> to vector<8x1xi1>
    %630 = vector.broadcast %629 : vector<8x1xi1> to vector<8x128xi1>
    %c0_i32_240 = arith.constant 0 : i32
    %631 = arith.cmpi eq, %arg0, %c0_i32_240 : i32
    %c88_i32_241 = arith.constant 88 : i32
    %c32_i32_242 = arith.constant 32 : i32
    %632 = arith.select %631, %c88_i32_241, %c32_i32_242 : i32
    %633 = tpu.assume_multiple %632, 8 : i32
    %634 = arith.index_cast %633 : i32 to index
    %c0_243 = arith.constant 0 : index
    %635 = vector.load %arg14[%634, %c0_243] : memref<128x512xf32, #tpu.memory_space<vmem>>, vector<8x512xf32>
    %636 = arith.truncf %615 : vector<8x128xf32> to vector<8x128xbf16>
    %cst_244 = arith.constant dense<0.000000e+00> : vector<8x512xf32>
    %637 = tpu.matmul %636, %14, %cst_244 {dimension_numbers = #tpu.dot_dimension_numbers<[1], [0], [0], [1], [0, 0, 1, 1], [], []>} : vector<8x128xbf16>, vector<128x512xbf16>, vector<8x512xf32> -> vector<8x512xf32>
    %638 = arith.addf %635, %637 : vector<8x512xf32>
    %639 = vector.extract_strided_slice %638 {offsets = [0, 0], sizes = [8, 128], strides = [1, 1]} : vector<8x512xf32> to vector<8x128xf32>
    %cst_245 = arith.constant 5.000000e-01 : f32
    %640 = vector.broadcast %cst_245 : f32 to vector<8x128xf32>
    %641 = arith.mulf %640, %639 : vector<8x128xf32>
    %642 = math.tanh %641 : vector<8x128xf32>
    %cst_246 = arith.constant 5.000000e-01 : f32
    %643 = vector.broadcast %cst_246 : f32 to vector<8x128xf32>
    %644 = arith.mulf %643, %642 : vector<8x128xf32>
    %cst_247 = arith.constant 5.000000e-01 : f32
    %645 = vector.broadcast %cst_247 : f32 to vector<8x128xf32>
    %646 = arith.addf %644, %645 : vector<8x128xf32>
    %647 = vector.extract_strided_slice %638 {offsets = [0, 128], sizes = [8, 128], strides = [1, 1]} : vector<8x512xf32> to vector<8x128xf32>
    %cst_248 = arith.constant 5.000000e-01 : f32
    %648 = vector.broadcast %cst_248 : f32 to vector<8x128xf32>
    %649 = arith.mulf %648, %647 : vector<8x128xf32>
    %650 = math.tanh %649 : vector<8x128xf32>
    %cst_249 = arith.constant 5.000000e-01 : f32
    %651 = vector.broadcast %cst_249 : f32 to vector<8x128xf32>
    %652 = arith.mulf %651, %650 : vector<8x128xf32>
    %cst_250 = arith.constant 5.000000e-01 : f32
    %653 = vector.broadcast %cst_250 : f32 to vector<8x128xf32>
    %654 = arith.addf %652, %653 : vector<8x128xf32>
    %655 = vector.extract_strided_slice %638 {offsets = [0, 256], sizes = [8, 128], strides = [1, 1]} : vector<8x512xf32> to vector<8x128xf32>
    %656 = math.tanh %655 : vector<8x128xf32>
    %657 = vector.extract_strided_slice %638 {offsets = [0, 384], sizes = [8, 128], strides = [1, 1]} : vector<8x512xf32> to vector<8x128xf32>
    %cst_251 = arith.constant 5.000000e-01 : f32
    %658 = vector.broadcast %cst_251 : f32 to vector<8x128xf32>
    %659 = arith.mulf %658, %657 : vector<8x128xf32>
    %660 = math.tanh %659 : vector<8x128xf32>
    %cst_252 = arith.constant 5.000000e-01 : f32
    %661 = vector.broadcast %cst_252 : f32 to vector<8x128xf32>
    %662 = arith.mulf %661, %660 : vector<8x128xf32>
    %cst_253 = arith.constant 5.000000e-01 : f32
    %663 = vector.broadcast %cst_253 : f32 to vector<8x128xf32>
    %664 = arith.addf %662, %663 : vector<8x128xf32>
    %665 = arith.mulf %654, %616 : vector<8x128xf32>
    %666 = arith.mulf %646, %656 : vector<8x128xf32>
    %667 = arith.addf %665, %666 : vector<8x128xf32>
    %668 = math.tanh %667 : vector<8x128xf32>
    %669 = arith.mulf %664, %668 : vector<8x128xf32>
    %670 = arith.select %630, %669, %615 : vector<8x128xi1>, vector<8x128xf32>
    %671 = arith.select %630, %667, %616 : vector<8x128xi1>, vector<8x128xf32>
    %cst_254 = arith.constant 0.000000e+00 : f32
    %672 = vector.broadcast %cst_254 : f32 to vector<8x128xf32>
    %673 = arith.select %630, %669, %672 : vector<8x128xi1>, vector<8x128xf32>
    %c0_255 = arith.constant 0 : index
    %c11 = arith.constant 11 : index
    %c0_256 = arith.constant 0 : index
    %c0_257 = arith.constant 0 : index
    %674 = vector.load %arg9[%c0_255, %c11, %c0_256, %c0_257] : memref<1x16x8x128xf32, #tpu.memory_space<vmem>>, vector<1x1x8x128xf32>
    %675 = vector.shape_cast %674 : vector<1x1x8x128xf32> to vector<8x128xf32>
    %676 = vector.shape_cast %673 : vector<8x128xf32> to vector<1x1x8x128xf32>
    tpu.vector_store %arg9[%c0_255, %c11, %c0_256, %c0_257], %676 {strides = array<i32>} : memref<1x16x8x128xf32, #tpu.memory_space<vmem>>, vector<1x1x8x128xf32>,
    %c16_i32_258 = arith.constant 16 : i32
    %677 = arith.muli %arg1, %c16_i32_258 : i32
    %c12_i32 = arith.constant 12 : i32
    %678 = arith.addi %677, %c12_i32 : i32
    %c0_i32_259 = arith.constant 0 : i32
    %679 = arith.cmpi eq, %arg0, %c0_i32_259 : i32
    %c15_i32_260 = arith.constant 15 : i32
    %680 = arith.subi %c15_i32_260, %678 : i32
    %681 = arith.select %679, %678, %680 : i32
    %682 = vector.broadcast %681 : i32 to vector<8x1xi32>
    %683 = arith.cmpi slt, %682, %12 : vector<8x1xi32>
    %684 = vector.shape_cast %683 : vector<8x1xi1> to vector<8x1xi1>
    %685 = vector.broadcast %684 : vector<8x1xi1> to vector<8x128xi1>
    %c0_i32_261 = arith.constant 0 : i32
    %686 = arith.cmpi eq, %arg0, %c0_i32_261 : i32
    %c96_i32_262 = arith.constant 96 : i32
    %c24_i32_263 = arith.constant 24 : i32
    %687 = arith.select %686, %c96_i32_262, %c24_i32_263 : i32
    %688 = tpu.assume_multiple %687, 8 : i32
    %689 = arith.index_cast %688 : i32 to index
    %c0_264 = arith.constant 0 : index
    %690 = vector.load %arg14[%689, %c0_264] : memref<128x512xf32, #tpu.memory_space<vmem>>, vector<8x512xf32>
    %691 = arith.truncf %670 : vector<8x128xf32> to vector<8x128xbf16>
    %cst_265 = arith.constant dense<0.000000e+00> : vector<8x512xf32>
    %692 = tpu.matmul %691, %14, %cst_265 {dimension_numbers = #tpu.dot_dimension_numbers<[1], [0], [0], [1], [0, 0, 1, 1], [], []>} : vector<8x128xbf16>, vector<128x512xbf16>, vector<8x512xf32> -> vector<8x512xf32>
    %693 = arith.addf %690, %692 : vector<8x512xf32>
    %694 = vector.extract_strided_slice %693 {offsets = [0, 0], sizes = [8, 128], strides = [1, 1]} : vector<8x512xf32> to vector<8x128xf32>
    %cst_266 = arith.constant 5.000000e-01 : f32
    %695 = vector.broadcast %cst_266 : f32 to vector<8x128xf32>
    %696 = arith.mulf %695, %694 : vector<8x128xf32>
    %697 = math.tanh %696 : vector<8x128xf32>
    %cst_267 = arith.constant 5.000000e-01 : f32
    %698 = vector.broadcast %cst_267 : f32 to vector<8x128xf32>
    %699 = arith.mulf %698, %697 : vector<8x128xf32>
    %cst_268 = arith.constant 5.000000e-01 : f32
    %700 = vector.broadcast %cst_268 : f32 to vector<8x128xf32>
    %701 = arith.addf %699, %700 : vector<8x128xf32>
    %702 = vector.extract_strided_slice %693 {offsets = [0, 128], sizes = [8, 128], strides = [1, 1]} : vector<8x512xf32> to vector<8x128xf32>
    %cst_269 = arith.constant 5.000000e-01 : f32
    %703 = vector.broadcast %cst_269 : f32 to vector<8x128xf32>
    %704 = arith.mulf %703, %702 : vector<8x128xf32>
    %705 = math.tanh %704 : vector<8x128xf32>
    %cst_270 = arith.constant 5.000000e-01 : f32
    %706 = vector.broadcast %cst_270 : f32 to vector<8x128xf32>
    %707 = arith.mulf %706, %705 : vector<8x128xf32>
    %cst_271 = arith.constant 5.000000e-01 : f32
    %708 = vector.broadcast %cst_271 : f32 to vector<8x128xf32>
    %709 = arith.addf %707, %708 : vector<8x128xf32>
    %710 = vector.extract_strided_slice %693 {offsets = [0, 256], sizes = [8, 128], strides = [1, 1]} : vector<8x512xf32> to vector<8x128xf32>
    %711 = math.tanh %710 : vector<8x128xf32>
    %712 = vector.extract_strided_slice %693 {offsets = [0, 384], sizes = [8, 128], strides = [1, 1]} : vector<8x512xf32> to vector<8x128xf32>
    %cst_272 = arith.constant 5.000000e-01 : f32
    %713 = vector.broadcast %cst_272 : f32 to vector<8x128xf32>
    %714 = arith.mulf %713, %712 : vector<8x128xf32>
    %715 = math.tanh %714 : vector<8x128xf32>
    %cst_273 = arith.constant 5.000000e-01 : f32
    %716 = vector.broadcast %cst_273 : f32 to vector<8x128xf32>
    %717 = arith.mulf %716, %715 : vector<8x128xf32>
    %cst_274 = arith.constant 5.000000e-01 : f32
    %718 = vector.broadcast %cst_274 : f32 to vector<8x128xf32>
    %719 = arith.addf %717, %718 : vector<8x128xf32>
    %720 = arith.mulf %709, %671 : vector<8x128xf32>
    %721 = arith.mulf %701, %711 : vector<8x128xf32>
    %722 = arith.addf %720, %721 : vector<8x128xf32>
    %723 = math.tanh %722 : vector<8x128xf32>
    %724 = arith.mulf %719, %723 : vector<8x128xf32>
    %725 = arith.select %685, %724, %670 : vector<8x128xi1>, vector<8x128xf32>
    %726 = arith.select %685, %722, %671 : vector<8x128xi1>, vector<8x128xf32>
    %cst_275 = arith.constant 0.000000e+00 : f32
    %727 = vector.broadcast %cst_275 : f32 to vector<8x128xf32>
    %728 = arith.select %685, %724, %727 : vector<8x128xi1>, vector<8x128xf32>
    %c0_276 = arith.constant 0 : index
    %c12 = arith.constant 12 : index
    %c0_277 = arith.constant 0 : index
    %c0_278 = arith.constant 0 : index
    %729 = vector.load %arg9[%c0_276, %c12, %c0_277, %c0_278] : memref<1x16x8x128xf32, #tpu.memory_space<vmem>>, vector<1x1x8x128xf32>
    %730 = vector.shape_cast %729 : vector<1x1x8x128xf32> to vector<8x128xf32>
    %731 = vector.shape_cast %728 : vector<8x128xf32> to vector<1x1x8x128xf32>
    tpu.vector_store %arg9[%c0_276, %c12, %c0_277, %c0_278], %731 {strides = array<i32>} : memref<1x16x8x128xf32, #tpu.memory_space<vmem>>, vector<1x1x8x128xf32>,
    %c16_i32_279 = arith.constant 16 : i32
    %732 = arith.muli %arg1, %c16_i32_279 : i32
    %c13_i32 = arith.constant 13 : i32
    %733 = arith.addi %732, %c13_i32 : i32
    %c0_i32_280 = arith.constant 0 : i32
    %734 = arith.cmpi eq, %arg0, %c0_i32_280 : i32
    %c15_i32_281 = arith.constant 15 : i32
    %735 = arith.subi %c15_i32_281, %733 : i32
    %736 = arith.select %734, %733, %735 : i32
    %737 = vector.broadcast %736 : i32 to vector<8x1xi32>
    %738 = arith.cmpi slt, %737, %12 : vector<8x1xi32>
    %739 = vector.shape_cast %738 : vector<8x1xi1> to vector<8x1xi1>
    %740 = vector.broadcast %739 : vector<8x1xi1> to vector<8x128xi1>
    %c0_i32_282 = arith.constant 0 : i32
    %741 = arith.cmpi eq, %arg0, %c0_i32_282 : i32
    %c104_i32_283 = arith.constant 104 : i32
    %c16_i32_284 = arith.constant 16 : i32
    %742 = arith.select %741, %c104_i32_283, %c16_i32_284 : i32
    %743 = tpu.assume_multiple %742, 8 : i32
    %744 = arith.index_cast %743 : i32 to index
    %c0_285 = arith.constant 0 : index
    %745 = vector.load %arg14[%744, %c0_285] : memref<128x512xf32, #tpu.memory_space<vmem>>, vector<8x512xf32>
    %746 = arith.truncf %725 : vector<8x128xf32> to vector<8x128xbf16>
    %cst_286 = arith.constant dense<0.000000e+00> : vector<8x512xf32>
    %747 = tpu.matmul %746, %14, %cst_286 {dimension_numbers = #tpu.dot_dimension_numbers<[1], [0], [0], [1], [0, 0, 1, 1], [], []>} : vector<8x128xbf16>, vector<128x512xbf16>, vector<8x512xf32> -> vector<8x512xf32>
    %748 = arith.addf %745, %747 : vector<8x512xf32>
    %749 = vector.extract_strided_slice %748 {offsets = [0, 0], sizes = [8, 128], strides = [1, 1]} : vector<8x512xf32> to vector<8x128xf32>
    %cst_287 = arith.constant 5.000000e-01 : f32
    %750 = vector.broadcast %cst_287 : f32 to vector<8x128xf32>
    %751 = arith.mulf %750, %749 : vector<8x128xf32>
    %752 = math.tanh %751 : vector<8x128xf32>
    %cst_288 = arith.constant 5.000000e-01 : f32
    %753 = vector.broadcast %cst_288 : f32 to vector<8x128xf32>
    %754 = arith.mulf %753, %752 : vector<8x128xf32>
    %cst_289 = arith.constant 5.000000e-01 : f32
    %755 = vector.broadcast %cst_289 : f32 to vector<8x128xf32>
    %756 = arith.addf %754, %755 : vector<8x128xf32>
    %757 = vector.extract_strided_slice %748 {offsets = [0, 128], sizes = [8, 128], strides = [1, 1]} : vector<8x512xf32> to vector<8x128xf32>
    %cst_290 = arith.constant 5.000000e-01 : f32
    %758 = vector.broadcast %cst_290 : f32 to vector<8x128xf32>
    %759 = arith.mulf %758, %757 : vector<8x128xf32>
    %760 = math.tanh %759 : vector<8x128xf32>
    %cst_291 = arith.constant 5.000000e-01 : f32
    %761 = vector.broadcast %cst_291 : f32 to vector<8x128xf32>
    %762 = arith.mulf %761, %760 : vector<8x128xf32>
    %cst_292 = arith.constant 5.000000e-01 : f32
    %763 = vector.broadcast %cst_292 : f32 to vector<8x128xf32>
    %764 = arith.addf %762, %763 : vector<8x128xf32>
    %765 = vector.extract_strided_slice %748 {offsets = [0, 256], sizes = [8, 128], strides = [1, 1]} : vector<8x512xf32> to vector<8x128xf32>
    %766 = math.tanh %765 : vector<8x128xf32>
    %767 = vector.extract_strided_slice %748 {offsets = [0, 384], sizes = [8, 128], strides = [1, 1]} : vector<8x512xf32> to vector<8x128xf32>
    %cst_293 = arith.constant 5.000000e-01 : f32
    %768 = vector.broadcast %cst_293 : f32 to vector<8x128xf32>
    %769 = arith.mulf %768, %767 : vector<8x128xf32>
    %770 = math.tanh %769 : vector<8x128xf32>
    %cst_294 = arith.constant 5.000000e-01 : f32
    %771 = vector.broadcast %cst_294 : f32 to vector<8x128xf32>
    %772 = arith.mulf %771, %770 : vector<8x128xf32>
    %cst_295 = arith.constant 5.000000e-01 : f32
    %773 = vector.broadcast %cst_295 : f32 to vector<8x128xf32>
    %774 = arith.addf %772, %773 : vector<8x128xf32>
    %775 = arith.mulf %764, %726 : vector<8x128xf32>
    %776 = arith.mulf %756, %766 : vector<8x128xf32>
    %777 = arith.addf %775, %776 : vector<8x128xf32>
    %778 = math.tanh %777 : vector<8x128xf32>
    %779 = arith.mulf %774, %778 : vector<8x128xf32>
    %780 = arith.select %740, %779, %725 : vector<8x128xi1>, vector<8x128xf32>
    %781 = arith.select %740, %777, %726 : vector<8x128xi1>, vector<8x128xf32>
    %cst_296 = arith.constant 0.000000e+00 : f32
    %782 = vector.broadcast %cst_296 : f32 to vector<8x128xf32>
    %783 = arith.select %740, %779, %782 : vector<8x128xi1>, vector<8x128xf32>
    %c0_297 = arith.constant 0 : index
    %c13 = arith.constant 13 : index
    %c0_298 = arith.constant 0 : index
    %c0_299 = arith.constant 0 : index
    %784 = vector.load %arg9[%c0_297, %c13, %c0_298, %c0_299] : memref<1x16x8x128xf32, #tpu.memory_space<vmem>>, vector<1x1x8x128xf32>
    %785 = vector.shape_cast %784 : vector<1x1x8x128xf32> to vector<8x128xf32>
    %786 = vector.shape_cast %783 : vector<8x128xf32> to vector<1x1x8x128xf32>
    tpu.vector_store %arg9[%c0_297, %c13, %c0_298, %c0_299], %786 {strides = array<i32>} : memref<1x16x8x128xf32, #tpu.memory_space<vmem>>, vector<1x1x8x128xf32>,
    %c16_i32_300 = arith.constant 16 : i32
    %787 = arith.muli %arg1, %c16_i32_300 : i32
    %c14_i32 = arith.constant 14 : i32
    %788 = arith.addi %787, %c14_i32 : i32
    %c0_i32_301 = arith.constant 0 : i32
    %789 = arith.cmpi eq, %arg0, %c0_i32_301 : i32
    %c15_i32_302 = arith.constant 15 : i32
    %790 = arith.subi %c15_i32_302, %788 : i32
    %791 = arith.select %789, %788, %790 : i32
    %792 = vector.broadcast %791 : i32 to vector<8x1xi32>
    %793 = arith.cmpi slt, %792, %12 : vector<8x1xi32>
    %794 = vector.shape_cast %793 : vector<8x1xi1> to vector<8x1xi1>
    %795 = vector.broadcast %794 : vector<8x1xi1> to vector<8x128xi1>
    %c0_i32_303 = arith.constant 0 : i32
    %796 = arith.cmpi eq, %arg0, %c0_i32_303 : i32
    %c112_i32_304 = arith.constant 112 : i32
    %c8_i32_305 = arith.constant 8 : i32
    %797 = arith.select %796, %c112_i32_304, %c8_i32_305 : i32
    %798 = tpu.assume_multiple %797, 8 : i32
    %799 = arith.index_cast %798 : i32 to index
    %c0_306 = arith.constant 0 : index
    %800 = vector.load %arg14[%799, %c0_306] : memref<128x512xf32, #tpu.memory_space<vmem>>, vector<8x512xf32>
    %801 = arith.truncf %780 : vector<8x128xf32> to vector<8x128xbf16>
    %cst_307 = arith.constant dense<0.000000e+00> : vector<8x512xf32>
    %802 = tpu.matmul %801, %14, %cst_307 {dimension_numbers = #tpu.dot_dimension_numbers<[1], [0], [0], [1], [0, 0, 1, 1], [], []>} : vector<8x128xbf16>, vector<128x512xbf16>, vector<8x512xf32> -> vector<8x512xf32>
    %803 = arith.addf %800, %802 : vector<8x512xf32>
    %804 = vector.extract_strided_slice %803 {offsets = [0, 0], sizes = [8, 128], strides = [1, 1]} : vector<8x512xf32> to vector<8x128xf32>
    %cst_308 = arith.constant 5.000000e-01 : f32
    %805 = vector.broadcast %cst_308 : f32 to vector<8x128xf32>
    %806 = arith.mulf %805, %804 : vector<8x128xf32>
    %807 = math.tanh %806 : vector<8x128xf32>
    %cst_309 = arith.constant 5.000000e-01 : f32
    %808 = vector.broadcast %cst_309 : f32 to vector<8x128xf32>
    %809 = arith.mulf %808, %807 : vector<8x128xf32>
    %cst_310 = arith.constant 5.000000e-01 : f32
    %810 = vector.broadcast %cst_310 : f32 to vector<8x128xf32>
    %811 = arith.addf %809, %810 : vector<8x128xf32>
    %812 = vector.extract_strided_slice %803 {offsets = [0, 128], sizes = [8, 128], strides = [1, 1]} : vector<8x512xf32> to vector<8x128xf32>
    %cst_311 = arith.constant 5.000000e-01 : f32
    %813 = vector.broadcast %cst_311 : f32 to vector<8x128xf32>
    %814 = arith.mulf %813, %812 : vector<8x128xf32>
    %815 = math.tanh %814 : vector<8x128xf32>
    %cst_312 = arith.constant 5.000000e-01 : f32
    %816 = vector.broadcast %cst_312 : f32 to vector<8x128xf32>
    %817 = arith.mulf %816, %815 : vector<8x128xf32>
    %cst_313 = arith.constant 5.000000e-01 : f32
    %818 = vector.broadcast %cst_313 : f32 to vector<8x128xf32>
    %819 = arith.addf %817, %818 : vector<8x128xf32>
    %820 = vector.extract_strided_slice %803 {offsets = [0, 256], sizes = [8, 128], strides = [1, 1]} : vector<8x512xf32> to vector<8x128xf32>
    %821 = math.tanh %820 : vector<8x128xf32>
    %822 = vector.extract_strided_slice %803 {offsets = [0, 384], sizes = [8, 128], strides = [1, 1]} : vector<8x512xf32> to vector<8x128xf32>
    %cst_314 = arith.constant 5.000000e-01 : f32
    %823 = vector.broadcast %cst_314 : f32 to vector<8x128xf32>
    %824 = arith.mulf %823, %822 : vector<8x128xf32>
    %825 = math.tanh %824 : vector<8x128xf32>
    %cst_315 = arith.constant 5.000000e-01 : f32
    %826 = vector.broadcast %cst_315 : f32 to vector<8x128xf32>
    %827 = arith.mulf %826, %825 : vector<8x128xf32>
    %cst_316 = arith.constant 5.000000e-01 : f32
    %828 = vector.broadcast %cst_316 : f32 to vector<8x128xf32>
    %829 = arith.addf %827, %828 : vector<8x128xf32>
    %830 = arith.mulf %819, %781 : vector<8x128xf32>
    %831 = arith.mulf %811, %821 : vector<8x128xf32>
    %832 = arith.addf %830, %831 : vector<8x128xf32>
    %833 = math.tanh %832 : vector<8x128xf32>
    %834 = arith.mulf %829, %833 : vector<8x128xf32>
    %835 = arith.select %795, %834, %780 : vector<8x128xi1>, vector<8x128xf32>
    %836 = arith.select %795, %832, %781 : vector<8x128xi1>, vector<8x128xf32>
    %cst_317 = arith.constant 0.000000e+00 : f32
    %837 = vector.broadcast %cst_317 : f32 to vector<8x128xf32>
    %838 = arith.select %795, %834, %837 : vector<8x128xi1>, vector<8x128xf32>
    %c0_318 = arith.constant 0 : index
    %c14 = arith.constant 14 : index
    %c0_319 = arith.constant 0 : index
    %c0_320 = arith.constant 0 : index
    %839 = vector.load %arg9[%c0_318, %c14, %c0_319, %c0_320] : memref<1x16x8x128xf32, #tpu.memory_space<vmem>>, vector<1x1x8x128xf32>
    %840 = vector.shape_cast %839 : vector<1x1x8x128xf32> to vector<8x128xf32>
    %841 = vector.shape_cast %838 : vector<8x128xf32> to vector<1x1x8x128xf32>
    tpu.vector_store %arg9[%c0_318, %c14, %c0_319, %c0_320], %841 {strides = array<i32>} : memref<1x16x8x128xf32, #tpu.memory_space<vmem>>, vector<1x1x8x128xf32>,
    %c16_i32_321 = arith.constant 16 : i32
    %842 = arith.muli %arg1, %c16_i32_321 : i32
    %c15_i32_322 = arith.constant 15 : i32
    %843 = arith.addi %842, %c15_i32_322 : i32
    %c0_i32_323 = arith.constant 0 : i32
    %844 = arith.cmpi eq, %arg0, %c0_i32_323 : i32
    %c15_i32_324 = arith.constant 15 : i32
    %845 = arith.subi %c15_i32_324, %843 : i32
    %846 = arith.select %844, %843, %845 : i32
    %847 = vector.broadcast %846 : i32 to vector<8x1xi32>
    %848 = arith.cmpi slt, %847, %12 : vector<8x1xi32>
    %849 = vector.shape_cast %848 : vector<8x1xi1> to vector<8x1xi1>
    %850 = vector.broadcast %849 : vector<8x1xi1> to vector<8x128xi1>
    %c0_i32_325 = arith.constant 0 : i32
    %851 = arith.cmpi eq, %arg0, %c0_i32_325 : i32
    %c120_i32_326 = arith.constant 120 : i32
    %c0_i32_327 = arith.constant 0 : i32
    %852 = arith.select %851, %c120_i32_326, %c0_i32_327 : i32
    %853 = tpu.assume_multiple %852, 8 : i32
    %854 = arith.index_cast %853 : i32 to index
    %c0_328 = arith.constant 0 : index
    %855 = vector.load %arg14[%854, %c0_328] : memref<128x512xf32, #tpu.memory_space<vmem>>, vector<8x512xf32>
    %856 = arith.truncf %835 : vector<8x128xf32> to vector<8x128xbf16>
    %cst_329 = arith.constant dense<0.000000e+00> : vector<8x512xf32>
    %857 = tpu.matmul %856, %14, %cst_329 {dimension_numbers = #tpu.dot_dimension_numbers<[1], [0], [0], [1], [0, 0, 1, 1], [], []>} : vector<8x128xbf16>, vector<128x512xbf16>, vector<8x512xf32> -> vector<8x512xf32>
    %858 = arith.addf %855, %857 : vector<8x512xf32>
    %859 = vector.extract_strided_slice %858 {offsets = [0, 0], sizes = [8, 128], strides = [1, 1]} : vector<8x512xf32> to vector<8x128xf32>
    %cst_330 = arith.constant 5.000000e-01 : f32
    %860 = vector.broadcast %cst_330 : f32 to vector<8x128xf32>
    %861 = arith.mulf %860, %859 : vector<8x128xf32>
    %862 = math.tanh %861 : vector<8x128xf32>
    %cst_331 = arith.constant 5.000000e-01 : f32
    %863 = vector.broadcast %cst_331 : f32 to vector<8x128xf32>
    %864 = arith.mulf %863, %862 : vector<8x128xf32>
    %cst_332 = arith.constant 5.000000e-01 : f32
    %865 = vector.broadcast %cst_332 : f32 to vector<8x128xf32>
    %866 = arith.addf %864, %865 : vector<8x128xf32>
    %867 = vector.extract_strided_slice %858 {offsets = [0, 128], sizes = [8, 128], strides = [1, 1]} : vector<8x512xf32> to vector<8x128xf32>
    %cst_333 = arith.constant 5.000000e-01 : f32
    %868 = vector.broadcast %cst_333 : f32 to vector<8x128xf32>
    %869 = arith.mulf %868, %867 : vector<8x128xf32>
    %870 = math.tanh %869 : vector<8x128xf32>
    %cst_334 = arith.constant 5.000000e-01 : f32
    %871 = vector.broadcast %cst_334 : f32 to vector<8x128xf32>
    %872 = arith.mulf %871, %870 : vector<8x128xf32>
    %cst_335 = arith.constant 5.000000e-01 : f32
    %873 = vector.broadcast %cst_335 : f32 to vector<8x128xf32>
    %874 = arith.addf %872, %873 : vector<8x128xf32>
    %875 = vector.extract_strided_slice %858 {offsets = [0, 256], sizes = [8, 128], strides = [1, 1]} : vector<8x512xf32> to vector<8x128xf32>
    %876 = math.tanh %875 : vector<8x128xf32>
    %877 = vector.extract_strided_slice %858 {offsets = [0, 384], sizes = [8, 128], strides = [1, 1]} : vector<8x512xf32> to vector<8x128xf32>
    %cst_336 = arith.constant 5.000000e-01 : f32
    %878 = vector.broadcast %cst_336 : f32 to vector<8x128xf32>
    %879 = arith.mulf %878, %877 : vector<8x128xf32>
    %880 = math.tanh %879 : vector<8x128xf32>
    %cst_337 = arith.constant 5.000000e-01 : f32
    %881 = vector.broadcast %cst_337 : f32 to vector<8x128xf32>
    %882 = arith.mulf %881, %880 : vector<8x128xf32>
    %cst_338 = arith.constant 5.000000e-01 : f32
    %883 = vector.broadcast %cst_338 : f32 to vector<8x128xf32>
    %884 = arith.addf %882, %883 : vector<8x128xf32>
    %885 = arith.mulf %874, %836 : vector<8x128xf32>
    %886 = arith.mulf %866, %876 : vector<8x128xf32>
    %887 = arith.addf %885, %886 : vector<8x128xf32>
    %888 = math.tanh %887 : vector<8x128xf32>
    %889 = arith.mulf %884, %888 : vector<8x128xf32>
    %890 = arith.select %850, %889, %835 : vector<8x128xi1>, vector<8x128xf32>
    %891 = arith.select %850, %887, %836 : vector<8x128xi1>, vector<8x128xf32>
    %cst_339 = arith.constant 0.000000e+00 : f32
    %892 = vector.broadcast %cst_339 : f32 to vector<8x128xf32>
    %893 = arith.select %850, %889, %892 : vector<8x128xi1>, vector<8x128xf32>
    %c0_340 = arith.constant 0 : index
    %c15 = arith.constant 15 : index
    %c0_341 = arith.constant 0 : index
    %c0_342 = arith.constant 0 : index
    %894 = vector.load %arg9[%c0_340, %c15, %c0_341, %c0_342] : memref<1x16x8x128xf32, #tpu.memory_space<vmem>>, vector<1x1x8x128xf32>
    %895 = vector.shape_cast %894 : vector<1x1x8x128xf32> to vector<8x128xf32>
    %896 = vector.shape_cast %893 : vector<8x128xf32> to vector<1x1x8x128xf32>
    tpu.vector_store %arg9[%c0_340, %c15, %c0_341, %c0_342], %896 {strides = array<i32>} : memref<1x16x8x128xf32, #tpu.memory_space<vmem>>, vector<1x1x8x128xf32>,
    %c0_343 = arith.constant 0 : index
    %c0_344 = arith.constant 0 : index
    %897 = vector.load %arg12[%c0_343, %c0_344] : memref<8x128xf32, #tpu.memory_space<vmem>>, vector<8x128xf32>
    tpu.vector_store %arg12[%c0_343, %c0_344], %890 {strides = array<i32>} : memref<8x128xf32, #tpu.memory_space<vmem>>, vector<8x128xf32>,
    %c0_345 = arith.constant 0 : index
    %c0_346 = arith.constant 0 : index
    %898 = vector.load %arg13[%c0_345, %c0_346] : memref<8x128xf32, #tpu.memory_space<vmem>>, vector<8x128xf32>
    tpu.vector_store %arg13[%c0_345, %c0_346], %891 {strides = array<i32>} : memref<8x128xf32, #tpu.memory_space<vmem>>, vector<8x128xf32>,
    %c0_i32_347 = arith.constant 0 : i32
    %899 = arith.cmpi eq, %arg1, %c0_i32_347 : i32
    %900 = arith.extui %899 : i1 to i32
    %c0_i32_348 = arith.constant 0 : i32
    %901 = arith.cmpi ne, %900, %c0_i32_348 : i32
    scf.if %901 {
      %c0_349 = arith.constant 0 : index
      %c0_350 = arith.constant 0 : index
      %902 = vector.load %arg12[%c0_349, %c0_350] : memref<8x128xf32, #tpu.memory_space<vmem>>, vector<8x128xf32>
      %c0_351 = arith.constant 0 : index
      %c0_352 = arith.constant 0 : index
      %c0_353 = arith.constant 0 : index
      %903 = vector.load %arg10[%c0_351, %c0_352, %c0_353] : memref<1x8x128xf32, #tpu.memory_space<vmem>>, vector<1x8x128xf32>
      %904 = vector.shape_cast %903 : vector<1x8x128xf32> to vector<8x128xf32>
      %905 = vector.shape_cast %902 : vector<8x128xf32> to vector<1x8x128xf32>
      tpu.vector_store %arg10[%c0_351, %c0_352, %c0_353], %905 {strides = array<i32>} : memref<1x8x128xf32, #tpu.memory_space<vmem>>, vector<1x8x128xf32>,
      %c0_354 = arith.constant 0 : index
      %c0_355 = arith.constant 0 : index
      %906 = vector.load %arg13[%c0_354, %c0_355] : memref<8x128xf32, #tpu.memory_space<vmem>>, vector<8x128xf32>
      %c0_356 = arith.constant 0 : index
      %c0_357 = arith.constant 0 : index
      %c0_358 = arith.constant 0 : index
      %907 = vector.load %arg11[%c0_356, %c0_357, %c0_358] : memref<1x8x128xf32, #tpu.memory_space<vmem>>, vector<1x8x128xf32>
      %908 = vector.shape_cast %907 : vector<1x8x128xf32> to vector<8x128xf32>
      %909 = vector.shape_cast %906 : vector<8x128xf32> to vector<1x8x128xf32>
      tpu.vector_store %arg11[%c0_356, %c0_357, %c0_358], %909 {strides = array<i32>} : memref<1x8x128xf32, #tpu.memory_space<vmem>>, vector<1x8x128xf32>,
    } else {
    }
    return
  }
  func.func @transform_0(%arg0: i32, %arg1: i32) -> (i32, i32) {
    %c0_i32 = arith.constant 0 : i32
    %c0_i32_0 = arith.constant 0 : i32
    %c0_i32_1 = arith.constant 0 : i32
    return %c0_i32, %c0_i32_0 : i32, i32
  }
  func.func @transform_1(%arg0: i32, %arg1: i32) -> (i32, i32) {
    %c2_i32 = arith.constant 2 : i32
    %0 = arith.muli %c2_i32, %arg1 : i32
    %c0_i32 = arith.constant 0 : i32
    %1 = arith.subi %c0_i32, %0 : i32
    %2 = arith.muli %arg0, %1 : i32
    %3 = arith.addi %arg1, %2 : i32
    %c0_i32_0 = arith.constant 0 : i32
    %c0_i32_1 = arith.constant 0 : i32
    return %3, %c0_i32_0 : i32, i32
  }
  func.func @transform_2(%arg0: i32, %arg1: i32) -> (i32, i32, i32) {
    %c0_i32 = arith.constant 0 : i32
    %c0_i32_0 = arith.constant 0 : i32
    %c0_i32_1 = arith.constant 0 : i32
    return %arg0, %c0_i32, %c0_i32_0 : i32, i32, i32
  }
  func.func @transform_3(%arg0: i32, %arg1: i32) -> (i32, i32, i32) {
    %c0_i32 = arith.constant 0 : i32
    %c0_i32_0 = arith.constant 0 : i32
    %c0_i32_1 = arith.constant 0 : i32
    return %arg0, %c0_i32, %c0_i32_0 : i32, i32, i32
  }
  func.func @transform_4(%arg0: i32, %arg1: i32) -> (i32, i32, i32) {
    %c0_i32 = arith.constant 0 : i32
    %c0_i32_0 = arith.constant 0 : i32
    %c0_i32_1 = arith.constant 0 : i32
    return %arg0, %c0_i32, %c0_i32_0 : i32, i32, i32
  }
  func.func @transform_5(%arg0: i32, %arg1: i32) -> (i32, i32, i32) {
    %c0_i32 = arith.constant 0 : i32
    %c0_i32_0 = arith.constant 0 : i32
    %c0_i32_1 = arith.constant 0 : i32
    return %arg0, %c0_i32, %c0_i32_0 : i32, i32, i32
  }
  func.func @transform_6(%arg0: i32, %arg1: i32) -> (i32, i32, i32) {
    %c0_i32 = arith.constant 0 : i32
    %c0_i32_0 = arith.constant 0 : i32
    %c0_i32_1 = arith.constant 0 : i32
    return %arg0, %c0_i32, %c0_i32_0 : i32, i32, i32
  }
  func.func @transform_7(%arg0: i32, %arg1: i32) -> (i32, i32, i32, i32) {
    %c0_i32 = arith.constant 0 : i32
    %c0_i32_0 = arith.constant 0 : i32
    %c0_i32_1 = arith.constant 0 : i32
    return %arg0, %arg1, %c0_i32, %c0_i32_0 : i32, i32, i32, i32
  }
  func.func @transform_8(%arg0: i32, %arg1: i32) -> (i32, i32, i32) {
    %c0_i32 = arith.constant 0 : i32
    %c0_i32_0 = arith.constant 0 : i32
    %c0_i32_1 = arith.constant 0 : i32
    return %arg0, %c0_i32, %c0_i32_0 : i32, i32, i32
  }
  func.func @transform_9(%arg0: i32, %arg1: i32) -> (i32, i32, i32) {
    %c0_i32 = arith.constant 0 : i32
    %c0_i32_0 = arith.constant 0 : i32
    %c0_i32_1 = arith.constant 0 : i32
    return %arg0, %c0_i32, %c0_i32_0 : i32, i32, i32
  }
}

</mosaic_0001>

<bundles_post_ra>
// kernel: tpu_custom_call.1
= control target key start
LH: loop header
LB: loop body
LE: loop exit
PB: predicated region body
PF: predicated region fallthrough
CT: control target
= control target key end

     0   :  { %s5779_s0 = inlined_call_operand.vmem [shape: s32[8,1], index: 0, kind: input, shape index: {}]   ;;  %s5780_s1 = inlined_call_operand.vmem [shape: bf16[128,4], index: 1, kind: input, shape index: {}]   ;;  %s5781_s2 = inlined_call_operand.vmem [shape: bf16[2,4,512], index: 2, kind: input, shape index: {}]   ;;  %s5782_s3 = inlined_call_operand.vmem [shape: f32[2,1,512], index: 3, kind: input, shape index: {}]   ;;  %s5783_s4 = inlined_call_operand.hbm [shape: bf16[2,128,512], index: 4, kind: input, shape index: {}]   ;;  %s5784_s5 = inlined_call_operand.vmem [shape: f32[2,8,128], index: 5, kind: input, shape index: {}]   ;;  %s5785_s6 = inlined_call_operand.vmem [shape: f32[2,8,128], index: 6, kind: input, shape index: {}]   ;;  %s5786_s7 = inlined_call_operand.hbm [shape: f32[2,16,8,128], index: 7, kind: output, shape index: {0}]   ;;  %s5787_s8 = inlined_call_operand.hbm [shape: f32[2,8,128], index: 8, kind: output, shape index: {1}]   ;;  %s5788_s9 = inlined_call_operand.hbm [shape: f32[2,8,128], index: 9, kind: output, shape index: {2}]  }
   0x1   :  { %5793 = sst [smem:[#allocation17_spill]] %s5779_s0 }
   0x2   :  { %5794 = sst [smem:[#allocation18_spill]] %s5780_s1 }
   0x3   :  { %5795 = sst [smem:[#allocation19_spill]] %s5781_s2 }
   0x4   :  { %5796 = sst [smem:[#allocation20_spill]] %s5782_s3 }
   0x5   :  { %15 = vsyncpa [#allocation6], 0 }
   0x6   :  { %17 = vsyncpa [#allocation6 + $0x1], 0 }
   0x7   :  { %18 = vsyncpa [#allocation7], 0 }
   0x8   :  { %20 = vsyncpa [#allocation7 + $0x1], 0 }
   0x9   :  { %21 = vsyncpa [#allocation10], 0 }
   0xa   :  { %23 = vsyncpa [#allocation10 + $0x1], 0  ;;  %s4285_s30 = smov 0   ;;  %s4287_s10 = smov 0  }
   0xb   :  { %s4289_s11 = smov 0   ;;  %s4291_s12 = smov 0  }
   0xc   :  { %s4293_s13 = smov 0   ;;  %s4295_s14 = smov 0  }
   0xd LB: > { %5797 = sst [smem:[#allocation15_spill]] %s4219_s13  ;;  %s4316_s15 = sadd.s32 4294967295, %s4223_s14   ;;  %s4223_s14 = sphi %s4295_s14, %s29_s14   ;;  %s4219_s13 = sphi %s4293_s13, %s5814_s13   ;;  %s4215_s12 = sphi %s4291_s12, %s5813_s12   ;;  %s4211_s11 = sphi %s4289_s11, %s5817_s11   ;;  %s4207_s10 = sphi %s4287_s10, %s5816_s10   ;;  %s4203_s30 = sphi %s4285_s30, %s5815_s30  }
   0xe   : > { %s5789_s16 = sadd.s32 4294967294, %s4223_s14   ;;  %s41_s17 = sadd.s32 1, %s4219_s13 }
   0xf   : > { %s155_s18 = sadd.s32 1, %s4211_s11  ;;  %p43_p0 = scmp.ge.s32.totalorder %s41_s17, 2 }
  0x10   : > { %p162_p1 = scmp.ne.s32.totalorder %s4211_s11, %s4207_s10  ;;  %p163_p2 = scmp.eq.s32.totalorder %s4223_s14, 0 }
  0x11   : > { %p168_p3 = scmp.ne.s32.totalorder %s4207_s10, %s4203_s30  ;;  %s5819_s17 = smov (%p43_p0, %s41_s17), 0 }
  0x12   : > { %5798 = sst [smem:[#allocation16_spill]] %s5819_s17  ;;  %p4328_p4 = por %p163_p2, %p162_p1 }
  0x13   : > { %p169_p5 = scmp.eq.s32.totalorder %s4316_s15, 0  ;;  %s152_s20 = ssub.s32 %s4219_s13, %s5819_s17 }
  0x14   : > { %p246_p6 = scmp.eq.s32.totalorder %s4316_s15, 1  ;;  %p153_p7 = scmp.eq.s32.totalorder %s152_s20, 0 }
  0x15   : > { %p4336_p8 = por %p169_p5, %p168_p3  ;;  %p252_p10 = scmp.eq.s32.totalorder %s5789_s16, 1 }
  0x16   : > { %p4340_p9 = por %p246_p6, %p162_p1  ;;  %p3685_p13 = scmp.lt.s32.totalorder %s4223_s14, 2 }
  0x17   : > { %s4347_s23 = scalar_select %p153_p7, %s4211_s11, %s155_s18  }
  0x18   : > { %s5801_s22 = scalar_select %p4340_p9, 1, 0 }
  0x19   : > { %p4349_p11 = por %p252_p10, %p168_p3  ;;  %s359_s25 = sand.u32 1, %s4211_s11  }
  0x1a   : > { %s3517_s26 = sshll.u32 %s359_s25, 8  ;;  %s3644_s27 = sshll.u32 %s4219_s13, 12 }
  0x1b   : > { %s5802_s24 = scalar_select %p4349_p11, 1, 0 }
  0x1c   : > { %s4360_s20 = scalar_lea.hbm %s5783_s4, %s3644_s27  ;;  %s363_s18 = scalar_lea.vmem [#allocation5], %s3517_s26 }
  0x1d   : > { %s370_s16 = sshll.u32 %s363_s18, 4  ;;  %p4366_p0 = pnand %p3685_p13, %p4328_p4  ;;  %s4362_s16 = int_to_ptr.vmem [resolvable:$true] %s370_s16 }
  0x1e   : > { %s4371_s13 = scalar_lea.sflag [#allocation6], %s359_s25  ;;  %s4051_s27 = scalar_lea.hbm %s4360_s20, 4096 }
  0x1f   : > { %p4052_p2 = scmp.ne.s32.totalorder %s4360_s20, %s4051_s27  ;;  %p4053_p3 = pneg %p4366_p0 }
  0x20   : > { %s4056_s19 = scalar_lea.hbm %s5783_s4, 8192  ;;  %p4057_p4 = scmp.lt.u32.totalorder %s4360_s20, %s5783_s4 }
  0x21   : > { %p4054_p5 = pnand %p4053_p3, %p4052_p2  ;;  %p4058_p7 = scmp.lt.u32.totalorder %s4056_s19, %s4051_s27 }
  0x22   : > { %p4060_p13 = scmp.lt.u32.totalorder %s4051_s27, %s4360_s20 }
  0x23   : > { %p4055_p6 = pneg %p4054_p5  ;;  %p4059_p10 = por %p4058_p7, %p4057_p4 }
  0x25   : > { %p4061_p12 = por %p4060_p13, %p4059_p10 }
  0x27   : > { %p4062_p1 = pnand %p4061_p12, %p4055_p6 }
  0x29   : > { %4065 = shalt.err (!%p4062_p1)
}
  0x2a   : > { %s4066_s25 = scalar_lea.vmem %s4362_s16, 4096  ;;  %s4225_s26 = smov [#allocation5]  }
  0x2b   : > { %p4067_p2 = scmp.ne.s32.totalorder %s4362_s16, %s4066_s25  ;;  %s4071_s28 = sshll.u32 %s4225_s26, 4  ;;  %s4072_s28 = int_to_ptr.vmem [resolvable:$false] %s4071_s28 }
  0x2c   : > { %s4073_s29 = scalar_lea.vmem %s4072_s28, 8192  ;;  %p4074_p9 = scmp.lt.s32.totalorder %s4362_s16, %s4072_s28 }
  0x2d   : > { %p4069_p5 = pnand %p4067_p2, %p4053_p3  ;;  %p4075_p4 = scmp.lt.s32.totalorder %s4073_s29, %s4066_s25 }
  0x2f   : > { %p4070_p11 = pneg %p4069_p5  ;;  %p4076_p7 = por %p4075_p4, %p4074_p9 }
  0x31   : > { %p4077_p10 = pnand %p4076_p7, %p4070_p11 }
  0x33   : > { %4080 = shalt.err (!%p4077_p10)
}
  0x34   : > { %s4226_s27 = smov 256   ;;  %s4227_s19 = smov 16  }
  0x35   : > { %3674 = dma.hbm_to_vmem [thread:$0]  (!%p4366_p0), %s4360_s20, 4096, %s4362_s16, %s4371_s13, %s4226_s27, %s4226_s27, %s4227_s19  }
  0x36   : > { %p392_p12 = scmp.lt.s32.totalorder %s4223_s14, 3  ;;  %p5804_p1 = scmp.ge.s32.totalorder %s4223_s14, 1 }
  0x38   : > { %p393_p3 = pnand %p5804_p1, %p392_p12 }
  0x39   : > { %s4403_s18 = sand.u32 (!%p393_p3), 1, %s4207_s10  }
  0x3a   : > { %396 = sbr.rel (%p393_p3) target bundleno = 4243 (0x1093), region = 48  ;;  %s3521_s25 = sshll.u32 (!%p393_p3), %s4403_s18, 8 }
  0x3b   : > { %s399_s26 = scalar_lea.sflag (!%p393_p3), [#allocation6], %s4403_s18  ;;  %s4407_s28 = scalar_lea.vmem (!%p393_p3), [#allocation5], %s3521_s25 }
  0x41   : > { %4190 = dma.done.wait (%p4336_p8), %s399_s26, 4096  }
  0x42   : > { %4192 = vsyncadd (%p4336_p8), %s399_s26, 4294963200  ;;  %p487_p9 = scmp.lt.s32.totalorder %s4215_s12, 1  ;;  %v533_v0 = vlaneseq  ;;  %v4228_v1 = vmov 1983009808   ;;  %v4229_v3 = vmov 0   ;;  %s5805_s2 = sld [smem:[#allocation19_spill]] }
  0x43   : > { %v596_v2 = vunpack.c.l.s4 %v4228_v1  ;;  %681 = vmatprep.mubr.bf16.mxu0 %v4229_v3  ;;  %794 = vmatprep.mubr.bf16.mxu1 %v4229_v3  ;;  %s5806_s3 = sld [smem:[#allocation20_spill]]  ;;  %vm636_vm0 = vcmask 1041408   ;;  %v4438_v22 = vld [vmem:[%s4407_s28 + $0x4] ss:$16 sps:$4 sm:$0xff]   ;;  %s5807_s1 = sld [smem:[#allocation18_spill]]  ;;  %vm611_vm1 = vcmask 31744  }
  0x44   : > { %s488_s13 = scalar_select %p487_p9, %s4215_s12, 1  ;;  %v534_v4 = vshrl.u32 %v533_v0, 7  ;;  %3741 = vset.pattern.permute.xlu0 %v4229_v3  ;;  %3742 = vset.pattern.permute.xlu1 %v4229_v3  ;;  %v4446_v26 = vld [vmem:[%s4407_s28 + $0xc] ss:$16 sps:$4 sm:$0xff]   ;;  %v4449_v27 = vld [vmem:[%s4407_s28] ss:$16 sps:$4 sm:$0xff]  }
  0x45   : > { %v597_v5 = vunpack.c.0.s8 %v596_v2  ;;  %v4454_v28 = vld [vmem:[%s4407_s28 + $0x24] ss:$16 sps:$4 sm:$0xff]   ;;  %v4457_v29 = vld [vmem:[%s4407_s28 + $0x8] ss:$16 sps:$4 sm:$0xff]   ;;  %v4462_v30 = vld [vmem:[%s4407_s28 + $0x2c] ss:$16 sps:$4 sm:$0xff]  }
  0x46   : > { %s4419_s16 = sshll.u32 %s488_s13, 3  ;;  %s3527_s17 = sshll.u32 %s488_s13, 2  ;;  %v535_v6 = vsub.s32 0, %v534_v4  ;;  %v539_v7 = vsub.s32 1, %v534_v4  ;;  %v543_v8 = vsub.s32 2, %v534_v4  ;;  %v547_v9 = vsub.s32 3, %v534_v4 }
  0x47   : > { %v600_v10 = vsub.s32 %v597_v5, %v534_v4  ;;  %v4467_v31 = vld [vmem:[%s4407_s28 + $0x20] ss:$16 sps:$4 sm:$0xff]   ;;  %v4472_v32 = vld [vmem:[%s4407_s28 + $0x44] ss:$16 sps:$4 sm:$0xff]   ;;  %v4480_v34 = vld [vmem:[%s4407_s28 + $0x28] ss:$16 sps:$4 sm:$0xff]   ;;  %s499_s13 = scalar_lea.vmem %s5784_s5, %s4419_s16 }
  0x48   : > { %s491_s29 = scalar_lea.vmem %s5805_s2, %s4419_s16  ;;  %v4484_v35 = vld [vmem:[%s4407_s28 + $0x4c] ss:$16 sps:$4 sm:$0xff]   ;;  %v4488_v36 = vld [vmem:[%s4407_s28 + $0x40] ss:$16 sps:$4 sm:$0xff]   ;;  %v4492_v37 = vld [vmem:[%s4407_s28 + $0x64] ss:$16 sps:$4 sm:$0xff]  }
  0x49   : > { %s495_s25 = scalar_lea.vmem %s5806_s3, %s3527_s17  ;;  %v530_v11 = vld [vmem:[%s491_s29] sm:$0xff]  ;;  %v3748_v33 = vld [vmem:[%s5807_s1 + $0x8] sm:$0xff]   ;;  %p975_p8 = scmp.eq.s32.totalorder %s4215_s12, 0  ;;  %v3755_v42 = vld [vmem:[%s5807_s1 + $0x10] sm:$0xff]  }
  0x4a   : > { %v531_v12 = vld [vmem:[%s495_s25] sm:$0xf]  ;;  %v601_v17 = vrot.slane %v530_v11, %v600_v10  ;;  %v594_v18 = vcombine.high %v530_v11, %v530_v11  ;;  %v4501_v39 = vld [vmem:[%s4407_s28 + $0x6c] ss:$16 sps:$4 sm:$0xff]   ;;  %v4506_v40 = vld [vmem:[%s4407_s28 + $0x60] ss:$16 sps:$4 sm:$0xff]  }
  0x4b   : > { %v4428_v13 = vrot.slane %v531_v12, %v535_v6  ;;  %v4430_v14 = vrot.slane %v531_v12, %v539_v7  ;;  %v4432_v15 = vrot.slane %v531_v12, %v543_v8  ;;  %v4434_v16 = vrot.slane %v531_v12, %v547_v9  ;;  %v3744_v25 = vld [vmem:[%s5807_s1] sm:$0xff]   ;;  %v4512_v41 = vld [vmem:[%s4407_s28 + $0x84] ss:$16 sps:$4 sm:$0xff]   ;;  %v4528_v45 = vld [vmem:[%s4407_s28 + $0x80] ss:$16 sps:$4 sm:$0xff]   ;;  %s5808_s0 = sld [smem:[#allocation17_spill]] }
  0x4c   : > { %v609_v19 = vcombine.high %v601_v17, %v601_v17  ;;  %v638_v20 = vsel %vm636_vm0, %v601_v17, 0  ;;  %v608_v21 = vrot.slane %v594_v18, %v600_v10  ;;  %v4496_v38 = vld [vmem:[%s4407_s28 + $0x48] ss:$16 sps:$4 sm:$0xff]   ;;  %v4524_v44 = vld [vmem:[%s4407_s28 + $0x8c] ss:$16 sps:$4 sm:$0xff]   ;;  %v3762_v54 = vld [vmem:[%s5807_s1 + $0x18] sm:$0xff]  }
  0x4d   : > { %v4520_v43 = vld [vmem:[%s4407_s28 + $0x68] ss:$16 sps:$4 sm:$0xff]   ;;  %s977_s27 = scalar_select %p975_p8, 0, 15  ;;  %v4534_v46 = vld [vmem:[%s4407_s28 + $0xa4] ss:$16 sps:$4 sm:$0xff]  }
  0x4e   : > { %3538 = vmatprep.subr.msk.bf16.mxu0 %vm636_vm0, %v609_v19  ;;  %v610_v23 = vcombine.high %v608_v21, %v608_v21  ;;  %v644_v24 = vsel %vm636_vm0, %v608_v21, 0  ;;  %s1266_s19 = scalar_select %p975_p8, 1, 14  ;;  %v4540_v47 = vld [vmem:[%s4407_s28 + $0x88] ss:$16 sps:$4 sm:$0xff]   ;;  %v3776_v9 = vld [vmem:[%s5807_s1 + $0x28] sm:$0xff]  }
  0x4f   : > { %650 = vmatpush1.bf16.msra.mxu0 %v638_v20  ;;  %v4545_v48 = vld [vmem:[%s4407_s28 + $0xac] ss:$16 sps:$4 sm:$0xff]   ;;  %v4550_v49 = vld [vmem:[%s4407_s28 + $0xa0] ss:$16 sps:$4 sm:$0xff]   ;;  %v4555_v50 = vld [vmem:[%s4407_s28 + $0xc4] ss:$16 sps:$4 sm:$0xff]   ;;  %v978_v51 = vstv %s977_s27 }
  0x50   : > { %3547 = vmatprep.subr.msk.bf16.mxu1 %vm636_vm0, %v610_v23  ;;  %1156 = vmatprep.subr.bf16.mxu0 %v4438_v22  ;;  %v4560_v52 = vld [vmem:[%s4407_s28 + $0xa8] ss:$16 sps:$4 sm:$0xff]   ;;  %v1267_v53 = vstv %s1266_s19  ;;  %s1656_s25 = scalar_select %p975_p8, 4, 11  ;;  %v4569_v55 = vld [vmem:[%s4407_s28 + $0xcc] ss:$16 sps:$4 sm:$0xff]  }
  0x51   : > { %763 = vmatpush1.bf16.msra.mxu1 %v644_v24  ;;  %v4574_v56 = vld [vmem:[%s5808_s0] sm:$0xff]  ;;  %v4578_v57 = vld [vmem:[%s4407_s28 + $0xc0] ss:$16 sps:$4 sm:$0xff]   ;;  %v4583_v58 = vld [vmem:[%s4407_s28 + $0xe4] ss:$16 sps:$4 sm:$0xff]   ;;  %p5809_p0 = scmp.ne.s32.totalorder %s5801_s22, 0 }
  0x52   : > { %3539 = vmatmul.mubr.msk.bf16.vlgmr.msra.gmra.mrb[0].mxu0 %vm611_vm1, %v3744_v25  ;;  %1197 = vmatprep.subr.bf16.mxu1 %v4446_v26  ;;  %vm979_vm2 = vcmp.lt.s32.totalorder %v978_v51, %v4574_v56  ;;  %vm1268_vm3 = vcmp.lt.s32.totalorder %v1267_v53, %v4574_v56  ;;  %v4589_v60 = vld [vmem:[%s4407_s28 + $0xc8] ss:$16 sps:$4 sm:$0xff]   ;;  %v1657_v61 = vstv %s1656_s25  ;;  %s1916_s20 = scalar_select %p975_p8, 6, 9  ;;  %v4596_v62 = vld [vmem:[%s4407_s28 + $0xec] ss:$16 sps:$4 sm:$0xff]  }
  0x53   : > { %1157 = vmatpush1.bf16.msra.mxu0 %v4449_v27  ;;  %691 = vmatprep.mubr.bf16.mxu0 %v4229_v3  ;;  %v980_v59 = vsel %vm979_vm2, 1, %v4229_v3  ;;  %v4601_v63 = vld [vmem:[%s4407_s28 + $0xe0] ss:$16 sps:$4 sm:$0xff]   ;;  %v1269_v0 = vsel %vm1268_vm3, 1, %v4229_v3  ;;  %vm1658_vm4 = vcmp.lt.s32.totalorder %v1657_v61, %v4574_v56  ;;  %v4610_v1 = vld [vmem:[%s4407_s28 + $0xe8] ss:$16 sps:$4 sm:$0xff]  }
  0x54   : > { %3548 = vmatmul.mubr.msk.bf16.vlgmr.msra.gmra.mrb[0].mxu1 %vm611_vm1, %v3744_v25  ;;  %1158 = vmatprep.subr.bf16.mxu0 %v4454_v28  ;;  %v1917_v2 = vstv %s1916_s20  ;;  %s2176_s29 = scalar_select %p975_p8, 8, 7  ;;  %v3769_v4 = vld [vmem:[%s5807_s1 + $0x20] sm:$0xff]   ;;  %v1659_v5 = vsel %vm1658_vm4, 1, %v4229_v3  ;;  %v3783_v18 = vld [vmem:[%s5807_s1 + $0x30] sm:$0xff]   ;;  %v3790_v21 = vld [vmem:[%s5807_s1 + $0x38] sm:$0xff]  }
  0x55   : > { %804 = vmatprep.mubr.bf16.mxu1 %v4229_v3  ;;  %1198 = vmatpush1.bf16.msra.mxu1 %v4457_v29  ;;  %vm1918_vm5 = vcmp.lt.s32.totalorder %v1917_v2, %v4574_v56  ;;  %s2436_s25 = scalar_select %p975_p8, 10, 5  ;;  %v4665_v23 = vld [vmem:[%s499_s13] sm:$0xff] }
  0x56   : > { %1199 = vmatprep.subr.bf16.mxu1 %v4462_v30  ;;  %982 = vperm.xlu0 %3741, %v980_v59   ;;  %v2177_v6 = vstv %s2176_s29  ;;  %v1919_v7 = vsel %vm1918_vm5, 1, %v4229_v3  ;;  %s2696_s26 = scalar_select %p975_p8, 12, 3  ;;  %v995_v24 = vpack.c.bf16 %v4665_v23, %v4665_v23 }
  0x57   : > { %1159 = vmatpush1.bf16.msra.mxu0 %v4467_v31  ;;  %vm2178_vm6 = vcmp.lt.s32.totalorder %v2177_v6, %v4574_v56  ;;  %v2437_v8 = vstv %s2436_s25  ;;  %s2956_s21 = scalar_select %p975_p8, 14, 1 }
  0x58   : > { %1160 = vmatprep.subr.bf16.mxu0 %v4472_v32  ;;  %v2179_v10 = vsel %vm2178_vm6, 1, %v4229_v3  ;;  %vm2438_vm7 = vcmp.lt.s32.totalorder %v2437_v8, %v4574_v56  ;;  %v2697_v11 = vstv %s2696_s26  ;;  %s985_s17 = scalar_select %p975_p8, 0, 120 }
  0x59   : > { %1200 = vmatpush1.bf16.msra.mxu1 %v4480_v34  ;;  %v2439_v12 = vsel %vm2438_vm7, 1, %v4229_v3  ;;  %vm2698_vm8 = vcmp.lt.s32.totalorder %v2697_v11, %v4574_v56  ;;  %v2957_v17 = vstv %s2956_s21  ;;  %s503_s25 = scalar_lea.vmem %s5785_s6, %s4419_s16  ;;  %s3522_s16 = sshll.u32 %s4403_s18, 7 }
  0x5a   : > { %3540 = vmatmul.mubr.msk.bf16.gmra.mrb[4].mxu0 %vm611_vm1, %v3748_v33  ;;  %1201 = vmatprep.subr.bf16.mxu1 %v4484_v35  ;;  %v2699_v19 = vsel %vm2698_vm8, 1, %v4229_v3  ;;  %vm2958_vm9 = vcmp.lt.s32.totalorder %v2957_v17, %v4574_v56  ;;  %s986_s21 = sshra.s32 %s985_s17, 3  ;;  %s4782_s26 = scalar_lea.vmem [#allocation8], %s3522_s16 }
  0x5b   : > { %701 = vmatprep.mubr.bf16.mxu0 %v4229_v3  ;;  %1161 = vmatpush1.bf16.msra.mxu0 %v4488_v36  ;;  %v2959_v20 = vsel %vm2958_vm9, 1, %v4229_v3  ;;  %s3646_s20 = sshll.u32 %s986_s21, 5 }
  0x5c   : > { %3549 = vmatmul.mubr.msk.bf16.gmra.mrb[4].mxu1 %vm611_vm1, %v3748_v33  ;;  %1162 = vmatprep.subr.bf16.mxu0 %v4492_v37  ;;  %s990_s29 = scalar_lea.vmem [#allocation4], %s3646_s20 }
  0x5d   : > { %814 = vmatprep.mubr.bf16.mxu1 %v4229_v3  ;;  %1202 = vmatpush1.bf16.msra.mxu1 %v4496_v38  ;;  %s1396_s13 = scalar_select %p975_p8, 2, 13 }
  0x5e   : > { %1203 = vmatprep.subr.bf16.mxu1 %v4501_v39  ;;  %1271 = vperm.xlu0 %3741, %v1269_v0   ;;  %s1526_s17 = scalar_select %p975_p8, 3, 12 }
  0x5f   : > { %1163 = vmatpush1.bf16.msra.mxu0 %v4506_v40  ;;  %s1786_s21 = scalar_select %p975_p8, 5, 10 }
  0x60   : > { %1164 = vmatprep.subr.bf16.mxu0 %v4512_v41  ;;  %s2046_s20 = scalar_select %p975_p8, 7, 8 }
  0x61   : > { %1204 = vmatpush1.bf16.msra.mxu1 %v4520_v43  ;;  %s2566_s27 = scalar_select %p975_p8, 11, 4 }
  0x62   : > { %3541 = vmatmul.mubr.msk.bf16.gmra.mrb[8].mxu0 %vm611_vm1, %v3755_v42  ;;  %1205 = vmatprep.subr.bf16.mxu1 %v4524_v44  ;;  %s2826_s19 = scalar_select %p975_p8, 13, 2 }
  0x63   : > { %711 = vmatprep.mubr.bf16.mxu0 %v4229_v3  ;;  %1165 = vmatpush1.bf16.msra.mxu0 %v4528_v45  ;;  %s1274_s16 = scalar_select %p975_p8, 8, 112 }
  0x64   : > { %3550 = vmatmul.mubr.msk.bf16.gmra.mrb[8].mxu1 %vm611_vm1, %v3755_v42  ;;  %1166 = vmatprep.subr.bf16.mxu0 %v4534_v46 }
  0x65   : > { %824 = vmatprep.mubr.bf16.mxu1 %v4229_v3  ;;  %1206 = vmatpush1.bf16.msra.mxu1 %v4540_v47 }
  0x66   : > { %1207 = vmatprep.subr.bf16.mxu1 %v4545_v48  ;;  %1661 = vperm.xlu0 %3741, %v1659_v5  }
  0x67   : > { %1167 = vmatpush1.bf16.msra.mxu0 %v4550_v49 }
  0x68   : > { %1168 = vmatprep.subr.bf16.mxu0 %v4555_v50 }
  0x69   : > { %1208 = vmatpush1.bf16.msra.mxu1 %v4560_v52 }
  0x6a   : > { %3542 = vmatmul.mubr.msk.bf16.gmra.mrb[12].mxu0 %vm611_vm1, %v3762_v54  ;;  %1209 = vmatprep.subr.bf16.mxu1 %v4569_v55 }
  0x6b   : > { %721 = vmatprep.mubr.bf16.mxu0 %v4229_v3  ;;  %1169 = vmatpush1.bf16.msra.mxu0 %v4578_v57 }
  0x6c   : > { %3551 = vmatmul.mubr.msk.bf16.gmra.mrb[12].mxu1 %vm611_vm1, %v3762_v54  ;;  %1170 = vmatprep.subr.bf16.mxu0 %v4583_v58 }
  0x6d   : > { %834 = vmatprep.mubr.bf16.mxu1 %v4229_v3  ;;  %1210 = vmatpush1.bf16.msra.mxu1 %v4589_v60 }
  0x6e   : > { %1211 = vmatprep.subr.bf16.mxu1 %v4596_v62  ;;  %1921 = vperm.xlu0 %3741, %v1919_v7  }
  0x6f   : > { %1171 = vmatpush1.bf16.msra.mxu0 %v4601_v63 }
  0x70   : > { %1285 = vmatprep.subr.bf16.mxu0 %v4438_v22 }
  0x71   : > { %1212 = vmatpush1.bf16.msra.mxu1 %v4610_v1 }
  0x72   : > { %3543 = vmatmul.mubr.msk.bf16.gmra.mrb[16].mxu0 %vm611_vm1, %v3769_v4  ;;  %1326 = vmatprep.subr.bf16.mxu1 %v4446_v26 }
  0x73   : > { %731 = vmatprep.mubr.bf16.mxu0 %v4229_v3  ;;  %2181 = vperm.xlu0 %3741, %v2179_v10  }
  0x74   : > { %3552 = vmatmul.mubr.msk.bf16.gmra.mrb[16].mxu1 %vm611_vm1, %v3769_v4 }
  0x75   : > { %844 = vmatprep.mubr.bf16.mxu1 %v4229_v3 }
  0x77   : > { %2441 = vperm.xlu0 %3741, %v2439_v12  }
  0x7a   : > { %3544 = vmatmul.mubr.msk.bf16.gmra.mrb[20].mxu0 %vm611_vm1, %v3776_v9 }
  0x7b   : > { %741 = vmatprep.mubr.bf16.mxu0 %v4229_v3  ;;  %2701 = vperm.xlu0 %3741, %v2699_v19  }
  0x7c   : > { %3553 = vmatmul.mubr.msk.bf16.gmra.mrb[20].mxu1 %vm611_vm1, %v3776_v9 }
  0x7d   : > { %854 = vmatprep.mubr.bf16.mxu1 %v4229_v3 }
  0x7f   : > { %2961 = vperm.xlu0 %3741, %v2959_v20  }
  0x82   : > { %3545 = vmatmul.mubr.msk.bf16.gmra.mrb[24].mxu0 %vm611_vm1, %v3783_v18 }
  0x83   : > { %751 = vmatprep.mubr.bf16.mxu0 %v4229_v3 }
  0x84   : > { %3554 = vmatmul.mubr.msk.bf16.gmra.mrb[24].mxu1 %vm611_vm1, %v3783_v18 }
  0x85   : > { %864 = vmatprep.mubr.bf16.mxu1 %v4229_v3 }
  0x8a   : > { %3546 = vmatmul.mubr.msk.bf16.gmra.mrb[28].mxu0 %vm611_vm1, %v3790_v21 }
  0x8b   : > { %1188 = vmatprep.mubr.bf16.mxu0 %v4229_v3 }
  0x8c   : > { %3555 = vmatmul.mubr.msk.bf16.gmra.mrb[28].mxu1 %vm611_vm1, %v3790_v21 }
  0x8d   : > { %1229 = vmatprep.mubr.bf16.mxu1 %v4229_v3 }
  0x92   : > { %1189 = vmatmul.mubr.bf16.vlgmr.msra.gmra.mrb[32].mxu0 %v995_v24 }
  0x93   : > { %1286 = vmatpush1.bf16.msra.mxu0 %v4449_v27  ;;  %1317 = vmatprep.mubr.bf16.mxu0 %v4229_v3 }
  0x94   : > { %1230 = vmatmul.mubr.bf16.vlgmr.msra.gmra.mrb[32].mxu1 %v995_v24  ;;  %1287 = vmatprep.subr.bf16.mxu0 %v4454_v28 }
  0x95   : > { %1327 = vmatpush1.bf16.msra.mxu1 %v4457_v29  ;;  %1358 = vmatprep.mubr.bf16.mxu1 %v4229_v3 }
  0x96   : > { %1328 = vmatprep.subr.bf16.mxu1 %v4462_v30 }
  0x97   : > { %1288 = vmatpush1.bf16.msra.mxu0 %v4467_v31 }
  0x98   : > { %1289 = vmatprep.subr.bf16.mxu0 %v4472_v32 }
  0x99   : > { %1329 = vmatpush1.bf16.msra.mxu1 %v4480_v34 }
  0x9a   : > { %1330 = vmatprep.subr.bf16.mxu1 %v4484_v35 }
  0x9b   : > { %1290 = vmatpush1.bf16.msra.mxu0 %v4488_v36 }
  0x9c   : > { %1291 = vmatprep.subr.bf16.mxu0 %v4492_v37 }
  0x9d   : > { %1331 = vmatpush1.bf16.msra.mxu1 %v4496_v38 }
  0x9e   : > { %1332 = vmatprep.subr.bf16.mxu1 %v4501_v39 }
  0x9f   : > { %1292 = vmatpush1.bf16.msra.mxu0 %v4506_v40 }
  0xa0   : > { %1293 = vmatprep.subr.bf16.mxu0 %v4512_v41 }
  0xa1   : > { %1333 = vmatpush1.bf16.msra.mxu1 %v4520_v43 }
  0xa2   : > { %1334 = vmatprep.subr.bf16.mxu1 %v4524_v44 }
  0xa3   : > { %1294 = vmatpush1.bf16.msra.mxu0 %v4528_v45 }
  0xa4   : > { %1295 = vmatprep.subr.bf16.mxu0 %v4534_v46 }
  0xa5   : > { %1335 = vmatpush1.bf16.msra.mxu1 %v4540_v47 }
  0xa6   : > { %1336 = vmatprep.subr.bf16.mxu1 %v4545_v48 }
  0xa7   : > { %1296 = vmatpush1.bf16.msra.mxu0 %v4550_v49 }
  0xa8   : > { %1297 = vmatprep.subr.bf16.mxu0 %v4555_v50 }
  0xa9   : > { %1337 = vmatpush1.bf16.msra.mxu1 %v4560_v52 }
  0xaa   : > { %1338 = vmatprep.subr.bf16.mxu1 %v4569_v55 }
  0xab   : > { %1298 = vmatpush1.bf16.msra.mxu0 %v4578_v57 }
  0xac   : > { %1299 = vmatprep.subr.bf16.mxu0 %v4583_v58 }
  0xad   : > { %1339 = vmatpush1.bf16.msra.mxu1 %v4589_v60 }
  0xae   : > { %1340 = vmatprep.subr.bf16.mxu1 %v4596_v62 }
  0xaf   : > { %1300 = vmatpush1.bf16.msra.mxu0 %v4601_v63 }
  0xb0   : > { %1415 = vmatprep.subr.bf16.mxu0 %v4438_v22 }
  0xb1   : > { %1341 = vmatpush1.bf16.msra.mxu1 %v4610_v1 }
  0xb2   : > { %1456 = vmatprep.subr.bf16.mxu1 %v4446_v26 }
 0x125   : > { %v683_v25 = vpop.f32.mrb[0].mxu0 }
 0x126   : > { %v684_v33 = vadd.f32 %v683_v25, %v4428_v13  ;;  %v685_v42 = vpop.f32.mrb[1].mxu0 }
 0x127   : > { %v686_v51 = vadd.f32 %v685_v42, %v4430_v14  ;;  %v687_v53 = vpop.f32.mrb[2].mxu0  ;;  %v796_v54 = vpop.f32.mrb[0].mxu1 }
 0x128   : > { %875 = vst [vmem:[#allocation4] sm:$0xff] %v684_v33  ;;  %v688_v59 = vadd.f32 %v687_v53, %v4428_v13  ;;  %v689_v61 = vpop.f32.mrb[3].mxu0  ;;  %v797_v0 = vadd.f32 %v796_v54, %v4432_v15  ;;  %v798_v2 = vpop.f32.mrb[1].mxu1 }
 0x129   : > { %876 = vst [vmem:[#allocation4 + $0x8] sm:$0xff] %v686_v51  ;;  %v690_v22 = vadd.f32 %v689_v61, %v4430_v14  ;;  %v799_v4 = vadd.f32 %v798_v2, %v4434_v16  ;;  %v800_v5 = vpop.f32.mrb[2].mxu1 }
 0x12a   : > { %879 = vst [vmem:[#allocation4 + $0x20] sm:$0xff] %v688_v59  ;;  %877 = vst [vmem:[#allocation4 + $0x10] sm:$0xff] %v797_v0  ;;  %v801_v6 = vadd.f32 %v800_v5, %v4432_v15  ;;  %v802_v7 = vpop.f32.mrb[3].mxu1 }
 0x12b   : > { %880 = vst [vmem:[#allocation4 + $0x28] sm:$0xff] %v690_v22  ;;  %878 = vst [vmem:[#allocation4 + $0x18] sm:$0xff] %v799_v4  ;;  %v803_v8 = vadd.f32 %v802_v7, %v4434_v16 }
 0x12c   : > { %881 = vst [vmem:[#allocation4 + $0x30] sm:$0xff] %v801_v6 }
 0x12d   : > { %882 = vst [vmem:[#allocation4 + $0x38] sm:$0xff] %v803_v8  ;;  %v693_v9 = vpop.f32.mrb[4].mxu0 }
 0x12e   : > { %v694_v10 = vadd.f32 %v693_v9, %v4428_v13  ;;  %v695_v11 = vpop.f32.mrb[5].mxu0 }
 0x12f   : > { %v696_v12 = vadd.f32 %v695_v11, %v4430_v14  ;;  %v697_v17 = vpop.f32.mrb[6].mxu0  ;;  %v806_v18 = vpop.f32.mrb[4].mxu1 }
 0x130   : > { %883 = vst [vmem:[#allocation4 + $0x40] sm:$0xff] %v694_v10  ;;  %v698_v19 = vadd.f32 %v697_v17, %v4428_v13  ;;  %v699_v20 = vpop.f32.mrb[7].mxu0  ;;  %v807_v21 = vadd.f32 %v806_v18, %v4432_v15  ;;  %v808_v24 = vpop.f32.mrb[5].mxu1 }
 0x131   : > { %884 = vst [vmem:[#allocation4 + $0x48] sm:$0xff] %v696_v12  ;;  %v700_v25 = vadd.f32 %v699_v20, %v4430_v14  ;;  %v809_v33 = vadd.f32 %v808_v24, %v4434_v16  ;;  %v810_v42 = vpop.f32.mrb[6].mxu1 }
 0x132   : > { %887 = vst [vmem:[#allocation4 + $0x60] sm:$0xff] %v698_v19  ;;  %885 = vst [vmem:[#allocation4 + $0x50] sm:$0xff] %v807_v21  ;;  %v811_v51 = vadd.f32 %v810_v42, %v4432_v15  ;;  %v812_v53 = vpop.f32.mrb[7].mxu1 }
 0x133   : > { %888 = vst [vmem:[#allocation4 + $0x68] sm:$0xff] %v700_v25  ;;  %886 = vst [vmem:[#allocation4 + $0x58] sm:$0xff] %v809_v33  ;;  %v813_v54 = vadd.f32 %v812_v53, %v4434_v16 }
 0x134   : > { %889 = vst [vmem:[#allocation4 + $0x70] sm:$0xff] %v811_v51 }
 0x135   : > { %890 = vst [vmem:[#allocation4 + $0x78] sm:$0xff] %v813_v54  ;;  %v703_v59 = vpop.f32.mrb[8].mxu0 }
 0x136   : > { %v704_v61 = vadd.f32 %v703_v59, %v4428_v13  ;;  %v705_v0 = vpop.f32.mrb[9].mxu0 }
 0x137   : > { %v706_v2 = vadd.f32 %v705_v0, %v4430_v14  ;;  %v707_v22 = vpop.f32.mrb[10].mxu0  ;;  %v816_v4 = vpop.f32.mrb[8].mxu1 }
 0x138   : > { %891 = vst [vmem:[#allocation4 + $0x80] sm:$0xff] %v704_v61  ;;  %v708_v5 = vadd.f32 %v707_v22, %v4428_v13  ;;  %v709_v6 = vpop.f32.mrb[11].mxu0  ;;  %v817_v7 = vadd.f32 %v816_v4, %v4432_v15  ;;  %v818_v8 = vpop.f32.mrb[9].mxu1 }
 0x139   : > { %892 = vst [vmem:[#allocation4 + $0x88] sm:$0xff] %v706_v2  ;;  %v710_v9 = vadd.f32 %v709_v6, %v4430_v14  ;;  %v819_v10 = vadd.f32 %v818_v8, %v4434_v16  ;;  %v820_v11 = vpop.f32.mrb[10].mxu1 }
 0x13a   : > { %895 = vst [vmem:[#allocation4 + $0xa0] sm:$0xff] %v708_v5  ;;  %893 = vst [vmem:[#allocation4 + $0x90] sm:$0xff] %v817_v7  ;;  %v821_v12 = vadd.f32 %v820_v11, %v4432_v15  ;;  %v822_v17 = vpop.f32.mrb[11].mxu1 }
 0x13b   : > { %896 = vst [vmem:[#allocation4 + $0xa8] sm:$0xff] %v710_v9  ;;  %894 = vst [vmem:[#allocation4 + $0x98] sm:$0xff] %v819_v10  ;;  %v823_v18 = vadd.f32 %v822_v17, %v4434_v16 }
 0x13c   : > { %897 = vst [vmem:[#allocation4 + $0xb0] sm:$0xff] %v821_v12 }
 0x13d   : > { %898 = vst [vmem:[#allocation4 + $0xb8] sm:$0xff] %v823_v18  ;;  %v713_v19 = vpop.f32.mrb[12].mxu0 }
 0x13e   : > { %v714_v20 = vadd.f32 %v713_v19, %v4428_v13  ;;  %v715_v21 = vpop.f32.mrb[13].mxu0 }
 0x13f   : > { %v716_v24 = vadd.f32 %v715_v21, %v4430_v14  ;;  %v717_v25 = vpop.f32.mrb[14].mxu0  ;;  %v826_v33 = vpop.f32.mrb[12].mxu1 }
 0x140   : > { %899 = vst [vmem:[#allocation4 + $0xc0] sm:$0xff] %v714_v20  ;;  %v718_v42 = vadd.f32 %v717_v25, %v4428_v13  ;;  %v719_v51 = vpop.f32.mrb[15].mxu0  ;;  %v827_v53 = vadd.f32 %v826_v33, %v4432_v15  ;;  %v828_v54 = vpop.f32.mrb[13].mxu1 }
 0x141   : > { %900 = vst [vmem:[#allocation4 + $0xc8] sm:$0xff] %v716_v24  ;;  %v720_v59 = vadd.f32 %v719_v51, %v4430_v14  ;;  %v829_v61 = vadd.f32 %v828_v54, %v4434_v16  ;;  %v830_v0 = vpop.f32.mrb[14].mxu1 }
 0x142   : > { %903 = vst [vmem:[#allocation4 + $0xe0] sm:$0xff] %v718_v42  ;;  %901 = vst [vmem:[#allocation4 + $0xd0] sm:$0xff] %v827_v53  ;;  %v831_v2 = vadd.f32 %v830_v0, %v4432_v15  ;;  %v832_v22 = vpop.f32.mrb[15].mxu1 }
 0x143   : > { %904 = vst [vmem:[#allocation4 + $0xe8] sm:$0xff] %v720_v59  ;;  %902 = vst [vmem:[#allocation4 + $0xd8] sm:$0xff] %v829_v61  ;;  %v833_v4 = vadd.f32 %v832_v22, %v4434_v16 }
 0x144   : > { %905 = vst [vmem:[#allocation4 + $0xf0] sm:$0xff] %v831_v2 }
 0x145   : > { %906 = vst [vmem:[#allocation4 + $0xf8] sm:$0xff] %v833_v4  ;;  %v723_v5 = vpop.f32.mrb[16].mxu0 }
 0x146   : > { %v724_v6 = vadd.f32 %v723_v5, %v4428_v13  ;;  %v725_v7 = vpop.f32.mrb[17].mxu0 }
 0x147   : > { %v726_v8 = vadd.f32 %v725_v7, %v4430_v14  ;;  %v727_v9 = vpop.f32.mrb[18].mxu0  ;;  %v836_v10 = vpop.f32.mrb[16].mxu1 }
 0x148   : > { %907 = vst [vmem:[#allocation4 + $0x100] sm:$0xff] %v724_v6  ;;  %v728_v11 = vadd.f32 %v727_v9, %v4428_v13  ;;  %v837_v12 = vadd.f32 %v836_v10, %v4432_v15  ;;  %v729_v17 = vpop.f32.mrb[19].mxu0  ;;  %v838_v18 = vpop.f32.mrb[17].mxu1 }
 0x149   : > { %908 = vst [vmem:[#allocation4 + $0x108] sm:$0xff] %v726_v8  ;;  %v730_v19 = vadd.f32 %v729_v17, %v4430_v14  ;;  %v839_v20 = vadd.f32 %v838_v18, %v4434_v16  ;;  %v840_v21 = vpop.f32.mrb[18].mxu1 }
 0x14a   : > { %911 = vst [vmem:[#allocation4 + $0x120] sm:$0xff] %v728_v11  ;;  %909 = vst [vmem:[#allocation4 + $0x110] sm:$0xff] %v837_v12  ;;  %v841_v24 = vadd.f32 %v840_v21, %v4432_v15  ;;  %v842_v25 = vpop.f32.mrb[19].mxu1 }
 0x14b   : > { %912 = vst [vmem:[#allocation4 + $0x128] sm:$0xff] %v730_v19  ;;  %910 = vst [vmem:[#allocation4 + $0x118] sm:$0xff] %v839_v20  ;;  %v843_v33 = vadd.f32 %v842_v25, %v4434_v16 }
 0x14c   : > { %913 = vst [vmem:[#allocation4 + $0x130] sm:$0xff] %v841_v24 }
 0x14d   : > { %914 = vst [vmem:[#allocation4 + $0x138] sm:$0xff] %v843_v33  ;;  %v733_v42 = vpop.f32.mrb[20].mxu0 }
 0x14e   : > { %v734_v51 = vadd.f32 %v733_v42, %v4428_v13  ;;  %v735_v53 = vpop.f32.mrb[21].mxu0 }
 0x14f   : > { %v736_v54 = vadd.f32 %v735_v53, %v4430_v14  ;;  %v737_v59 = vpop.f32.mrb[22].mxu0  ;;  %v846_v61 = vpop.f32.mrb[20].mxu1 }
 0x150   : > { %915 = vst [vmem:[#allocation4 + $0x140] sm:$0xff] %v734_v51  ;;  %v738_v0 = vadd.f32 %v737_v59, %v4428_v13  ;;  %v847_v2 = vadd.f32 %v846_v61, %v4432_v15  ;;  %v739_v22 = vpop.f32.mrb[23].mxu0  ;;  %v848_v4 = vpop.f32.mrb[21].mxu1 }
 0x151   : > { %916 = vst [vmem:[#allocation4 + $0x148] sm:$0xff] %v736_v54  ;;  %v740_v5 = vadd.f32 %v739_v22, %v4430_v14  ;;  %v849_v6 = vadd.f32 %v848_v4, %v4434_v16  ;;  %v850_v7 = vpop.f32.mrb[22].mxu1 }
 0x152   : > { %919 = vst [vmem:[#allocation4 + $0x160] sm:$0xff] %v738_v0  ;;  %917 = vst [vmem:[#allocation4 + $0x150] sm:$0xff] %v847_v2  ;;  %v851_v8 = vadd.f32 %v850_v7, %v4432_v15  ;;  %v852_v9 = vpop.f32.mrb[23].mxu1 }
 0x153   : > { %920 = vst [vmem:[#allocation4 + $0x168] sm:$0xff] %v740_v5  ;;  %918 = vst [vmem:[#allocation4 + $0x158] sm:$0xff] %v849_v6  ;;  %v853_v10 = vadd.f32 %v852_v9, %v4434_v16 }
 0x154   : > { %921 = vst [vmem:[#allocation4 + $0x170] sm:$0xff] %v851_v8 }
 0x155   : > { %922 = vst [vmem:[#allocation4 + $0x178] sm:$0xff] %v853_v10  ;;  %v743_v11 = vpop.f32.mrb[24].mxu0 }
 0x156   : > { %v744_v12 = vadd.f32 %v743_v11, %v4428_v13  ;;  %v745_v17 = vpop.f32.mrb[25].mxu0 }
 0x157   : > { %v746_v18 = vadd.f32 %v745_v17, %v4430_v14  ;;  %v747_v19 = vpop.f32.mrb[26].mxu0  ;;  %v856_v20 = vpop.f32.mrb[24].mxu1 }
 0x158   : > { %923 = vst [vmem:[#allocation4 + $0x180] sm:$0xff] %v744_v12  ;;  %v748_v21 = vadd.f32 %v747_v19, %v4428_v13  ;;  %v857_v24 = vadd.f32 %v856_v20, %v4432_v15  ;;  %v749_v25 = vpop.f32.mrb[27].mxu0  ;;  %v858_v33 = vpop.f32.mrb[25].mxu1 }
 0x159   : > { %924 = vst [vmem:[#allocation4 + $0x188] sm:$0xff] %v746_v18  ;;  %v750_v42 = vadd.f32 %v749_v25, %v4430_v14  ;;  %v859_v51 = vadd.f32 %v858_v33, %v4434_v16  ;;  %v860_v53 = vpop.f32.mrb[26].mxu1 }
 0x15a   : > { %927 = vst [vmem:[#allocation4 + $0x1a0] sm:$0xff] %v748_v21  ;;  %925 = vst [vmem:[#allocation4 + $0x190] sm:$0xff] %v857_v24  ;;  %v861_v54 = vadd.f32 %v860_v53, %v4432_v15  ;;  %v862_v59 = vpop.f32.mrb[27].mxu1 }
 0x15b   : > { %928 = vst [vmem:[#allocation4 + $0x1a8] sm:$0xff] %v750_v42  ;;  %926 = vst [vmem:[#allocation4 + $0x198] sm:$0xff] %v859_v51  ;;  %v863_v61 = vadd.f32 %v862_v59, %v4434_v16 }
 0x15c   : > { %929 = vst [vmem:[#allocation4 + $0x1b0] sm:$0xff] %v861_v54 }
 0x15d   : > { %930 = vst [vmem:[#allocation4 + $0x1b8] sm:$0xff] %v863_v61  ;;  %v753_v0 = vpop.f32.mrb[28].mxu0 }
 0x15e   : > { %v754_v2 = vadd.f32 %v753_v0, %v4428_v13  ;;  %v755_v22 = vpop.f32.mrb[29].mxu0 }
 0x15f   : > { %v756_v4 = vadd.f32 %v755_v22, %v4430_v14  ;;  %v757_v5 = vpop.f32.mrb[30].mxu0  ;;  %v866_v6 = vpop.f32.mrb[28].mxu1 }
 0x160   : > { %931 = vst [vmem:[#allocation4 + $0x1c0] sm:$0xff] %v754_v2  ;;  %v758_v7 = vadd.f32 %v757_v5, %v4428_v13  ;;  %v867_v8 = vadd.f32 %v866_v6, %v4432_v15  ;;  %v759_v9 = vpop.f32.mrb[31].mxu0  ;;  %v868_v10 = vpop.f32.mrb[29].mxu1 }
 0x161   : > { %932 = vst [vmem:[#allocation4 + $0x1c8] sm:$0xff] %v756_v4  ;;  %v760_v11 = vadd.f32 %v759_v9, %v4430_v14  ;;  %v869_v12 = vadd.f32 %v868_v10, %v4434_v16  ;;  %v870_v17 = vpop.f32.mrb[30].mxu1 }
 0x162   : > { %935 = vst [vmem:[#allocation4 + $0x1e0] sm:$0xff] %v758_v7  ;;  %933 = vst [vmem:[#allocation4 + $0x1d0] sm:$0xff] %v867_v8  ;;  %v871_v18 = vadd.f32 %v870_v17, %v4432_v15  ;;  %v872_v19 = vpop.f32.mrb[31].mxu1 }
 0x163   : > { %936 = vst [vmem:[#allocation4 + $0x1e8] sm:$0xff] %v760_v11  ;;  %934 = vst [vmem:[#allocation4 + $0x1d8] sm:$0xff] %v869_v12  ;;  %v873_v13 = vadd.f32 %v872_v19, %v4434_v16  ;;  %v512_v11 = vld [vmem:[%s503_s25] sm:$0xff]  ;;  %v983_v19 = vpop.permute.xlu0 %982  ;;  %s3086_s25 = scalar_select %p975_p8, 15, 0 }
 0x164   : > { %937 = vst [vmem:[#allocation4 + $0x1f0] sm:$0xff] %v871_v18  ;;  %vm984_vm10 = vcmp.eq.s32.totalorder %v983_v19, 1 }
 0x165   : > { %938 = vst [vmem:[#allocation4 + $0x1f8] sm:$0xff] %v873_v13  ;;  %v1190_v20 = vpop.f32.mrb[32].mxu0 }
 0x166   : > { %v1192_v21 = vpop.f32.mrb[33].mxu0 }
 0x167   : > { %v1194_v24 = vpop.f32.mrb[34].mxu0  ;;  %v1231_v25 = vpop.f32.mrb[32].mxu1 }
 0x168   : > { %v1195_v14 = vpop.f32.mrb[35].mxu0  ;;  %v1233_v33 = vpop.f32.mrb[33].mxu1 }
 0x169   : > { %v1235_v51 = vpop.f32.mrb[34].mxu1 }
 0x16a   : > { %v1236_v54 = vpop.f32.mrb[35].mxu1 }
 0x16c   : > { %v991_v42 = vld [vmem:[%s990_s29] sm:$0xff]  ;;  %v992_v15 = vld [vmem:[%s990_s29 + $0x8] sm:$0xff]  ;;  %v993_v61 = vld [vmem:[%s990_s29 + $0x10] sm:$0xff] }
 0x16d   : > { %v1238_v53 = vadd.f32 %v1190_v20, %v991_v42  ;;  %v1239_v59 = vadd.f32 %v1192_v21, %v992_v15  ;;  %v1240_v2 = vadd.f32 %v1231_v25, %v993_v61  ;;  %v994_v22 = vld [vmem:[%s990_s29 + $0x18] sm:$0xff]  ;;  %s2306_s29 = scalar_select %p975_p8, 9, 6 }
 0x16e   : > { %v1241_v4 = vadd.f32 %v1233_v33, %v994_v22 }
 0x16f   : > { %v1242_v0 = vmul.f32 0.5, %v1238_v53  ;;  %v1246_v16 = vmul.f32 0.5, %v1239_v59 }
 0x170   : > { %v1251_v5 = vmul.f32 0.5, %v1241_v4 }
 0x171   : > { %3800 = vtanh.f32 %v1242_v0 }
 0x172   : > { %3802 = vtanh.f32 %v1246_v16 }
 0x173   : > { %3804 = vtanh.f32 %v1240_v2 }
 0x174   : > { %3806 = vtanh.f32 %v1251_v5 }
 0x17b   : > { %v3801_v6 = vpop.eup %3800 }
 0x17c   : > { %v3803_v7 = vpop.eup %3802  ;;  %v1244_v8 = vmul.f32 0.5, %v3801_v6 }
 0x17d   : > { %v1248_v9 = vmul.f32 0.5, %v3803_v7  ;;  %v3805_v12 = vpop.eup %3804 }
 0x17e   : > { %v1245_v10 = vadd.f32 0.5, %v1244_v8  ;;  %v3807_v24 = vpop.eup %3806 }
 0x17f   : > { %v1249_v17 = vadd.f32 0.5, %v1248_v9  ;;  %v1253_v25 = vmul.f32 0.5, %v3807_v24 }
 0x180   : > { %v1256_v18 = vmul.f32 %v3805_v12, %v1245_v10 }
 0x181   : > { %v1255_v13 = vmul.f32 %v1249_v17, %v512_v11  ;;  %v1254_v14 = vadd.f32 0.5, %v1253_v25  ;;  %v1272_v17 = vpop.permute.xlu0 %1271 }
 0x182   : > { %vm1273_vm3 = vcmp.eq.s32.totalorder %v1272_v17, 1 }
 0x183   : > { %v1257_v20 = vadd.f32 %v1256_v18, %v1255_v13 }
 0x185   : > { %3808 = vtanh.f32 %v1257_v20  ;;  %v4776_v21 = vsel %vm984_vm10, %v1257_v20, %v512_v11 }
 0x18f   : > { %v3809_v33 = vpop.eup %3808 }
 0x190   : > { %v1259_v42 = vmul.f32 %v3809_v33, %v1254_v14 }
 0x192   : > { %v4780_v51 = vsel %vm984_vm10, %v1259_v42, %v4665_v23  ;;  %v1262_v53 = vsel %vm984_vm10, %v1259_v42, 0.0 }
 0x193   : > { %1263 = vst [vmem:[%s4782_s26] sm:$0xff] %v1262_v53  ;;  %v1284_v15 = vpack.c.bf16 %v4780_v51, %v4780_v51 }
 0x195   : > { %1318 = vmatmul.mubr.bf16.vlgmr.msra.gmra.mrb[36].mxu0 %v1284_v15  ;;  %1359 = vmatmul.mubr.bf16.vlgmr.msra.gmra.mrb[36].mxu1 %v1284_v15  ;;  %v4873_v15 = vld [vmem:[%s4407_s28 + $0x8] ss:$16 sps:$4 sm:$0xff]  }
 0x196   : > { %1416 = vmatpush1.bf16.msra.mxu0 %v4449_v27  ;;  %1457 = vmatpush1.bf16.msra.mxu1 %v4457_v29  ;;  %v4820_v27 = vld [vmem:[%s4407_s28 + $0x4] ss:$16 sps:$4 sm:$0xff]   ;;  %v1527_v29 = vstv %s1526_s17 }
 0x197   : > { %1417 = vmatprep.subr.bf16.mxu0 %v4454_v28  ;;  %1458 = vmatprep.subr.bf16.mxu1 %v4462_v30  ;;  %v1397_v28 = vstv %s1396_s13  ;;  %vm1528_vm12 = vcmp.lt.s32.totalorder %v1527_v29, %v4574_v56  ;;  %s1275_s13 = sshra.s32 %s1274_s16, 3  ;;  %v4887_v29 = vld [vmem:[%s4407_s28 + $0x20] ss:$16 sps:$4 sm:$0xff]  }
 0x198   : > { %1447 = vmatprep.mubr.bf16.mxu0 %v4229_v3  ;;  %1488 = vmatprep.mubr.bf16.mxu1 %v4229_v3  ;;  %vm1398_vm11 = vcmp.lt.s32.totalorder %v1397_v28, %v4574_v56  ;;  %s3647_s17 = sshll.u32 %s1275_s13, 5  ;;  %v4881_v28 = vld [vmem:[%s4407_s28 + $0x2c] ss:$16 sps:$4 sm:$0xff]  }
 0x199   : > { %v1399_v30 = vsel %vm1398_vm11, 1, %v4229_v3 }
 0x19a   : > { %1418 = vmatpush1.bf16.msra.mxu0 %v4467_v31  ;;  %1459 = vmatpush1.bf16.msra.mxu1 %v4480_v34  ;;  %v1787_v31 = vstv %s1786_s21  ;;  %s1279_s21 = scalar_lea.vmem [#allocation4], %s3647_s17 }
 0x19b   : > { %1419 = vmatprep.subr.bf16.mxu0 %v4472_v32  ;;  %1460 = vmatprep.subr.bf16.mxu1 %v4484_v35  ;;  %vm1788_vm13 = vcmp.lt.s32.totalorder %v1787_v31, %v4574_v56  ;;  %v2047_v32 = vstv %s2046_s20  ;;  %v2307_v35 = vstv %s2306_s29  ;;  %v1282_v59 = vld [vmem:[%s1279_s21 + $0x10] sm:$0xff]  ;;  %v1283_v16 = vld [vmem:[%s1279_s21 + $0x18] sm:$0xff]  ;;  %s1404_s20 = scalar_select %p975_p8, 16, 104 }
 0x19c   : > { %1401 = vperm.xlu1 %3742, %v1399_v30   ;;  %v1789_v34 = vsel %vm1788_vm13, 1, %v4229_v3  ;;  %vm2048_vm14 = vcmp.lt.s32.totalorder %v2047_v32, %v4574_v56  ;;  %vm2308_vm15 = vcmp.lt.s32.totalorder %v2307_v35, %v4574_v56  ;;  %v4891_v30 = vld [vmem:[%s4407_s28 + $0x28] ss:$16 sps:$4 sm:$0xff]   ;;  %v4895_v31 = vld [vmem:[%s4407_s28 + $0x44] ss:$16 sps:$4 sm:$0xff]  }
 0x19d   : > { %v4903_v32 = vld [vmem:[%s4407_s28 + $0x40] ss:$16 sps:$4 sm:$0xff]   ;;  %v4911_v35 = vld [vmem:[%s4407_s28 + $0x64] ss:$16 sps:$4 sm:$0xff]   ;;  %s1405_s29 = sshra.s32 %s1404_s20, 3 }
 0x19e   : > { %1420 = vmatpush1.bf16.msra.mxu0 %v4488_v36  ;;  %1461 = vmatpush1.bf16.msra.mxu1 %v4496_v38  ;;  %v2049_v36 = vsel %vm2048_vm14, 1, %v4229_v3  ;;  %v2309_v38 = vsel %vm2308_vm15, 1, %v4229_v3 }
 0x19f   : > { %1421 = vmatprep.subr.bf16.mxu0 %v4492_v37  ;;  %1462 = vmatprep.subr.bf16.mxu1 %v4501_v39  ;;  %v2567_v37 = vstv %s2566_s27  ;;  %v2827_v39 = vstv %s2826_s19  ;;  %s3648_s27 = sshll.u32 %s1405_s29, 5 }
 0x1a0   : > { %vm2568_vm0 = vcmp.lt.s32.totalorder %v2567_v37, %v4574_v56  ;;  %vm2828_vm1 = vcmp.lt.s32.totalorder %v2827_v39, %v4574_v56  ;;  %v4919_v37 = vld [vmem:[%s4407_s28 + $0x60] ss:$16 sps:$4 sm:$0xff]   ;;  %v4927_v39 = vld [vmem:[%s4407_s28 + $0x84] ss:$16 sps:$4 sm:$0xff]   ;;  %s1409_s19 = scalar_lea.vmem [#allocation4], %s3648_s27 }
 0x1a2   : > { %1422 = vmatpush1.bf16.msra.mxu0 %v4506_v40  ;;  %1463 = vmatpush1.bf16.msra.mxu1 %v4520_v43  ;;  %v2569_v40 = vsel %vm2568_vm0, 1, %v4229_v3  ;;  %v2829_v43 = vsel %vm2828_vm1, 1, %v4229_v3 }
 0x1a3   : > { %1423 = vmatprep.subr.bf16.mxu0 %v4512_v41  ;;  %1464 = vmatprep.subr.bf16.mxu1 %v4524_v44  ;;  %v3087_v41 = vstv %s3086_s25  ;;  %s1534_s25 = scalar_select %p975_p8, 24, 96 }
 0x1a4   : > { %vm3088_vm2 = vcmp.lt.s32.totalorder %v3087_v41, %v4574_v56  ;;  %v4935_v41 = vld [vmem:[%s4407_s28 + $0x80] ss:$16 sps:$4 sm:$0xff]  }
 0x1a5   : > { %v3089_v44 = vsel %vm3088_vm2, 1, %v4229_v3  ;;  %s1535_s16 = sshra.s32 %s1534_s25, 3 }
 0x1a6   : > { %1424 = vmatpush1.bf16.msra.mxu0 %v4528_v45  ;;  %1465 = vmatpush1.bf16.msra.mxu1 %v4540_v47  ;;  %v1280_v45 = vld [vmem:[%s1279_s21] sm:$0xff]  ;;  %s3649_s13 = sshll.u32 %s1535_s16, 5 }
 0x1a7   : > { %1425 = vmatprep.subr.bf16.mxu0 %v4534_v46  ;;  %1466 = vmatprep.subr.bf16.mxu1 %v4545_v48  ;;  %s1539_s17 = scalar_lea.vmem [#allocation4], %s3649_s13 }
 0x1aa   : > { %1426 = vmatpush1.bf16.msra.mxu0 %v4550_v49  ;;  %1467 = vmatpush1.bf16.msra.mxu1 %v4560_v52  ;;  %v1281_v49 = vld [vmem:[%s1279_s21 + $0x8] sm:$0xff]  ;;  %s1664_s21 = scalar_select %p975_p8, 32, 88 }
 0x1ab   : > { %1427 = vmatprep.subr.bf16.mxu0 %v4555_v50  ;;  %1468 = vmatprep.subr.bf16.mxu1 %v4569_v55 }
 0x1ac   : > { %s1665_s20 = sshra.s32 %s1664_s21, 3 }
 0x1ad   : > { %s3650_s29 = sshll.u32 %s1665_s20, 5 }
 0x1ae   : > { %1428 = vmatpush1.bf16.msra.mxu0 %v4578_v57  ;;  %1469 = vmatpush1.bf16.msra.mxu1 %v4589_v60  ;;  %s1669_s27 = scalar_lea.vmem [#allocation4], %s3650_s29 }
 0x1af   : > { %1429 = vmatprep.subr.bf16.mxu0 %v4583_v58  ;;  %1470 = vmatprep.subr.bf16.mxu1 %v4596_v62 }
 0x1b2   : > { %1430 = vmatpush1.bf16.msra.mxu0 %v4601_v63  ;;  %1471 = vmatpush1.bf16.msra.mxu1 %v4610_v1 }
 0x1b3   : > { %1545 = vmatprep.subr.bf16.mxu0 %v4820_v27  ;;  %1586 = vmatprep.subr.bf16.mxu1 %v4446_v26  ;;  %v1529_v26 = vsel %vm1528_vm12, 1, %v4229_v3 }
 0x1b4   : > { %1531 = vperm.xlu1 %3742, %v1529_v26   ;;  %v4899_v26 = vld [vmem:[%s4407_s28 + $0x4c] ss:$16 sps:$4 sm:$0xff]  }
 0x1b8   : > { %1791 = vperm.xlu1 %3742, %v1789_v34   ;;  %v4907_v34 = vld [vmem:[%s4407_s28 + $0x48] ss:$16 sps:$4 sm:$0xff]  }
 0x1bc   : > { %2051 = vperm.xlu1 %3742, %v2049_v36   ;;  %v4915_v36 = vld [vmem:[%s4407_s28 + $0x6c] ss:$16 sps:$4 sm:$0xff]  }
 0x1c0   : > { %2311 = vperm.xlu1 %3742, %v2309_v38   ;;  %v4923_v38 = vld [vmem:[%s4407_s28 + $0x68] ss:$16 sps:$4 sm:$0xff]  }
 0x1c4   : > { %2571 = vperm.xlu1 %3742, %v2569_v40   ;;  %v4931_v40 = vld [vmem:[%s4407_s28 + $0x8c] ss:$16 sps:$4 sm:$0xff]  }
 0x1c8   : > { %2831 = vperm.xlu1 %3742, %v2829_v43   ;;  %v4939_v43 = vld [vmem:[%s4407_s28 + $0x88] ss:$16 sps:$4 sm:$0xff]  }
 0x1cc   : > { %3091 = vperm.xlu1 %3742, %v3089_v44   ;;  %v4943_v44 = vld [vmem:[%s4407_s28 + $0xa4] ss:$16 sps:$4 sm:$0xff]  }
 0x268   : > { %v1319_v46 = vpop.f32.mrb[36].mxu0  ;;  %v1360_v47 = vpop.f32.mrb[36].mxu1 }
 0x269   : > { %v1367_v48 = vadd.f32 %v1319_v46, %v1280_v45  ;;  %v1321_v50 = vpop.f32.mrb[37].mxu0  ;;  %v1362_v52 = vpop.f32.mrb[37].mxu1  ;;  %v1369_v0 = vadd.f32 %v1360_v47, %v1282_v59  ;;  %v4947_v45 = vld [vmem:[%s4407_s28 + $0xac] ss:$16 sps:$4 sm:$0xff]   ;;  %v4951_v46 = vld [vmem:[%s4407_s28 + $0xa0] ss:$16 sps:$4 sm:$0xff]  }
 0x26a   : > { %v1368_v55 = vadd.f32 %v1321_v50, %v1281_v49  ;;  %v1323_v57 = vpop.f32.mrb[38].mxu0  ;;  %v1364_v58 = vpop.f32.mrb[38].mxu1  ;;  %v1370_v2 = vadd.f32 %v1362_v52, %v1283_v16  ;;  %v4955_v47 = vld [vmem:[%s4407_s28 + $0xa8] ss:$16 sps:$4 sm:$0xff]   ;;  %v4963_v49 = vld [vmem:[%s4407_s28 + $0xcc] ss:$16 sps:$4 sm:$0xff]  }
 0x26b   : > { %v1371_v56 = vmul.f32 0.5, %v1367_v48  ;;  %v1324_v23 = vpop.f32.mrb[39].mxu0  ;;  %v1365_v54 = vpop.f32.mrb[39].mxu1  ;;  %v4959_v48 = vld [vmem:[%s4407_s28 + $0xc4] ss:$16 sps:$4 sm:$0xff]  }
 0x26c   : > { %v1375_v61 = vmul.f32 0.5, %v1368_v55  ;;  %v1380_v22 = vmul.f32 0.5, %v1370_v2  ;;  %v4967_v50 = vld [vmem:[%s4407_s28 + $0xc0] ss:$16 sps:$4 sm:$0xff]   ;;  %v4972_v52 = vld [vmem:[%s4407_s28 + $0xe4] ss:$16 sps:$4 sm:$0xff]  }
 0x26d   : > { %3810 = vtanh.f32 %v1371_v56  ;;  %v4980_v55 = vld [vmem:[%s4407_s28 + $0xc] ss:$16 sps:$4 sm:$0xff]  }
 0x26e   : > { %3812 = vtanh.f32 %v1375_v61  ;;  %v1412_v2 = vld [vmem:[%s1409_s19 + $0x10] sm:$0xff] }
 0x26f   : > { %3814 = vtanh.f32 %v1369_v0 }
 0x270   : > { %3816 = vtanh.f32 %v1380_v22 }
 0x277   : > { %v3811_v4 = vpop.eup %3810 }
 0x278   : > { %v3813_v5 = vpop.eup %3812  ;;  %v1373_v6 = vmul.f32 0.5, %v3811_v4 }
 0x279   : > { %v1377_v7 = vmul.f32 0.5, %v3813_v5  ;;  %v3815_v9 = vpop.eup %3814  ;;  %v1413_v5 = vld [vmem:[%s1409_s19 + $0x18] sm:$0xff] }
 0x27a   : > { %v1374_v8 = vadd.f32 0.5, %v1373_v6  ;;  %v3817_v13 = vpop.eup %3816 }
 0x27b   : > { %v1378_v10 = vadd.f32 0.5, %v1377_v7  ;;  %v1382_v20 = vmul.f32 0.5, %v3817_v13 }
 0x27c   : > { %v1385_v11 = vmul.f32 %v3815_v9, %v1374_v8 }
 0x27d   : > { %v1384_v12 = vmul.f32 %v1378_v10, %v4776_v21  ;;  %v1383_v24 = vadd.f32 0.5, %v1382_v20  ;;  %v1402_v20 = vpop.permute.xlu1 %1401 }
 0x27e   : > { %vm1403_vm4 = vcmp.eq.s32.totalorder %v1402_v20, 1 }
 0x27f   : > { %v1386_v18 = vadd.f32 %v1385_v11, %v1384_v12 }
 0x281   : > { %3818 = vtanh.f32 %v1386_v18  ;;  %v4860_v19 = vsel %vm1273_vm3, %v1386_v18, %v4776_v21  ;;  %v4869_v21 = vld [vmem:[%s4407_s28] ss:$16 sps:$4 sm:$0xff]  }
 0x28b   : > { %v3819_v25 = vpop.eup %3818 }
 0x28c   : > { %v1388_v14 = vmul.f32 %v3819_v25, %v1383_v24 }
 0x28e   : > { %v1391_v33 = vsel %vm1273_vm3, %v1388_v14, 0.0  ;;  %v4863_v42 = vsel %vm1273_vm3, %v1388_v14, %v4780_v51  ;;  %v4877_v51 = vld [vmem:[%s4407_s28 + $0x24] ss:$16 sps:$4 sm:$0xff]  }
 0x28f   : > { %3592 = vst [vmem:[%s4782_s26 + $0x8] sm:$0xff] %v1391_v33  ;;  %v1414_v53 = vpack.c.bf16 %v4863_v42, %v4863_v42 }
 0x291   : > { %1448 = vmatmul.mubr.bf16.vlgmr.msra.gmra.mrb[40].mxu0 %v1414_v53  ;;  %1489 = vmatmul.mubr.bf16.vlgmr.msra.gmra.mrb[40].mxu1 %v1414_v53 }
 0x292   : > { %1546 = vmatpush1.bf16.msra.mxu0 %v4869_v21  ;;  %1587 = vmatpush1.bf16.msra.mxu1 %v4873_v15 }
 0x293   : > { %1547 = vmatprep.subr.bf16.mxu0 %v4877_v51  ;;  %1588 = vmatprep.subr.bf16.mxu1 %v4881_v28 }
 0x294   : > { %1577 = vmatprep.mubr.bf16.mxu0 %v4229_v3  ;;  %1618 = vmatprep.mubr.bf16.mxu1 %v4229_v3 }
 0x296   : > { %1548 = vmatpush1.bf16.msra.mxu0 %v4887_v29  ;;  %1589 = vmatpush1.bf16.msra.mxu1 %v4891_v30 }
 0x297   : > { %1549 = vmatprep.subr.bf16.mxu0 %v4895_v31  ;;  %1590 = vmatprep.subr.bf16.mxu1 %v4899_v26 }
 0x29a   : > { %1550 = vmatpush1.bf16.msra.mxu0 %v4903_v32  ;;  %1591 = vmatpush1.bf16.msra.mxu1 %v4907_v34 }
 0x29b   : > { %1551 = vmatprep.subr.bf16.mxu0 %v4911_v35  ;;  %1592 = vmatprep.subr.bf16.mxu1 %v4915_v36 }
 0x29e   : > { %1552 = vmatpush1.bf16.msra.mxu0 %v4919_v37  ;;  %1593 = vmatpush1.bf16.msra.mxu1 %v4923_v38 }
 0x29f   : > { %1553 = vmatprep.subr.bf16.mxu0 %v4927_v39  ;;  %1594 = vmatprep.subr.bf16.mxu1 %v4931_v40 }
 0x2a2   : > { %1554 = vmatpush1.bf16.msra.mxu0 %v4935_v41  ;;  %1595 = vmatpush1.bf16.msra.mxu1 %v4939_v43 }
 0x2a3   : > { %1555 = vmatprep.subr.bf16.mxu0 %v4943_v44  ;;  %1596 = vmatprep.subr.bf16.mxu1 %v4947_v45 }
 0x2a6   : > { %1556 = vmatpush1.bf16.msra.mxu0 %v4951_v46  ;;  %1597 = vmatpush1.bf16.msra.mxu1 %v4955_v47 }
 0x2a7   : > { %1557 = vmatprep.subr.bf16.mxu0 %v4959_v48  ;;  %1598 = vmatprep.subr.bf16.mxu1 %v4963_v49 }
 0x2aa   : > { %1558 = vmatpush1.bf16.msra.mxu0 %v4967_v50  ;;  %1599 = vmatpush1.bf16.msra.mxu1 %v4589_v60  ;;  %v1410_v60 = vld [vmem:[%s1409_s19] sm:$0xff] }
 0x2ab   : > { %1559 = vmatprep.subr.bf16.mxu0 %v4972_v52  ;;  %1600 = vmatprep.subr.bf16.mxu1 %v4596_v62  ;;  %v1411_v62 = vld [vmem:[%s1409_s19 + $0x8] sm:$0xff]  ;;  %s1794_s19 = scalar_select %p975_p8, 40, 80 }
 0x2ad   : > { %s1795_s25 = sshra.s32 %s1794_s19, 3 }
 0x2ae   : > { %1560 = vmatpush1.bf16.msra.mxu0 %v4601_v63  ;;  %1601 = vmatpush1.bf16.msra.mxu1 %v4610_v1  ;;  %s3651_s16 = sshll.u32 %s1795_s25, 5 }
 0x2af   : > { %1675 = vmatprep.subr.bf16.mxu0 %v4820_v27  ;;  %1716 = vmatprep.subr.bf16.mxu1 %v4980_v55  ;;  %s1799_s13 = scalar_lea.vmem [#allocation4], %s3651_s16 }
 0x364   : > { %v1449_v57 = vpop.f32.mrb[40].mxu0  ;;  %v1490_v58 = vpop.f32.mrb[40].mxu1 }
 0x365   : > { %v1497_v56 = vadd.f32 %v1449_v57, %v1410_v60  ;;  %v1451_v23 = vpop.f32.mrb[41].mxu0  ;;  %v1492_v63 = vpop.f32.mrb[41].mxu1  ;;  %v1499_v4 = vadd.f32 %v1490_v58, %v1412_v2 }
 0x366   : > { %v1498_v54 = vadd.f32 %v1451_v23, %v1411_v62  ;;  %v1453_v1 = vpop.f32.mrb[42].mxu0  ;;  %v1494_v59 = vpop.f32.mrb[42].mxu1  ;;  %v1500_v6 = vadd.f32 %v1492_v63, %v1413_v5  ;;  %v5032_v63 = vld [vmem:[%s4407_s28 + $0xe0] ss:$16 sps:$4 sm:$0xff]  }
 0x367   : > { %v1501_v61 = vmul.f32 0.5, %v1497_v56  ;;  %v1454_v0 = vpop.f32.mrb[43].mxu0  ;;  %v1495_v16 = vpop.f32.mrb[43].mxu1  ;;  %v1540_v1 = vld [vmem:[%s1539_s17] sm:$0xff] }
 0x368   : > { %v1505_v22 = vmul.f32 0.5, %v1498_v54  ;;  %v1510_v7 = vmul.f32 0.5, %v1500_v6  ;;  %v5036_v54 = vld [vmem:[%s4407_s28 + $0xe8] ss:$16 sps:$4 sm:$0xff]   ;;  %v1541_v16 = vld [vmem:[%s1539_s17 + $0x8] sm:$0xff] }
 0x369   : > { %3820 = vtanh.f32 %v1501_v61 }
 0x36a   : > { %3822 = vtanh.f32 %v1505_v22 }
 0x36b   : > { %3824 = vtanh.f32 %v1499_v4 }
 0x36c   : > { %3826 = vtanh.f32 %v1510_v7 }
 0x373   : > { %v3821_v8 = vpop.eup %3820 }
 0x374   : > { %v3823_v9 = vpop.eup %3822  ;;  %v1503_v10 = vmul.f32 0.5, %v3821_v8 }
 0x375   : > { %v1507_v11 = vmul.f32 0.5, %v3823_v9  ;;  %v3825_v17 = vpop.eup %3824 }
 0x376   : > { %v1504_v12 = vadd.f32 0.5, %v1503_v10  ;;  %v3827_v33 = vpop.eup %3826  ;;  %v1542_v10 = vld [vmem:[%s1539_s17 + $0x10] sm:$0xff] }
 0x377   : > { %v1508_v18 = vadd.f32 0.5, %v1507_v11  ;;  %v1512_v53 = vmul.f32 0.5, %v3827_v33 }
 0x378   : > { %v1515_v13 = vmul.f32 %v3825_v17, %v1504_v12  ;;  %v1543_v17 = vld [vmem:[%s1539_s17 + $0x18] sm:$0xff]  ;;  %s1924_s17 = scalar_select %p975_p8, 48, 72 }
 0x379   : > { %v1514_v24 = vmul.f32 %v1508_v18, %v4860_v19  ;;  %v1513_v60 = vadd.f32 0.5, %v1512_v53 }
 0x37a   : > { %s1925_s21 = sshra.s32 %s1924_s17, 3 }
 0x37b   : > { %v1516_v25 = vadd.f32 %v1515_v13, %v1514_v24  ;;  %s3652_s20 = sshll.u32 %s1925_s21, 5 }
 0x37c   : > { %s1929_s29 = scalar_lea.vmem [#allocation4], %s3652_s20 }
 0x37d   : > { %3828 = vtanh.f32 %v1516_v25  ;;  %v4987_v14 = vsel %vm1403_vm4, %v1516_v25, %v4860_v19  ;;  %v5023_v19 = vld [vmem:[%s4407_s28 + $0xc8] ss:$16 sps:$4 sm:$0xff]  }
 0x387   : > { %v3829_v57 = vpop.eup %3828 }
 0x388   : > { %v1518_v58 = vmul.f32 %v3829_v57, %v1513_v60 }
 0x38a   : > { %v4990_v56 = vsel %vm1403_vm4, %v1518_v58, %v4863_v42  ;;  %v1521_v62 = vsel %vm1403_vm4, %v1518_v58, 0.0  ;;  %v5028_v42 = vld [vmem:[%s4407_s28 + $0xec] ss:$16 sps:$4 sm:$0xff]  }
 0x38b   : > { %3595 = vst [vmem:[%s4782_s26 + $0x10] sm:$0xff] %v1521_v62  ;;  %v1544_v23 = vpack.c.bf16 %v4990_v56, %v4990_v56 }
 0x38d   : > { %1578 = vmatmul.mubr.bf16.vlgmr.msra.gmra.mrb[44].mxu0 %v1544_v23  ;;  %1619 = vmatmul.mubr.bf16.vlgmr.msra.gmra.mrb[44].mxu1 %v1544_v23  ;;  %v1532_v23 = vpop.permute.xlu1 %1531 }
 0x38e   : > { %1676 = vmatpush1.bf16.msra.mxu0 %v4869_v21  ;;  %1717 = vmatpush1.bf16.msra.mxu1 %v4873_v15  ;;  %vm1533_vm5 = vcmp.eq.s32.totalorder %v1532_v23, 1 }
 0x38f   : > { %1677 = vmatprep.subr.bf16.mxu0 %v4877_v51  ;;  %1718 = vmatprep.subr.bf16.mxu1 %v4881_v28 }
 0x390   : > { %1707 = vmatprep.mubr.bf16.mxu0 %v4229_v3  ;;  %1748 = vmatprep.mubr.bf16.mxu1 %v4229_v3 }
 0x392   : > { %1678 = vmatpush1.bf16.msra.mxu0 %v4887_v29  ;;  %1719 = vmatpush1.bf16.msra.mxu1 %v4891_v30 }
 0x393   : > { %1679 = vmatprep.subr.bf16.mxu0 %v4895_v31  ;;  %1720 = vmatprep.subr.bf16.mxu1 %v4899_v26 }
 0x396   : > { %1680 = vmatpush1.bf16.msra.mxu0 %v4903_v32  ;;  %1721 = vmatpush1.bf16.msra.mxu1 %v4907_v34 }
 0x397   : > { %1681 = vmatprep.subr.bf16.mxu0 %v4911_v35  ;;  %1722 = vmatprep.subr.bf16.mxu1 %v4915_v36 }
 0x39a   : > { %1682 = vmatpush1.bf16.msra.mxu0 %v4919_v37  ;;  %1723 = vmatpush1.bf16.msra.mxu1 %v4923_v38 }
 0x39b   : > { %1683 = vmatprep.subr.bf16.mxu0 %v4927_v39  ;;  %1724 = vmatprep.subr.bf16.mxu1 %v4931_v40 }
 0x39e   : > { %1684 = vmatpush1.bf16.msra.mxu0 %v4935_v41  ;;  %1725 = vmatpush1.bf16.msra.mxu1 %v4939_v43 }
 0x39f   : > { %1685 = vmatprep.subr.bf16.mxu0 %v4943_v44  ;;  %1726 = vmatprep.subr.bf16.mxu1 %v4947_v45 }
 0x3a2   : > { %1686 = vmatpush1.bf16.msra.mxu0 %v4951_v46  ;;  %1727 = vmatpush1.bf16.msra.mxu1 %v4955_v47 }
 0x3a3   : > { %1687 = vmatprep.subr.bf16.mxu0 %v4959_v48  ;;  %1728 = vmatprep.subr.bf16.mxu1 %v4963_v49 }
 0x3a6   : > { %1688 = vmatpush1.bf16.msra.mxu0 %v4967_v50  ;;  %1729 = vmatpush1.bf16.msra.mxu1 %v5023_v19 }
 0x3a7   : > { %1689 = vmatprep.subr.bf16.mxu0 %v4972_v52  ;;  %1730 = vmatprep.subr.bf16.mxu1 %v5028_v42 }
 0x3aa   : > { %1690 = vmatpush1.bf16.msra.mxu0 %v5032_v63  ;;  %1731 = vmatpush1.bf16.msra.mxu1 %v5036_v54 }
 0x3ab   : > { %1805 = vmatprep.subr.bf16.mxu0 %v4820_v27  ;;  %1846 = vmatprep.subr.bf16.mxu1 %v4980_v55 }
 0x460   : > { %v1579_v59 = vpop.f32.mrb[44].mxu0  ;;  %v1620_v61 = vpop.f32.mrb[44].mxu1 }
 0x461   : > { %v1627_v0 = vadd.f32 %v1579_v59, %v1540_v1  ;;  %v1581_v2 = vpop.f32.mrb[45].mxu0  ;;  %v1622_v22 = vpop.f32.mrb[45].mxu1  ;;  %v1629_v12 = vadd.f32 %v1620_v61, %v1542_v10 }
 0x462   : > { %v1628_v4 = vadd.f32 %v1581_v2, %v1541_v16  ;;  %v1583_v5 = vpop.f32.mrb[46].mxu0  ;;  %v1624_v6 = vpop.f32.mrb[46].mxu1  ;;  %v1630_v18 = vadd.f32 %v1622_v22, %v1543_v17 }
 0x463   : > { %v1631_v7 = vmul.f32 0.5, %v1627_v0  ;;  %v1584_v8 = vpop.f32.mrb[47].mxu0  ;;  %v1625_v9 = vpop.f32.mrb[47].mxu1 }
 0x464   : > { %v1635_v11 = vmul.f32 0.5, %v1628_v4  ;;  %v1640_v13 = vmul.f32 0.5, %v1630_v18  ;;  %v1671_v9 = vld [vmem:[%s1669_s27 + $0x8] sm:$0xff] }
 0x465   : > { %3830 = vtanh.f32 %v1631_v7 }
 0x466   : > { %3832 = vtanh.f32 %v1635_v11 }
 0x467   : > { %3834 = vtanh.f32 %v1629_v12 }
 0x468   : > { %3836 = vtanh.f32 %v1640_v13 }
 0x46f   : > { %v3831_v20 = vpop.eup %3830 }
 0x470   : > { %v3833_v24 = vpop.eup %3832  ;;  %v1633_v25 = vmul.f32 0.5, %v3831_v20 }
 0x471   : > { %v1637_v33 = vmul.f32 0.5, %v3833_v24  ;;  %v3835_v60 = vpop.eup %3834 }
 0x472   : > { %v1634_v53 = vadd.f32 0.5, %v1633_v25  ;;  %v3837_v61 = vpop.eup %3836  ;;  %v1672_v25 = vld [vmem:[%s1669_s27 + $0x10] sm:$0xff] }
 0x473   : > { %v1638_v57 = vadd.f32 0.5, %v1637_v33  ;;  %v1642_v0 = vmul.f32 0.5, %v3837_v61 }
 0x474   : > { %v1645_v58 = vmul.f32 %v3835_v60, %v1634_v53  ;;  %v1673_v60 = vld [vmem:[%s1669_s27 + $0x18] sm:$0xff] }
 0x475   : > { %v1644_v62 = vmul.f32 %v1638_v57, %v4987_v14  ;;  %v1643_v16 = vadd.f32 0.5, %v1642_v0 }
 0x477   : > { %v1646_v1 = vadd.f32 %v1645_v58, %v1644_v62 }
 0x479   : > { %3838 = vtanh.f32 %v1646_v1  ;;  %v5045_v59 = vsel %vm1533_vm5, %v1646_v1, %v4987_v14  ;;  %v1670_v14 = vld [vmem:[%s1669_s27] sm:$0xff]  ;;  %s2054_s27 = scalar_select %p975_p8, 56, 64 }
 0x47b   : > { %s2055_s19 = sshra.s32 %s2054_s27, 3 }
 0x47c   : > { %s3653_s25 = sshll.u32 %s2055_s19, 5 }
 0x47d   : > { %s2059_s16 = scalar_lea.vmem [#allocation4], %s3653_s25 }
 0x483   : > { %v3839_v2 = vpop.eup %3838 }
 0x484   : > { %v1648_v22 = vmul.f32 %v3839_v2, %v1643_v16 }
 0x486   : > { %v1651_v4 = vsel %vm1533_vm5, %v1648_v22, 0.0  ;;  %v5048_v5 = vsel %vm1533_vm5, %v1648_v22, %v4990_v56 }
 0x487   : > { %3598 = vst [vmem:[%s4782_s26 + $0x18] sm:$0xff] %v1651_v4  ;;  %v1674_v6 = vpack.c.bf16 %v5048_v5, %v5048_v5 }
 0x489   : > { %1708 = vmatmul.mubr.bf16.vlgmr.msra.gmra.mrb[48].mxu0 %v1674_v6  ;;  %1749 = vmatmul.mubr.bf16.vlgmr.msra.gmra.mrb[48].mxu1 %v1674_v6  ;;  %v1662_v6 = vpop.permute.xlu0 %1661 }
 0x48a   : > { %1806 = vmatpush1.bf16.msra.mxu0 %v4869_v21  ;;  %1847 = vmatpush1.bf16.msra.mxu1 %v4873_v15  ;;  %vm1663_vm6 = vcmp.eq.s32.totalorder %v1662_v6, 1 }
 0x48b   : > { %1807 = vmatprep.subr.bf16.mxu0 %v4877_v51  ;;  %1848 = vmatprep.subr.bf16.mxu1 %v4881_v28 }
 0x48c   : > { %1837 = vmatprep.mubr.bf16.mxu0 %v4229_v3  ;;  %1878 = vmatprep.mubr.bf16.mxu1 %v4229_v3 }
 0x48e   : > { %1808 = vmatpush1.bf16.msra.mxu0 %v4887_v29  ;;  %1849 = vmatpush1.bf16.msra.mxu1 %v4891_v30 }
 0x48f   : > { %1809 = vmatprep.subr.bf16.mxu0 %v4895_v31  ;;  %1850 = vmatprep.subr.bf16.mxu1 %v4899_v26 }
 0x492   : > { %1810 = vmatpush1.bf16.msra.mxu0 %v4903_v32  ;;  %1851 = vmatpush1.bf16.msra.mxu1 %v4907_v34 }
 0x493   : > { %1811 = vmatprep.subr.bf16.mxu0 %v4911_v35  ;;  %1852 = vmatprep.subr.bf16.mxu1 %v4915_v36 }
 0x496   : > { %1812 = vmatpush1.bf16.msra.mxu0 %v4919_v37  ;;  %1853 = vmatpush1.bf16.msra.mxu1 %v4923_v38 }
 0x497   : > { %1813 = vmatprep.subr.bf16.mxu0 %v4927_v39  ;;  %1854 = vmatprep.subr.bf16.mxu1 %v4931_v40 }
 0x49a   : > { %1814 = vmatpush1.bf16.msra.mxu0 %v4935_v41  ;;  %1855 = vmatpush1.bf16.msra.mxu1 %v4939_v43 }
 0x49b   : > { %1815 = vmatprep.subr.bf16.mxu0 %v4943_v44  ;;  %1856 = vmatprep.subr.bf16.mxu1 %v4947_v45 }
 0x49e   : > { %1816 = vmatpush1.bf16.msra.mxu0 %v4951_v46  ;;  %1857 = vmatpush1.bf16.msra.mxu1 %v4955_v47 }
 0x49f   : > { %1817 = vmatprep.subr.bf16.mxu0 %v4959_v48  ;;  %1858 = vmatprep.subr.bf16.mxu1 %v4963_v49 }
 0x4a2   : > { %1818 = vmatpush1.bf16.msra.mxu0 %v4967_v50  ;;  %1859 = vmatpush1.bf16.msra.mxu1 %v5023_v19 }
 0x4a3   : > { %1819 = vmatprep.subr.bf16.mxu0 %v4972_v52  ;;  %1860 = vmatprep.subr.bf16.mxu1 %v5028_v42 }
 0x4a6   : > { %1820 = vmatpush1.bf16.msra.mxu0 %v5032_v63  ;;  %1861 = vmatpush1.bf16.msra.mxu1 %v5036_v54 }
 0x4a7   : > { %1935 = vmatprep.subr.bf16.mxu0 %v4820_v27  ;;  %1976 = vmatprep.subr.bf16.mxu1 %v4980_v55 }
 0x55c   : > { %v1709_v56 = vpop.f32.mrb[48].mxu0  ;;  %v1750_v7 = vpop.f32.mrb[48].mxu1 }
 0x55d   : > { %v1757_v8 = vadd.f32 %v1709_v56, %v1670_v14  ;;  %v1711_v10 = vpop.f32.mrb[49].mxu0  ;;  %v1752_v11 = vpop.f32.mrb[49].mxu1  ;;  %v1759_v53 = vadd.f32 %v1750_v7, %v1672_v25 }
 0x55e   : > { %v1758_v12 = vadd.f32 %v1711_v10, %v1671_v9  ;;  %v1713_v17 = vpop.f32.mrb[50].mxu0  ;;  %v1754_v18 = vpop.f32.mrb[50].mxu1  ;;  %v1760_v57 = vadd.f32 %v1752_v11, %v1673_v60 }
 0x55f   : > { %v1761_v13 = vmul.f32 0.5, %v1757_v8  ;;  %v1714_v20 = vpop.f32.mrb[51].mxu0  ;;  %v1755_v24 = vpop.f32.mrb[51].mxu1 }
 0x560   : > { %v1765_v33 = vmul.f32 0.5, %v1758_v12  ;;  %v1770_v58 = vmul.f32 0.5, %v1760_v57  ;;  %v1801_v24 = vld [vmem:[%s1799_s13 + $0x8] sm:$0xff] }
 0x561   : > { %3840 = vtanh.f32 %v1761_v13 }
 0x562   : > { %3842 = vtanh.f32 %v1765_v33 }
 0x563   : > { %3844 = vtanh.f32 %v1759_v53 }
 0x564   : > { %3846 = vtanh.f32 %v1770_v58 }
 0x56b   : > { %v3841_v62 = vpop.eup %3840 }
 0x56c   : > { %v3843_v23 = vpop.eup %3842  ;;  %v1763_v1 = vmul.f32 0.5, %v3841_v62 }
 0x56d   : > { %v1767_v61 = vmul.f32 0.5, %v3843_v23  ;;  %v3845_v16 = vpop.eup %3844 }
 0x56e   : > { %v1764_v0 = vadd.f32 0.5, %v1763_v1  ;;  %v3847_v7 = vpop.eup %3846  ;;  %v1802_v1 = vld [vmem:[%s1799_s13 + $0x10] sm:$0xff] }
 0x56f   : > { %v1768_v2 = vadd.f32 0.5, %v1767_v61  ;;  %v1772_v8 = vmul.f32 0.5, %v3847_v7 }
 0x570   : > { %v1775_v22 = vmul.f32 %v3845_v16, %v1764_v0  ;;  %v1803_v16 = vld [vmem:[%s1799_s13 + $0x18] sm:$0xff] }
 0x571   : > { %v1774_v4 = vmul.f32 %v1768_v2, %v5045_v59  ;;  %v1773_v9 = vadd.f32 0.5, %v1772_v8 }
 0x573   : > { %v1776_v14 = vadd.f32 %v1775_v22, %v1774_v4 }
 0x575   : > { %3848 = vtanh.f32 %v1776_v14  ;;  %v5091_v56 = vsel %vm1663_vm6, %v1776_v14, %v5045_v59  ;;  %v1800_v59 = vld [vmem:[%s1799_s13] sm:$0xff]  ;;  %s2184_s13 = scalar_select %p975_p8, 64, 56 }
 0x577   : > { %s2185_s17 = sshra.s32 %s2184_s13, 3 }
 0x578   : > { %s3654_s21 = sshll.u32 %s2185_s17, 5 }
 0x579   : > { %s2189_s20 = scalar_lea.vmem [#allocation4], %s3654_s21 }
 0x57f   : > { %v3849_v10 = vpop.eup %3848 }
 0x580   : > { %v1778_v11 = vmul.f32 %v3849_v10, %v1773_v9 }
 0x582   : > { %v1781_v12 = vsel %vm1663_vm6, %v1778_v11, 0.0  ;;  %v5094_v17 = vsel %vm1663_vm6, %v1778_v11, %v5048_v5 }
 0x583   : > { %3601 = vst [vmem:[%s4782_s26 + $0x20] sm:$0xff] %v1781_v12  ;;  %v1804_v18 = vpack.c.bf16 %v5094_v17, %v5094_v17 }
 0x585   : > { %1838 = vmatmul.mubr.bf16.vlgmr.msra.gmra.mrb[52].mxu0 %v1804_v18  ;;  %1879 = vmatmul.mubr.bf16.vlgmr.msra.gmra.mrb[52].mxu1 %v1804_v18  ;;  %v1792_v18 = vpop.permute.xlu1 %1791 }
 0x586   : > { %1936 = vmatpush1.bf16.msra.mxu0 %v4869_v21  ;;  %1977 = vmatpush1.bf16.msra.mxu1 %v4873_v15  ;;  %vm1793_vm7 = vcmp.eq.s32.totalorder %v1792_v18, 1 }
 0x587   : > { %1937 = vmatprep.subr.bf16.mxu0 %v4877_v51  ;;  %1978 = vmatprep.subr.bf16.mxu1 %v4881_v28 }
 0x588   : > { %1967 = vmatprep.mubr.bf16.mxu0 %v4229_v3  ;;  %2008 = vmatprep.mubr.bf16.mxu1 %v4229_v3 }
 0x58a   : > { %1938 = vmatpush1.bf16.msra.mxu0 %v4887_v29  ;;  %1979 = vmatpush1.bf16.msra.mxu1 %v4891_v30 }
 0x58b   : > { %1939 = vmatprep.subr.bf16.mxu0 %v4895_v31  ;;  %1980 = vmatprep.subr.bf16.mxu1 %v4899_v26 }
 0x58e   : > { %1940 = vmatpush1.bf16.msra.mxu0 %v4903_v32  ;;  %1981 = vmatpush1.bf16.msra.mxu1 %v4907_v34 }
 0x58f   : > { %1941 = vmatprep.subr.bf16.mxu0 %v4911_v35  ;;  %1982 = vmatprep.subr.bf16.mxu1 %v4915_v36 }
 0x592   : > { %1942 = vmatpush1.bf16.msra.mxu0 %v4919_v37  ;;  %1983 = vmatpush1.bf16.msra.mxu1 %v4923_v38 }
 0x593   : > { %1943 = vmatprep.subr.bf16.mxu0 %v4927_v39  ;;  %1984 = vmatprep.subr.bf16.mxu1 %v4931_v40 }
 0x596   : > { %1944 = vmatpush1.bf16.msra.mxu0 %v4935_v41  ;;  %1985 = vmatpush1.bf16.msra.mxu1 %v4939_v43 }
 0x597   : > { %1945 = vmatprep.subr.bf16.mxu0 %v4943_v44  ;;  %1986 = vmatprep.subr.bf16.mxu1 %v4947_v45 }
 0x59a   : > { %1946 = vmatpush1.bf16.msra.mxu0 %v4951_v46  ;;  %1987 = vmatpush1.bf16.msra.mxu1 %v4955_v47 }
 0x59b   : > { %1947 = vmatprep.subr.bf16.mxu0 %v4959_v48  ;;  %1988 = vmatprep.subr.bf16.mxu1 %v4963_v49 }
 0x59e   : > { %1948 = vmatpush1.bf16.msra.mxu0 %v4967_v50  ;;  %1989 = vmatpush1.bf16.msra.mxu1 %v5023_v19 }
 0x59f   : > { %1949 = vmatprep.subr.bf16.mxu0 %v4972_v52  ;;  %1990 = vmatprep.subr.bf16.mxu1 %v5028_v42 }
 0x5a2   : > { %1950 = vmatpush1.bf16.msra.mxu0 %v5032_v63  ;;  %1991 = vmatpush1.bf16.msra.mxu1 %v5036_v54 }
 0x5a3   : > { %2065 = vmatprep.subr.bf16.mxu0 %v4820_v27  ;;  %2106 = vmatprep.subr.bf16.mxu1 %v4980_v55 }
 0x658   : > { %v1839_v5 = vpop.f32.mrb[52].mxu0  ;;  %v1880_v13 = vpop.f32.mrb[52].mxu1 }
 0x659   : > { %v1887_v20 = vadd.f32 %v1839_v5, %v1800_v59  ;;  %v1841_v25 = vpop.f32.mrb[53].mxu0  ;;  %v1882_v33 = vpop.f32.mrb[53].mxu1  ;;  %v1889_v0 = vadd.f32 %v1880_v13, %v1802_v1 }
 0x65a   : > { %v1888_v53 = vadd.f32 %v1841_v25, %v1801_v24  ;;  %v1843_v60 = vpop.f32.mrb[54].mxu0  ;;  %v1884_v57 = vpop.f32.mrb[54].mxu1  ;;  %v1890_v2 = vadd.f32 %v1882_v33, %v1803_v16 }
 0x65b   : > { %v1891_v58 = vmul.f32 0.5, %v1887_v20  ;;  %v1844_v62 = vpop.f32.mrb[55].mxu0  ;;  %v1885_v23 = vpop.f32.mrb[55].mxu1 }
 0x65c   : > { %v1895_v61 = vmul.f32 0.5, %v1888_v53  ;;  %v1900_v22 = vmul.f32 0.5, %v1890_v2  ;;  %v1931_v23 = vld [vmem:[%s1929_s29 + $0x8] sm:$0xff] }
 0x65d   : > { %3850 = vtanh.f32 %v1891_v58 }
 0x65e   : > { %3852 = vtanh.f32 %v1895_v61 }
 0x65f   : > { %3854 = vtanh.f32 %v1889_v0 }
 0x660   : > { %3856 = vtanh.f32 %v1900_v22 }
 0x667   : > { %v3851_v4 = vpop.eup %3850 }
 0x668   : > { %v3853_v6 = vpop.eup %3852  ;;  %v1893_v14 = vmul.f32 0.5, %v3851_v4 }
 0x669   : > { %v1897_v7 = vmul.f32 0.5, %v3853_v6  ;;  %v3855_v9 = vpop.eup %3854  ;;  %v1932_v6 = vld [vmem:[%s1929_s29 + $0x10] sm:$0xff] }
 0x66a   : > { %v1894_v8 = vadd.f32 0.5, %v1893_v14  ;;  %v3857_v13 = vpop.eup %3856 }
 0x66b   : > { %v1898_v10 = vadd.f32 0.5, %v1897_v7  ;;  %v1902_v20 = vmul.f32 0.5, %v3857_v13 }
 0x66c   : > { %v1905_v11 = vmul.f32 %v3855_v9, %v1894_v8  ;;  %v1933_v8 = vld [vmem:[%s1929_s29 + $0x18] sm:$0xff] }
 0x66d   : > { %v1904_v12 = vmul.f32 %v1898_v10, %v5091_v56  ;;  %v1903_v24 = vadd.f32 0.5, %v1902_v20 }
 0x66f   : > { %v1906_v59 = vadd.f32 %v1905_v11, %v1904_v12 }
 0x671   : > { %3858 = vtanh.f32 %v1906_v59  ;;  %v5137_v5 = vsel %vm1793_vm7, %v1906_v59, %v5091_v56  ;;  %v1930_v56 = vld [vmem:[%s1929_s29] sm:$0xff]  ;;  %s2314_s29 = scalar_select %p975_p8, 72, 48 }
 0x673   : > { %s2315_s27 = sshra.s32 %s2314_s29, 3 }
 0x674   : > { %s3655_s19 = sshll.u32 %s2315_s27, 5 }
 0x675   : > { %s2319_s25 = scalar_lea.vmem [#allocation4], %s3655_s19 }
 0x67b   : > { %v3859_v25 = vpop.eup %3858 }
 0x67c   : > { %v1908_v33 = vmul.f32 %v3859_v25, %v1903_v24 }
 0x67e   : > { %v1911_v53 = vsel %vm1793_vm7, %v1908_v33, 0.0  ;;  %v5140_v60 = vsel %vm1793_vm7, %v1908_v33, %v5094_v17 }
 0x67f   : > { %3604 = vst [vmem:[%s4782_s26 + $0x28] sm:$0xff] %v1911_v53  ;;  %v1934_v57 = vpack.c.bf16 %v5140_v60, %v5140_v60  ;;  %v1922_v53 = vpop.permute.xlu0 %1921 }
 0x680   : > { %vm1923_vm8 = vcmp.eq.s32.totalorder %v1922_v53, 1  ;;  %v5275_v53 = vld [vmem:[%s4407_s28 + $0x40] ss:$16 sps:$4 sm:$0xff]  }
 0x681   : > { %1968 = vmatmul.mubr.bf16.vlgmr.msra.gmra.mrb[56].mxu0 %v1934_v57  ;;  %2009 = vmatmul.mubr.bf16.vlgmr.msra.gmra.mrb[56].mxu1 %v1934_v57 }
 0x682   : > { %2066 = vmatpush1.bf16.msra.mxu0 %v4869_v21  ;;  %2107 = vmatpush1.bf16.msra.mxu1 %v4873_v15 }
 0x683   : > { %2067 = vmatprep.subr.bf16.mxu0 %v4877_v51  ;;  %2108 = vmatprep.subr.bf16.mxu1 %v4881_v28 }
 0x684   : > { %2097 = vmatprep.mubr.bf16.mxu0 %v4229_v3  ;;  %2138 = vmatprep.mubr.bf16.mxu1 %v4229_v3 }
 0x686   : > { %2068 = vmatpush1.bf16.msra.mxu0 %v4887_v29  ;;  %2109 = vmatpush1.bf16.msra.mxu1 %v4891_v30 }
 0x687   : > { %2069 = vmatprep.subr.bf16.mxu0 %v4895_v31  ;;  %2110 = vmatprep.subr.bf16.mxu1 %v4899_v26 }
 0x68a   : > { %2070 = vmatpush1.bf16.msra.mxu0 %v4903_v32  ;;  %2111 = vmatpush1.bf16.msra.mxu1 %v4907_v34 }
 0x68b   : > { %2071 = vmatprep.subr.bf16.mxu0 %v4911_v35  ;;  %2112 = vmatprep.subr.bf16.mxu1 %v4915_v36 }
 0x68e   : > { %2072 = vmatpush1.bf16.msra.mxu0 %v4919_v37  ;;  %2113 = vmatpush1.bf16.msra.mxu1 %v4923_v38 }
 0x68f   : > { %2073 = vmatprep.subr.bf16.mxu0 %v4927_v39  ;;  %2114 = vmatprep.subr.bf16.mxu1 %v4931_v40 }
 0x692   : > { %2074 = vmatpush1.bf16.msra.mxu0 %v4935_v41  ;;  %2115 = vmatpush1.bf16.msra.mxu1 %v4939_v43 }
 0x693   : > { %2075 = vmatprep.subr.bf16.mxu0 %v4943_v44  ;;  %2116 = vmatprep.subr.bf16.mxu1 %v4947_v45 }
 0x696   : > { %2076 = vmatpush1.bf16.msra.mxu0 %v4951_v46  ;;  %2117 = vmatpush1.bf16.msra.mxu1 %v4955_v47 }
 0x697   : > { %2077 = vmatprep.subr.bf16.mxu0 %v4959_v48  ;;  %2118 = vmatprep.subr.bf16.mxu1 %v4963_v49 }
 0x69a   : > { %2078 = vmatpush1.bf16.msra.mxu0 %v4967_v50  ;;  %2119 = vmatpush1.bf16.msra.mxu1 %v5023_v19 }
 0x69b   : > { %2079 = vmatprep.subr.bf16.mxu0 %v4972_v52  ;;  %2120 = vmatprep.subr.bf16.mxu1 %v5028_v42 }
 0x69e   : > { %2080 = vmatpush1.bf16.msra.mxu0 %v5032_v63  ;;  %2121 = vmatpush1.bf16.msra.mxu1 %v5036_v54 }
 0x69f   : > { %2195 = vmatprep.subr.bf16.mxu0 %v4820_v27  ;;  %2236 = vmatprep.subr.bf16.mxu1 %v4980_v55 }
 0x754   : > { %v1969_v17 = vpop.f32.mrb[56].mxu0  ;;  %v2010_v58 = vpop.f32.mrb[56].mxu1 }
 0x755   : > { %v2017_v62 = vadd.f32 %v1969_v17, %v1930_v56  ;;  %v1971_v1 = vpop.f32.mrb[57].mxu0  ;;  %v2012_v61 = vpop.f32.mrb[57].mxu1  ;;  %v2019_v7 = vadd.f32 %v2010_v58, %v1932_v6 }
 0x756   : > { %v2018_v0 = vadd.f32 %v1971_v1, %v1931_v23  ;;  %v1973_v16 = vpop.f32.mrb[58].mxu0  ;;  %v2014_v2 = vpop.f32.mrb[58].mxu1  ;;  %v2020_v9 = vadd.f32 %v2012_v61, %v1933_v8 }
 0x757   : > { %v2021_v22 = vmul.f32 0.5, %v2017_v62  ;;  %v1974_v4 = vpop.f32.mrb[59].mxu0  ;;  %v2015_v27 = vpop.f32.mrb[59].mxu1 }
 0x758   : > { %v2025_v14 = vmul.f32 0.5, %v2018_v0  ;;  %v2030_v10 = vmul.f32 0.5, %v2020_v9  ;;  %v2052_v2 = vpop.permute.xlu1 %2051 }
 0x759   : > { %3860 = vtanh.f32 %v2021_v22  ;;  %vm2053_vm9 = vcmp.eq.s32.totalorder %v2052_v2, 1 }
 0x75a   : > { %3862 = vtanh.f32 %v2025_v14 }
 0x75b   : > { %3864 = vtanh.f32 %v2019_v7 }
 0x75c   : > { %3866 = vtanh.f32 %v2030_v10 }
 0x763   : > { %v3861_v11 = vpop.eup %3860 }
 0x764   : > { %v3863_v12 = vpop.eup %3862  ;;  %v2023_v18 = vmul.f32 0.5, %v3861_v11 }
 0x765   : > { %v2027_v59 = vmul.f32 0.5, %v3863_v12  ;;  %v3865_v20 = vpop.eup %3864  ;;  %v5241_v12 = vld [vmem:[%s4407_s28] ss:$16 sps:$4 sm:$0xff]  }
 0x766   : > { %v2024_v13 = vadd.f32 0.5, %v2023_v18  ;;  %v3867_v17 = vpop.eup %3866  ;;  %v5245_v18 = vld [vmem:[%s4407_s28 + $0x8] ss:$16 sps:$4 sm:$0xff]  }
 0x767   : > { %v2028_v24 = vadd.f32 0.5, %v2027_v59  ;;  %v2032_v58 = vmul.f32 0.5, %v3867_v17  ;;  %v5249_v59 = vld [vmem:[%s4407_s28 + $0x24] ss:$16 sps:$4 sm:$0xff]   ;;  %v5287_v17 = vld [vmem:[%s4407_s28 + $0x6c] ss:$16 sps:$4 sm:$0xff]  }
 0x768   : > { %v2035_v25 = vmul.f32 %v3865_v20, %v2024_v13  ;;  %v5253_v13 = vld [vmem:[%s4407_s28 + $0x2c] ss:$16 sps:$4 sm:$0xff]   ;;  %v5259_v20 = vld [vmem:[%s4407_s28 + $0x20] ss:$16 sps:$4 sm:$0xff]  }
 0x769   : > { %v2034_v33 = vmul.f32 %v2028_v24, %v5137_v5  ;;  %v2033_v62 = vadd.f32 0.5, %v2032_v58  ;;  %v5263_v24 = vld [vmem:[%s4407_s28 + $0x28] ss:$16 sps:$4 sm:$0xff]   ;;  %v5291_v58 = vld [vmem:[%s4407_s28 + $0x60] ss:$16 sps:$4 sm:$0xff]  }
 0x76b   : > { %v2036_v57 = vadd.f32 %v2035_v25, %v2034_v33  ;;  %v5267_v25 = vld [vmem:[%s4407_s28 + $0x44] ss:$16 sps:$4 sm:$0xff]   ;;  %v5271_v33 = vld [vmem:[%s4407_s28 + $0x4c] ss:$16 sps:$4 sm:$0xff]  }
 0x76d   : > { %3868 = vtanh.f32 %v2036_v57  ;;  %v5183_v56 = vsel %vm1923_vm8, %v2036_v57, %v5137_v5  ;;  %v5279_v57 = vld [vmem:[%s4407_s28 + $0x48] ss:$16 sps:$4 sm:$0xff]  }
 0x777   : > { %v3869_v23 = vpop.eup %3868 }
 0x778   : > { %v2038_v1 = vmul.f32 %v3869_v23, %v2033_v62  ;;  %v5295_v62 = vld [vmem:[%s4407_s28 + $0x68] ss:$16 sps:$4 sm:$0xff]   ;;  %v5299_v23 = vld [vmem:[%s4407_s28 + $0x84] ss:$16 sps:$4 sm:$0xff]  }
 0x77a   : > { %v2041_v61 = vsel %vm1923_vm8, %v2038_v1, 0.0  ;;  %v5186_v0 = vsel %vm1923_vm8, %v2038_v1, %v5140_v60  ;;  %v5303_v1 = vld [vmem:[%s4407_s28 + $0x8c] ss:$16 sps:$4 sm:$0xff]  }
 0x77b   : > { %3607 = vst [vmem:[%s4782_s26 + $0x30] sm:$0xff] %v2041_v61  ;;  %v2064_v16 = vpack.c.bf16 %v5186_v0, %v5186_v0  ;;  %v5307_v61 = vld [vmem:[%s4407_s28 + $0x80] ss:$16 sps:$4 sm:$0xff]  }
 0x77d   : > { %2098 = vmatmul.mubr.bf16.vlgmr.msra.gmra.mrb[60].mxu0 %v2064_v16  ;;  %2139 = vmatmul.mubr.bf16.vlgmr.msra.gmra.mrb[60].mxu1 %v2064_v16  ;;  %v5315_v16 = vld [vmem:[%s4407_s28 + $0xa4] ss:$16 sps:$4 sm:$0xff]  }
 0x77e   : > { %2196 = vmatpush1.bf16.msra.mxu0 %v4869_v21  ;;  %2237 = vmatpush1.bf16.msra.mxu1 %v4873_v15  ;;  %v5224_v21 = vld [vmem:[%s4407_s28 + $0x4] ss:$16 sps:$4 sm:$0xff]   ;;  %v2060_v15 = vld [vmem:[%s2059_s16] sm:$0xff] }
 0x77f   : > { %2197 = vmatprep.subr.bf16.mxu0 %v4877_v51  ;;  %2238 = vmatprep.subr.bf16.mxu1 %v4881_v28 }
 0x780   : > { %2227 = vmatprep.mubr.bf16.mxu0 %v4229_v3  ;;  %2268 = vmatprep.mubr.bf16.mxu1 %v4229_v3 }
 0x782   : > { %2198 = vmatpush1.bf16.msra.mxu0 %v4887_v29  ;;  %2239 = vmatpush1.bf16.msra.mxu1 %v4891_v30  ;;  %v2061_v30 = vld [vmem:[%s2059_s16 + $0x8] sm:$0xff] }
 0x783   : > { %2199 = vmatprep.subr.bf16.mxu0 %v4895_v31  ;;  %2240 = vmatprep.subr.bf16.mxu1 %v4899_v26 }
 0x786   : > { %2200 = vmatpush1.bf16.msra.mxu0 %v4903_v32  ;;  %2241 = vmatpush1.bf16.msra.mxu1 %v4907_v34 }
 0x787   : > { %2201 = vmatprep.subr.bf16.mxu0 %v4911_v35  ;;  %2242 = vmatprep.subr.bf16.mxu1 %v4915_v36 }
 0x78a   : > { %2202 = vmatpush1.bf16.msra.mxu0 %v4919_v37  ;;  %2243 = vmatpush1.bf16.msra.mxu1 %v4923_v38 }
 0x78b   : > { %2203 = vmatprep.subr.bf16.mxu0 %v4927_v39  ;;  %2244 = vmatprep.subr.bf16.mxu1 %v4931_v40  ;;  %v2062_v39 = vld [vmem:[%s2059_s16 + $0x10] sm:$0xff] }
 0x78e   : > { %2204 = vmatpush1.bf16.msra.mxu0 %v4935_v41  ;;  %2245 = vmatpush1.bf16.msra.mxu1 %v4939_v43  ;;  %v2063_v43 = vld [vmem:[%s2059_s16 + $0x18] sm:$0xff]  ;;  %s2444_s16 = scalar_select %p975_p8, 80, 40 }
 0x78f   : > { %2205 = vmatprep.subr.bf16.mxu0 %v4943_v44  ;;  %2246 = vmatprep.subr.bf16.mxu1 %v4947_v45 }
 0x790   : > { %s2445_s13 = sshra.s32 %s2444_s16, 3 }
 0x791   : > { %s3656_s17 = sshll.u32 %s2445_s13, 5 }
 0x792   : > { %2206 = vmatpush1.bf16.msra.mxu0 %v4951_v46  ;;  %2247 = vmatpush1.bf16.msra.mxu1 %v4955_v47  ;;  %s2449_s21 = scalar_lea.vmem [#allocation4], %s3656_s17 }
 0x793   : > { %2207 = vmatprep.subr.bf16.mxu0 %v4959_v48  ;;  %2248 = vmatprep.subr.bf16.mxu1 %v4963_v49 }
 0x796   : > { %2208 = vmatpush1.bf16.msra.mxu0 %v4967_v50  ;;  %2249 = vmatpush1.bf16.msra.mxu1 %v5023_v19 }
 0x797   : > { %2209 = vmatprep.subr.bf16.mxu0 %v4972_v52  ;;  %2250 = vmatprep.subr.bf16.mxu1 %v5028_v42 }
 0x79a   : > { %2210 = vmatpush1.bf16.msra.mxu0 %v5032_v63  ;;  %2251 = vmatpush1.bf16.msra.mxu1 %v5036_v54 }
 0x79b   : > { %2325 = vmatprep.subr.bf16.mxu0 %v5224_v21  ;;  %2366 = vmatprep.subr.bf16.mxu1 %v4980_v55 }
 0x850   : > { %v2099_v51 = vpop.f32.mrb[60].mxu0  ;;  %v2140_v28 = vpop.f32.mrb[60].mxu1 }
 0x851   : > { %v2147_v29 = vadd.f32 %v2099_v51, %v2060_v15  ;;  %v2101_v31 = vpop.f32.mrb[61].mxu0  ;;  %v2142_v26 = vpop.f32.mrb[61].mxu1  ;;  %v2149_v41 = vadd.f32 %v2140_v28, %v2062_v39  ;;  %v5319_v15 = vld [vmem:[%s4407_s28 + $0xac] ss:$16 sps:$4 sm:$0xff]   ;;  %v5323_v51 = vld [vmem:[%s4407_s28 + $0xa0] ss:$16 sps:$4 sm:$0xff]  }
 0x852   : > { %v2148_v32 = vadd.f32 %v2101_v31, %v2061_v30  ;;  %v2103_v34 = vpop.f32.mrb[62].mxu0  ;;  %v2144_v35 = vpop.f32.mrb[62].mxu1  ;;  %v2150_v44 = vadd.f32 %v2142_v26, %v2063_v43  ;;  %v5327_v28 = vld [vmem:[%s4407_s28 + $0xa8] ss:$16 sps:$4 sm:$0xff]   ;;  %v5335_v30 = vld [vmem:[%s4407_s28 + $0xcc] ss:$16 sps:$4 sm:$0xff]  }
 0x853   : > { %v2151_v36 = vmul.f32 0.5, %v2147_v29  ;;  %v2104_v37 = vpop.f32.mrb[63].mxu0  ;;  %v2145_v38 = vpop.f32.mrb[63].mxu1  ;;  %v5331_v29 = vld [vmem:[%s4407_s28 + $0xc4] ss:$16 sps:$4 sm:$0xff]  }
 0x854   : > { %v2155_v40 = vmul.f32 0.5, %v2148_v32  ;;  %v2160_v45 = vmul.f32 0.5, %v2150_v44  ;;  %v5339_v31 = vld [vmem:[%s4407_s28 + $0xc0] ss:$16 sps:$4 sm:$0xff]   ;;  %v5344_v26 = vld [vmem:[%s4407_s28 + $0xe4] ss:$16 sps:$4 sm:$0xff]  }
 0x855   : > { %3870 = vtanh.f32 %v2151_v36  ;;  %v5352_v32 = vld [vmem:[%s4407_s28 + $0xc] ss:$16 sps:$4 sm:$0xff]  }
 0x856   : > { %3872 = vtanh.f32 %v2155_v40  ;;  %v2192_v44 = vld [vmem:[%s2189_s20 + $0x10] sm:$0xff] }
 0x857   : > { %3874 = vtanh.f32 %v2149_v41 }
 0x858   : > { %3876 = vtanh.f32 %v2160_v45 }
 0x85f   : > { %v3871_v46 = vpop.eup %3870 }
 0x860   : > { %v3873_v47 = vpop.eup %3872  ;;  %v2153_v48 = vmul.f32 0.5, %v3871_v46 }
 0x861   : > { %v2157_v49 = vmul.f32 0.5, %v3873_v47  ;;  %v3875_v52 = vpop.eup %3874  ;;  %v2193_v47 = vld [vmem:[%s2189_s20 + $0x18] sm:$0xff] }
 0x862   : > { %v2154_v50 = vadd.f32 0.5, %v2153_v48  ;;  %v3877_v27 = vpop.eup %3876 }
 0x863   : > { %v2158_v55 = vadd.f32 0.5, %v2157_v49  ;;  %v2162_v6 = vmul.f32 0.5, %v3877_v27 }
 0x864   : > { %v2165_v5 = vmul.f32 %v3875_v52, %v2154_v50 }
 0x865   : > { %v2164_v60 = vmul.f32 %v2158_v55, %v5183_v56  ;;  %v2163_v14 = vadd.f32 0.5, %v2162_v6 }
 0x867   : > { %v2166_v22 = vadd.f32 %v2165_v5, %v2164_v60 }
 0x869   : > { %3878 = vtanh.f32 %v2166_v22  ;;  %v5232_v4 = vsel %vm2053_vm9, %v2166_v22, %v5183_v56  ;;  %v5283_v56 = vld [vmem:[%s4407_s28 + $0x64] ss:$16 sps:$4 sm:$0xff]  }
 0x873   : > { %v3879_v7 = vpop.eup %3878 }
 0x874   : > { %v2168_v8 = vmul.f32 %v3879_v7, %v2163_v14  ;;  %v2182_v14 = vpop.permute.xlu0 %2181 }
 0x875   : > { %vm2183_vm10 = vcmp.eq.s32.totalorder %v2182_v14, 1 }
 0x876   : > { %v2171_v9 = vsel %vm2053_vm9, %v2168_v8, 0.0  ;;  %v5235_v10 = vsel %vm2053_vm9, %v2168_v8, %v5186_v0  ;;  %v5311_v0 = vld [vmem:[%s4407_s28 + $0x88] ss:$16 sps:$4 sm:$0xff]  }
 0x877   : > { %3610 = vst [vmem:[%s4782_s26 + $0x38] sm:$0xff] %v2171_v9  ;;  %v2194_v11 = vpack.c.bf16 %v5235_v10, %v5235_v10 }
 0x879   : > { %2228 = vmatmul.mubr.bf16.vlgmr.msra.gmra.mrb[64].mxu0 %v2194_v11  ;;  %2269 = vmatmul.mubr.bf16.vlgmr.msra.gmra.mrb[64].mxu1 %v2194_v11 }
 0x87a   : > { %2326 = vmatpush1.bf16.msra.mxu0 %v5241_v12  ;;  %2367 = vmatpush1.bf16.msra.mxu1 %v5245_v18 }
 0x87b   : > { %2327 = vmatprep.subr.bf16.mxu0 %v5249_v59  ;;  %2368 = vmatprep.subr.bf16.mxu1 %v5253_v13 }
 0x87c   : > { %2357 = vmatprep.mubr.bf16.mxu0 %v4229_v3  ;;  %2398 = vmatprep.mubr.bf16.mxu1 %v4229_v3 }
 0x87e   : > { %2328 = vmatpush1.bf16.msra.mxu0 %v5259_v20  ;;  %2369 = vmatpush1.bf16.msra.mxu1 %v5263_v24 }
 0x87f   : > { %2329 = vmatprep.subr.bf16.mxu0 %v5267_v25  ;;  %2370 = vmatprep.subr.bf16.mxu1 %v5271_v33 }
 0x882   : > { %2330 = vmatpush1.bf16.msra.mxu0 %v5275_v53  ;;  %2371 = vmatpush1.bf16.msra.mxu1 %v5279_v57 }
 0x883   : > { %2331 = vmatprep.subr.bf16.mxu0 %v5283_v56  ;;  %2372 = vmatprep.subr.bf16.mxu1 %v5287_v17 }
 0x886   : > { %2332 = vmatpush1.bf16.msra.mxu0 %v5291_v58  ;;  %2373 = vmatpush1.bf16.msra.mxu1 %v5295_v62 }
 0x887   : > { %2333 = vmatprep.subr.bf16.mxu0 %v5299_v23  ;;  %2374 = vmatprep.subr.bf16.mxu1 %v5303_v1 }
 0x88a   : > { %2334 = vmatpush1.bf16.msra.mxu0 %v5307_v61  ;;  %2375 = vmatpush1.bf16.msra.mxu1 %v5311_v0 }
 0x88b   : > { %2335 = vmatprep.subr.bf16.mxu0 %v5315_v16  ;;  %2376 = vmatprep.subr.bf16.mxu1 %v5319_v15 }
 0x88e   : > { %2336 = vmatpush1.bf16.msra.mxu0 %v5323_v51  ;;  %2377 = vmatpush1.bf16.msra.mxu1 %v5327_v28 }
 0x88f   : > { %2337 = vmatprep.subr.bf16.mxu0 %v5331_v29  ;;  %2378 = vmatprep.subr.bf16.mxu1 %v5335_v30 }
 0x892   : > { %2338 = vmatpush1.bf16.msra.mxu0 %v5339_v31  ;;  %2379 = vmatpush1.bf16.msra.mxu1 %v5023_v19  ;;  %v2190_v19 = vld [vmem:[%s2189_s20] sm:$0xff] }
 0x893   : > { %2339 = vmatprep.subr.bf16.mxu0 %v5344_v26  ;;  %2380 = vmatprep.subr.bf16.mxu1 %v5028_v42  ;;  %v2191_v42 = vld [vmem:[%s2189_s20 + $0x8] sm:$0xff]  ;;  %s2574_s20 = scalar_select %p975_p8, 88, 32 }
 0x895   : > { %s2575_s29 = sshra.s32 %s2574_s20, 3 }
 0x896   : > { %2340 = vmatpush1.bf16.msra.mxu0 %v5032_v63  ;;  %2381 = vmatpush1.bf16.msra.mxu1 %v5036_v54  ;;  %s3657_s27 = sshll.u32 %s2575_s29, 5 }
 0x897   : > { %2455 = vmatprep.subr.bf16.mxu0 %v5224_v21  ;;  %2496 = vmatprep.subr.bf16.mxu1 %v5352_v32  ;;  %s2579_s19 = scalar_lea.vmem [#allocation4], %s3657_s27 }
 0x94c   : > { %v2229_v34 = vpop.f32.mrb[64].mxu0  ;;  %v2270_v35 = vpop.f32.mrb[64].mxu1 }
 0x94d   : > { %v2277_v36 = vadd.f32 %v2229_v34, %v2190_v19  ;;  %v2231_v37 = vpop.f32.mrb[65].mxu0  ;;  %v2272_v63 = vpop.f32.mrb[65].mxu1  ;;  %v2279_v46 = vadd.f32 %v2270_v35, %v2192_v44 }
 0x94e   : > { %v2278_v38 = vadd.f32 %v2231_v37, %v2191_v42  ;;  %v2233_v54 = vpop.f32.mrb[66].mxu0  ;;  %v2274_v39 = vpop.f32.mrb[66].mxu1  ;;  %v2280_v48 = vadd.f32 %v2272_v63, %v2193_v47  ;;  %v5404_v63 = vld [vmem:[%s4407_s28 + $0xe0] ss:$16 sps:$4 sm:$0xff]  }
 0x94f   : > { %v2281_v40 = vmul.f32 0.5, %v2277_v36  ;;  %v2234_v41 = vpop.f32.mrb[67].mxu0  ;;  %v2275_v43 = vpop.f32.mrb[67].mxu1  ;;  %v2320_v54 = vld [vmem:[%s2319_s25] sm:$0xff] }
 0x950   : > { %v2285_v45 = vmul.f32 0.5, %v2278_v38  ;;  %v2290_v49 = vmul.f32 0.5, %v2280_v48  ;;  %v5408_v38 = vld [vmem:[%s4407_s28 + $0xe8] ss:$16 sps:$4 sm:$0xff]   ;;  %v2321_v43 = vld [vmem:[%s2319_s25 + $0x8] sm:$0xff] }
 0x951   : > { %3880 = vtanh.f32 %v2281_v40 }
 0x952   : > { %3882 = vtanh.f32 %v2285_v45 }
 0x953   : > { %3884 = vtanh.f32 %v2279_v46 }
 0x954   : > { %3886 = vtanh.f32 %v2290_v49 }
 0x95b   : > { %v3881_v50 = vpop.eup %3880 }
 0x95c   : > { %v3883_v52 = vpop.eup %3882  ;;  %v2283_v55 = vmul.f32 0.5, %v3881_v50 }
 0x95d   : > { %v2287_v5 = vmul.f32 0.5, %v3883_v52  ;;  %v3885_v2 = vpop.eup %3884 }
 0x95e   : > { %v2284_v60 = vadd.f32 0.5, %v2283_v55  ;;  %v3887_v9 = vpop.eup %3886  ;;  %v2322_v55 = vld [vmem:[%s2319_s25 + $0x10] sm:$0xff] }
 0x95f   : > { %v2288_v22 = vadd.f32 0.5, %v2287_v5  ;;  %v2292_v11 = vmul.f32 0.5, %v3887_v9 }
 0x960   : > { %v2295_v27 = vmul.f32 %v3885_v2, %v2284_v60  ;;  %v2323_v2 = vld [vmem:[%s2319_s25 + $0x18] sm:$0xff]  ;;  %s2704_s25 = scalar_select %p975_p8, 96, 24 }
 0x961   : > { %v2294_v6 = vmul.f32 %v2288_v22, %v5232_v4  ;;  %v2293_v19 = vadd.f32 0.5, %v2292_v11 }
 0x962   : > { %s2705_s16 = sshra.s32 %s2704_s25, 3 }
 0x963   : > { %v2296_v7 = vadd.f32 %v2295_v27, %v2294_v6  ;;  %s3658_s13 = sshll.u32 %s2705_s16, 5 }
 0x964   : > { %s2709_s17 = scalar_lea.vmem [#allocation4], %s3658_s13 }
 0x965   : > { %3888 = vtanh.f32 %v2296_v7  ;;  %v5359_v8 = vsel %vm2183_vm10, %v2296_v7, %v5232_v4  ;;  %v5395_v4 = vld [vmem:[%s4407_s28 + $0xc8] ss:$16 sps:$4 sm:$0xff]  }
 0x96f   : > { %v3889_v34 = vpop.eup %3888 }
 0x970   : > { %v2298_v35 = vmul.f32 %v3889_v34, %v2293_v19 }
 0x972   : > { %v2301_v36 = vsel %vm2183_vm10, %v2298_v35, 0.0  ;;  %v5362_v42 = vsel %vm2183_vm10, %v2298_v35, %v5235_v10  ;;  %v5400_v10 = vld [vmem:[%s4407_s28 + $0xec] ss:$16 sps:$4 sm:$0xff]  }
 0x973   : > { %3613 = vst [vmem:[%s4782_s26 + $0x40] sm:$0xff] %v2301_v36  ;;  %v2324_v37 = vpack.c.bf16 %v5362_v42, %v5362_v42 }
 0x975   : > { %2358 = vmatmul.mubr.bf16.vlgmr.msra.gmra.mrb[68].mxu0 %v2324_v37  ;;  %2399 = vmatmul.mubr.bf16.vlgmr.msra.gmra.mrb[68].mxu1 %v2324_v37  ;;  %v2312_v37 = vpop.permute.xlu1 %2311 }
 0x976   : > { %2456 = vmatpush1.bf16.msra.mxu0 %v5241_v12  ;;  %2497 = vmatpush1.bf16.msra.mxu1 %v5245_v18  ;;  %vm2313_vm11 = vcmp.eq.s32.totalorder %v2312_v37, 1 }
 0x977   : > { %2457 = vmatprep.subr.bf16.mxu0 %v5249_v59  ;;  %2498 = vmatprep.subr.bf16.mxu1 %v5253_v13 }
 0x978   : > { %2487 = vmatprep.mubr.bf16.mxu0 %v4229_v3  ;;  %2528 = vmatprep.mubr.bf16.mxu1 %v4229_v3 }
 0x97a   : > { %2458 = vmatpush1.bf16.msra.mxu0 %v5259_v20  ;;  %2499 = vmatpush1.bf16.msra.mxu1 %v5263_v24 }
 0x97b   : > { %2459 = vmatprep.subr.bf16.mxu0 %v5267_v25  ;;  %2500 = vmatprep.subr.bf16.mxu1 %v5271_v33 }
 0x97e   : > { %2460 = vmatpush1.bf16.msra.mxu0 %v5275_v53  ;;  %2501 = vmatpush1.bf16.msra.mxu1 %v5279_v57 }
 0x97f   : > { %2461 = vmatprep.subr.bf16.mxu0 %v5283_v56  ;;  %2502 = vmatprep.subr.bf16.mxu1 %v5287_v17 }
 0x982   : > { %2462 = vmatpush1.bf16.msra.mxu0 %v5291_v58  ;;  %2503 = vmatpush1.bf16.msra.mxu1 %v5295_v62 }
 0x983   : > { %2463 = vmatprep.subr.bf16.mxu0 %v5299_v23  ;;  %2504 = vmatprep.subr.bf16.mxu1 %v5303_v1 }
 0x986   : > { %2464 = vmatpush1.bf16.msra.mxu0 %v5307_v61  ;;  %2505 = vmatpush1.bf16.msra.mxu1 %v5311_v0 }
 0x987   : > { %2465 = vmatprep.subr.bf16.mxu0 %v5315_v16  ;;  %2506 = vmatprep.subr.bf16.mxu1 %v5319_v15 }
 0x98a   : > { %2466 = vmatpush1.bf16.msra.mxu0 %v5323_v51  ;;  %2507 = vmatpush1.bf16.msra.mxu1 %v5327_v28 }
 0x98b   : > { %2467 = vmatprep.subr.bf16.mxu0 %v5331_v29  ;;  %2508 = vmatprep.subr.bf16.mxu1 %v5335_v30 }
 0x98e   : > { %2468 = vmatpush1.bf16.msra.mxu0 %v5339_v31  ;;  %2509 = vmatpush1.bf16.msra.mxu1 %v5395_v4 }
 0x98f   : > { %2469 = vmatprep.subr.bf16.mxu0 %v5344_v26  ;;  %2510 = vmatprep.subr.bf16.mxu1 %v5400_v10 }
 0x992   : > { %2470 = vmatpush1.bf16.msra.mxu0 %v5404_v63  ;;  %2511 = vmatpush1.bf16.msra.mxu1 %v5408_v38 }
 0x993   : > { %2585 = vmatprep.subr.bf16.mxu0 %v5224_v21  ;;  %2626 = vmatprep.subr.bf16.mxu1 %v5352_v32 }
 0xa48   : > { %v2359_v39 = vpop.f32.mrb[68].mxu0  ;;  %v2400_v40 = vpop.f32.mrb[68].mxu1 }
 0xa49   : > { %v2407_v41 = vadd.f32 %v2359_v39, %v2320_v54  ;;  %v2361_v44 = vpop.f32.mrb[69].mxu0  ;;  %v2402_v45 = vpop.f32.mrb[69].mxu1  ;;  %v2409_v60 = vadd.f32 %v2400_v40, %v2322_v55 }
 0xa4a   : > { %v2408_v46 = vadd.f32 %v2361_v44, %v2321_v43  ;;  %v2363_v47 = vpop.f32.mrb[70].mxu0  ;;  %v2404_v48 = vpop.f32.mrb[70].mxu1  ;;  %v2410_v22 = vadd.f32 %v2402_v45, %v2323_v2 }
 0xa4b   : > { %v2411_v49 = vmul.f32 0.5, %v2407_v41  ;;  %v2364_v50 = vpop.f32.mrb[71].mxu0  ;;  %v2405_v52 = vpop.f32.mrb[71].mxu1 }
 0xa4c   : > { %v2415_v5 = vmul.f32 0.5, %v2408_v46  ;;  %v2420_v27 = vmul.f32 0.5, %v2410_v22  ;;  %v2451_v52 = vld [vmem:[%s2449_s21 + $0x8] sm:$0xff] }
 0xa4d   : > { %3890 = vtanh.f32 %v2411_v49 }
 0xa4e   : > { %3892 = vtanh.f32 %v2415_v5 }
 0xa4f   : > { %3894 = vtanh.f32 %v2409_v60 }
 0xa50   : > { %3896 = vtanh.f32 %v2420_v27 }
 0xa57   : > { %v3891_v6 = vpop.eup %3890 }
 0xa58   : > { %v3893_v14 = vpop.eup %3892  ;;  %v2413_v7 = vmul.f32 0.5, %v3891_v6 }
 0xa59   : > { %v2417_v9 = vmul.f32 0.5, %v3893_v14  ;;  %v3895_v19 = vpop.eup %3894 }
 0xa5a   : > { %v2414_v11 = vadd.f32 0.5, %v2413_v7  ;;  %v3897_v40 = vpop.eup %3896  ;;  %v2452_v7 = vld [vmem:[%s2449_s21 + $0x10] sm:$0xff] }
 0xa5b   : > { %v2418_v34 = vadd.f32 0.5, %v2417_v9  ;;  %v2422_v41 = vmul.f32 0.5, %v3897_v40 }
 0xa5c   : > { %v2425_v35 = vmul.f32 %v3895_v19, %v2414_v11  ;;  %v2453_v19 = vld [vmem:[%s2449_s21 + $0x18] sm:$0xff] }
 0xa5d   : > { %v2424_v36 = vmul.f32 %v2418_v34, %v5359_v8  ;;  %v2423_v43 = vadd.f32 0.5, %v2422_v41 }
 0xa5f   : > { %v2426_v54 = vadd.f32 %v2425_v35, %v2424_v36 }
 0xa61   : > { %3898 = vtanh.f32 %v2426_v54  ;;  %v5417_v39 = vsel %vm2313_vm11, %v2426_v54, %v5359_v8  ;;  %v2450_v8 = vld [vmem:[%s2449_s21] sm:$0xff]  ;;  %s2834_s21 = scalar_select %p975_p8, 104, 16 }
 0xa63   : > { %s2835_s20 = sshra.s32 %s2834_s21, 3 }
 0xa64   : > { %s3659_s29 = sshll.u32 %s2835_s20, 5 }
 0xa65   : > { %s2839_s27 = scalar_lea.vmem [#allocation4], %s3659_s29  ;;  %s3523_s29 = sshll.u32 %s4403_s18, 3 }
 0xa6b   : > { %v3899_v44 = vpop.eup %3898 }
 0xa6c   : > { %v2428_v45 = vmul.f32 %v3899_v44, %v2423_v43 }
 0xa6e   : > { %v2431_v46 = vsel %vm2313_vm11, %v2428_v45, 0.0  ;;  %v5420_v47 = vsel %vm2313_vm11, %v2428_v45, %v5362_v42 }
 0xa6f   : > { %3616 = vst [vmem:[%s4782_s26 + $0x48] sm:$0xff] %v2431_v46  ;;  %v2454_v48 = vpack.c.bf16 %v5420_v47, %v5420_v47 }
 0xa71   : > { %2488 = vmatmul.mubr.bf16.vlgmr.msra.gmra.mrb[72].mxu0 %v2454_v48  ;;  %2529 = vmatmul.mubr.bf16.vlgmr.msra.gmra.mrb[72].mxu1 %v2454_v48  ;;  %v2442_v48 = vpop.permute.xlu0 %2441 }
 0xa72   : > { %2586 = vmatpush1.bf16.msra.mxu0 %v5241_v12  ;;  %2627 = vmatpush1.bf16.msra.mxu1 %v5245_v18  ;;  %vm2443_vm12 = vcmp.eq.s32.totalorder %v2442_v48, 1 }
 0xa73   : > { %2587 = vmatprep.subr.bf16.mxu0 %v5249_v59  ;;  %2628 = vmatprep.subr.bf16.mxu1 %v5253_v13 }
 0xa74   : > { %2617 = vmatprep.mubr.bf16.mxu0 %v4229_v3  ;;  %2658 = vmatprep.mubr.bf16.mxu1 %v4229_v3 }
 0xa76   : > { %2588 = vmatpush1.bf16.msra.mxu0 %v5259_v20  ;;  %2629 = vmatpush1.bf16.msra.mxu1 %v5263_v24 }
 0xa77   : > { %2589 = vmatprep.subr.bf16.mxu0 %v5267_v25  ;;  %2630 = vmatprep.subr.bf16.mxu1 %v5271_v33 }
 0xa7a   : > { %2590 = vmatpush1.bf16.msra.mxu0 %v5275_v53  ;;  %2631 = vmatpush1.bf16.msra.mxu1 %v5279_v57 }
 0xa7b   : > { %2591 = vmatprep.subr.bf16.mxu0 %v5283_v56  ;;  %2632 = vmatprep.subr.bf16.mxu1 %v5287_v17 }
 0xa7e   : > { %2592 = vmatpush1.bf16.msra.mxu0 %v5291_v58  ;;  %2633 = vmatpush1.bf16.msra.mxu1 %v5295_v62 }
 0xa7f   : > { %2593 = vmatprep.subr.bf16.mxu0 %v5299_v23  ;;  %2634 = vmatprep.subr.bf16.mxu1 %v5303_v1 }
 0xa82   : > { %2594 = vmatpush1.bf16.msra.mxu0 %v5307_v61  ;;  %2635 = vmatpush1.bf16.msra.mxu1 %v5311_v0 }
 0xa83   : > { %2595 = vmatprep.subr.bf16.mxu0 %v5315_v16  ;;  %2636 = vmatprep.subr.bf16.mxu1 %v5319_v15 }
 0xa86   : > { %2596 = vmatpush1.bf16.msra.mxu0 %v5323_v51  ;;  %2637 = vmatpush1.bf16.msra.mxu1 %v5327_v28 }
 0xa87   : > { %2597 = vmatprep.subr.bf16.mxu0 %v5331_v29  ;;  %2638 = vmatprep.subr.bf16.mxu1 %v5335_v30 }
 0xa8a   : > { %2598 = vmatpush1.bf16.msra.mxu0 %v5339_v31  ;;  %2639 = vmatpush1.bf16.msra.mxu1 %v5395_v4 }
 0xa8b   : > { %2599 = vmatprep.subr.bf16.mxu0 %v5344_v26  ;;  %2640 = vmatprep.subr.bf16.mxu1 %v5400_v10 }
 0xa8e   : > { %2600 = vmatpush1.bf16.msra.mxu0 %v5404_v63  ;;  %2641 = vmatpush1.bf16.msra.mxu1 %v5408_v38 }
 0xa8f   : > { %2715 = vmatprep.subr.bf16.mxu0 %v5224_v21  ;;  %2756 = vmatprep.subr.bf16.mxu1 %v5352_v32 }
 0xb44   : > { %v2489_v42 = vpop.f32.mrb[72].mxu0  ;;  %v2530_v49 = vpop.f32.mrb[72].mxu1 }
 0xb45   : > { %v2537_v50 = vadd.f32 %v2489_v42, %v2450_v8  ;;  %v2491_v55 = vpop.f32.mrb[73].mxu0  ;;  %v2532_v5 = vpop.f32.mrb[73].mxu1  ;;  %v2539_v11 = vadd.f32 %v2530_v49, %v2452_v7 }
 0xb46   : > { %v2538_v60 = vadd.f32 %v2491_v55, %v2451_v52  ;;  %v2493_v2 = vpop.f32.mrb[74].mxu0  ;;  %v2534_v22 = vpop.f32.mrb[74].mxu1  ;;  %v2540_v34 = vadd.f32 %v2532_v5, %v2453_v19 }
 0xb47   : > { %v2541_v27 = vmul.f32 0.5, %v2537_v50  ;;  %v2494_v6 = vpop.f32.mrb[75].mxu0  ;;  %v2535_v14 = vpop.f32.mrb[75].mxu1 }
 0xb48   : > { %v2545_v9 = vmul.f32 0.5, %v2538_v60  ;;  %v2550_v35 = vmul.f32 0.5, %v2540_v34  ;;  %v2581_v14 = vld [vmem:[%s2579_s19 + $0x8] sm:$0xff] }
 0xb49   : > { %3900 = vtanh.f32 %v2541_v27 }
 0xb4a   : > { %3902 = vtanh.f32 %v2545_v9 }
 0xb4b   : > { %3904 = vtanh.f32 %v2539_v11 }
 0xb4c   : > { %3906 = vtanh.f32 %v2550_v35 }
 0xb53   : > { %v3901_v36 = vpop.eup %3900 }
 0xb54   : > { %v3903_v37 = vpop.eup %3902  ;;  %v2543_v54 = vmul.f32 0.5, %v3901_v36 }
 0xb55   : > { %v2547_v40 = vmul.f32 0.5, %v3903_v37  ;;  %v3905_v43 = vpop.eup %3904 }
 0xb56   : > { %v2544_v41 = vadd.f32 0.5, %v2543_v54  ;;  %v3907_v49 = vpop.eup %3906  ;;  %v2582_v54 = vld [vmem:[%s2579_s19 + $0x10] sm:$0xff] }
 0xb57   : > { %v2548_v44 = vadd.f32 0.5, %v2547_v40  ;;  %v2552_v50 = vmul.f32 0.5, %v3907_v49 }
 0xb58   : > { %v2555_v45 = vmul.f32 %v3905_v43, %v2544_v41  ;;  %v2583_v43 = vld [vmem:[%s2579_s19 + $0x18] sm:$0xff] }
 0xb59   : > { %v2554_v46 = vmul.f32 %v2548_v44, %v5417_v39  ;;  %v2553_v52 = vadd.f32 0.5, %v2552_v50 }
 0xb5b   : > { %v2556_v8 = vadd.f32 %v2555_v45, %v2554_v46 }
 0xb5d   : > { %3908 = vtanh.f32 %v2556_v8  ;;  %v5463_v42 = vsel %vm2443_vm12, %v2556_v8, %v5417_v39  ;;  %v2580_v39 = vld [vmem:[%s2579_s19] sm:$0xff]  ;;  %s2964_s19 = scalar_select %p975_p8, 112, 8 }
 0xb5f   : > { %s2965_s25 = sshra.s32 %s2964_s19, 3  ;;  %s3228_s19 = sand.u32 1, %s4316_s15  }
 0xb60   : > { %s3660_s16 = sshll.u32 %s2965_s25, 5  ;;  %s3640_s25 = sshll.u32 %s4215_s12, 7 }
 0xb61   : > { %s2969_s13 = scalar_lea.vmem [#allocation4], %s3660_s16  ;;  %s465_s16 = scalar_lea.vmem [#allocation9], %s3523_s29 }
 0xb62   : > { %s5662_s0 = scalar_lea.hbm %s5787_s8, %s3640_s25  ;;  %s5684_s1 = scalar_lea.sflag [#allocation10], %s3228_s19 }
 0xb67   : > { %v3909_v55 = vpop.eup %3908 }
 0xb68   : > { %v2558_v5 = vmul.f32 %v3909_v55, %v2553_v52 }
 0xb6a   : > { %v2561_v60 = vsel %vm2443_vm12, %v2558_v5, 0.0  ;;  %v5466_v2 = vsel %vm2443_vm12, %v2558_v5, %v5420_v47 }
 0xb6b   : > { %3619 = vst [vmem:[%s4782_s26 + $0x50] sm:$0xff] %v2561_v60  ;;  %v2584_v22 = vpack.c.bf16 %v5466_v2, %v5466_v2 }
 0xb6d   : > { %2618 = vmatmul.mubr.bf16.vlgmr.msra.gmra.mrb[76].mxu0 %v2584_v22  ;;  %2659 = vmatmul.mubr.bf16.vlgmr.msra.gmra.mrb[76].mxu1 %v2584_v22  ;;  %v2572_v22 = vpop.permute.xlu1 %2571 }
 0xb6e   : > { %2716 = vmatpush1.bf16.msra.mxu0 %v5241_v12  ;;  %2757 = vmatpush1.bf16.msra.mxu1 %v5245_v18  ;;  %vm2573_vm13 = vcmp.eq.s32.totalorder %v2572_v22, 1 }
 0xb6f   : > { %2717 = vmatprep.subr.bf16.mxu0 %v5249_v59  ;;  %2758 = vmatprep.subr.bf16.mxu1 %v5253_v13 }
 0xb70   : > { %2747 = vmatprep.mubr.bf16.mxu0 %v4229_v3  ;;  %2788 = vmatprep.mubr.bf16.mxu1 %v4229_v3 }
 0xb72   : > { %2718 = vmatpush1.bf16.msra.mxu0 %v5259_v20  ;;  %2759 = vmatpush1.bf16.msra.mxu1 %v5263_v24 }
 0xb73   : > { %2719 = vmatprep.subr.bf16.mxu0 %v5267_v25  ;;  %2760 = vmatprep.subr.bf16.mxu1 %v5271_v33 }
 0xb76   : > { %2720 = vmatpush1.bf16.msra.mxu0 %v5275_v53  ;;  %2761 = vmatpush1.bf16.msra.mxu1 %v5279_v57 }
 0xb77   : > { %2721 = vmatprep.subr.bf16.mxu0 %v5283_v56  ;;  %2762 = vmatprep.subr.bf16.mxu1 %v5287_v17 }
 0xb7a   : > { %2722 = vmatpush1.bf16.msra.mxu0 %v5291_v58  ;;  %2763 = vmatpush1.bf16.msra.mxu1 %v5295_v62 }
 0xb7b   : > { %2723 = vmatprep.subr.bf16.mxu0 %v5299_v23  ;;  %2764 = vmatprep.subr.bf16.mxu1 %v5303_v1 }
 0xb7e   : > { %2724 = vmatpush1.bf16.msra.mxu0 %v5307_v61  ;;  %2765 = vmatpush1.bf16.msra.mxu1 %v5311_v0 }
 0xb7f   : > { %2725 = vmatprep.subr.bf16.mxu0 %v5315_v16  ;;  %2766 = vmatprep.subr.bf16.mxu1 %v5319_v15 }
 0xb82   : > { %2726 = vmatpush1.bf16.msra.mxu0 %v5323_v51  ;;  %2767 = vmatpush1.bf16.msra.mxu1 %v5327_v28 }
 0xb83   : > { %2727 = vmatprep.subr.bf16.mxu0 %v5331_v29  ;;  %2768 = vmatprep.subr.bf16.mxu1 %v5335_v30 }
 0xb86   : > { %2728 = vmatpush1.bf16.msra.mxu0 %v5339_v31  ;;  %2769 = vmatpush1.bf16.msra.mxu1 %v5395_v4 }
 0xb87   : > { %2729 = vmatprep.subr.bf16.mxu0 %v5344_v26  ;;  %2770 = vmatprep.subr.bf16.mxu1 %v5400_v10 }
 0xb8a   : > { %2730 = vmatpush1.bf16.msra.mxu0 %v5404_v63  ;;  %2771 = vmatpush1.bf16.msra.mxu1 %v5408_v38 }
 0xb8b   : > { %2845 = vmatprep.subr.bf16.mxu0 %v5224_v21  ;;  %2886 = vmatprep.subr.bf16.mxu1 %v5352_v32 }
 0xc40   : > { %v2619_v47 = vpop.f32.mrb[76].mxu0  ;;  %v2660_v27 = vpop.f32.mrb[76].mxu1 }
 0xc41   : > { %v2667_v6 = vadd.f32 %v2619_v47, %v2580_v39  ;;  %v2621_v7 = vpop.f32.mrb[77].mxu0  ;;  %v2662_v9 = vpop.f32.mrb[77].mxu1  ;;  %v2669_v41 = vadd.f32 %v2660_v27, %v2582_v54 }
 0xc42   : > { %v2668_v11 = vadd.f32 %v2621_v7, %v2581_v14  ;;  %v2623_v19 = vpop.f32.mrb[78].mxu0  ;;  %v2664_v34 = vpop.f32.mrb[78].mxu1  ;;  %v2670_v44 = vadd.f32 %v2662_v9, %v2583_v43 }
 0xc43   : > { %v2671_v35 = vmul.f32 0.5, %v2667_v6  ;;  %v2624_v36 = vpop.f32.mrb[79].mxu0  ;;  %v2665_v37 = vpop.f32.mrb[79].mxu1 }
 0xc44   : > { %v2675_v40 = vmul.f32 0.5, %v2668_v11  ;;  %v2680_v45 = vmul.f32 0.5, %v2670_v44  ;;  %v2711_v37 = vld [vmem:[%s2709_s17 + $0x8] sm:$0xff] }
 0xc45   : > { %3910 = vtanh.f32 %v2671_v35 }
 0xc46   : > { %3912 = vtanh.f32 %v2675_v40 }
 0xc47   : > { %3914 = vtanh.f32 %v2669_v41 }
 0xc48   : > { %3916 = vtanh.f32 %v2680_v45 }
 0xc4f   : > { %v3911_v46 = vpop.eup %3910 }
 0xc50   : > { %v3913_v48 = vpop.eup %3912  ;;  %v2673_v8 = vmul.f32 0.5, %v3911_v46 }
 0xc51   : > { %v2677_v49 = vmul.f32 0.5, %v3913_v48  ;;  %v3915_v52 = vpop.eup %3914  ;;  %v2712_v48 = vld [vmem:[%s2709_s17 + $0x10] sm:$0xff] }
 0xc52   : > { %v2674_v50 = vadd.f32 0.5, %v2673_v8  ;;  %v3917_v27 = vpop.eup %3916 }
 0xc53   : > { %v2678_v55 = vadd.f32 0.5, %v2677_v49  ;;  %v2682_v6 = vmul.f32 0.5, %v3917_v27 }
 0xc54   : > { %v2685_v5 = vmul.f32 %v3915_v52, %v2674_v50  ;;  %v2713_v50 = vld [vmem:[%s2709_s17 + $0x18] sm:$0xff] }
 0xc55   : > { %v2684_v60 = vmul.f32 %v2678_v55, %v5463_v42  ;;  %v2683_v14 = vadd.f32 0.5, %v2682_v6 }
 0xc57   : > { %v2686_v39 = vadd.f32 %v2685_v5, %v2684_v60 }
 0xc59   : > { %3918 = vtanh.f32 %v2686_v39  ;;  %v5509_v47 = vsel %vm2573_vm13, %v2686_v39, %v5463_v42  ;;  %v2710_v42 = vld [vmem:[%s2709_s17] sm:$0xff] }
 0xc63   : > { %v3919_v7 = vpop.eup %3918 }
 0xc64   : > { %v2688_v9 = vmul.f32 %v3919_v7, %v2683_v14 }
 0xc66   : > { %v2691_v11 = vsel %vm2573_vm13, %v2688_v9, 0.0  ;;  %v5512_v19 = vsel %vm2573_vm13, %v2688_v9, %v5466_v2 }
 0xc67   : > { %3622 = vst [vmem:[%s4782_s26 + $0x58] sm:$0xff] %v2691_v11  ;;  %v2714_v34 = vpack.c.bf16 %v5512_v19, %v5512_v19  ;;  %v2702_v11 = vpop.permute.xlu0 %2701 }
 0xc68   : > { %vm2703_vm14 = vcmp.eq.s32.totalorder %v2702_v11, 1  ;;  %v4033_v11 = vld [vmem:[%s4407_s28 + $0x40] ss:$16 sps:$4 sm:$0xff]  }
 0xc69   : > { %2748 = vmatmul.mubr.bf16.vlgmr.msra.gmra.mrb[80].mxu0 %v2714_v34  ;;  %2789 = vmatmul.mubr.bf16.vlgmr.msra.gmra.mrb[80].mxu1 %v2714_v34 }
 0xc6a   : > { %2846 = vmatpush1.bf16.msra.mxu0 %v5241_v12  ;;  %2887 = vmatpush1.bf16.msra.mxu1 %v5245_v18 }
 0xc6b   : > { %2847 = vmatprep.subr.bf16.mxu0 %v5249_v59  ;;  %2888 = vmatprep.subr.bf16.mxu1 %v5253_v13 }
 0xc6c   : > { %2877 = vmatprep.mubr.bf16.mxu0 %v4229_v3  ;;  %2918 = vmatprep.mubr.bf16.mxu1 %v4229_v3 }
 0xc6e   : > { %2848 = vmatpush1.bf16.msra.mxu0 %v5259_v20  ;;  %2889 = vmatpush1.bf16.msra.mxu1 %v5263_v24 }
 0xc6f   : > { %2849 = vmatprep.subr.bf16.mxu0 %v5267_v25  ;;  %2890 = vmatprep.subr.bf16.mxu1 %v5271_v33 }
 0xc72   : > { %2850 = vmatpush1.bf16.msra.mxu0 %v5275_v53  ;;  %2891 = vmatpush1.bf16.msra.mxu1 %v5279_v57 }
 0xc73   : > { %2851 = vmatprep.subr.bf16.mxu0 %v5283_v56  ;;  %2892 = vmatprep.subr.bf16.mxu1 %v5287_v17 }
 0xc76   : > { %2852 = vmatpush1.bf16.msra.mxu0 %v5291_v58  ;;  %2893 = vmatpush1.bf16.msra.mxu1 %v5295_v62 }
 0xc77   : > { %2853 = vmatprep.subr.bf16.mxu0 %v5299_v23  ;;  %2894 = vmatprep.subr.bf16.mxu1 %v5303_v1 }
 0xc7a   : > { %2854 = vmatpush1.bf16.msra.mxu0 %v5307_v61  ;;  %2895 = vmatpush1.bf16.msra.mxu1 %v5311_v0 }
 0xc7b   : > { %2855 = vmatprep.subr.bf16.mxu0 %v5315_v16  ;;  %2896 = vmatprep.subr.bf16.mxu1 %v5319_v15 }
 0xc7e   : > { %2856 = vmatpush1.bf16.msra.mxu0 %v5323_v51  ;;  %2897 = vmatpush1.bf16.msra.mxu1 %v5327_v28 }
 0xc7f   : > { %2857 = vmatprep.subr.bf16.mxu0 %v5331_v29  ;;  %2898 = vmatprep.subr.bf16.mxu1 %v5335_v30 }
 0xc82   : > { %2858 = vmatpush1.bf16.msra.mxu0 %v5339_v31  ;;  %2899 = vmatpush1.bf16.msra.mxu1 %v5395_v4 }
 0xc83   : > { %2859 = vmatprep.subr.bf16.mxu0 %v5344_v26  ;;  %2900 = vmatprep.subr.bf16.mxu1 %v5400_v10 }
 0xc86   : > { %2860 = vmatpush1.bf16.msra.mxu0 %v5404_v63  ;;  %2901 = vmatpush1.bf16.msra.mxu1 %v5408_v38 }
 0xc87   : > { %2975 = vmatprep.subr.bf16.mxu0 %v5224_v21  ;;  %3016 = vmatprep.subr.bf16.mxu1 %v5352_v32 }
 0xd3c   : > { %v2749_v2 = vpop.f32.mrb[80].mxu0  ;;  %v2790_v35 = vpop.f32.mrb[80].mxu1 }
 0xd3d   : > { %v2797_v36 = vadd.f32 %v2749_v2, %v2710_v42  ;;  %v2751_v54 = vpop.f32.mrb[81].mxu0  ;;  %v2792_v40 = vpop.f32.mrb[81].mxu1  ;;  %v2799_v49 = vadd.f32 %v2790_v35, %v2712_v48 }
 0xd3e   : > { %v2798_v41 = vadd.f32 %v2751_v54, %v2711_v37  ;;  %v2753_v43 = vpop.f32.mrb[82].mxu0  ;;  %v2794_v44 = vpop.f32.mrb[82].mxu1  ;;  %v2800_v52 = vadd.f32 %v2792_v40, %v2713_v50 }
 0xd3f   : > { %v2801_v45 = vmul.f32 0.5, %v2797_v36  ;;  %v2754_v46 = vpop.f32.mrb[83].mxu0  ;;  %v2795_v21 = vpop.f32.mrb[83].mxu1 }
 0xd40   : > { %v2805_v8 = vmul.f32 0.5, %v2798_v41  ;;  %v2810_v55 = vmul.f32 0.5, %v2800_v52  ;;  %v2832_v44 = vpop.permute.xlu1 %2831 }
 0xd41   : > { %3920 = vtanh.f32 %v2801_v45  ;;  %vm2833_vm15 = vcmp.eq.s32.totalorder %v2832_v44, 1  ;;  %v2962_v44 = vpop.permute.xlu0 %2961 }
 0xd42   : > { %3922 = vtanh.f32 %v2805_v8  ;;  %vm2963_vm0 = vcmp.eq.s32.totalorder %v2962_v44, 1 }
 0xd43   : > { %3924 = vtanh.f32 %v2799_v49 }
 0xd44   : > { %3926 = vtanh.f32 %v2810_v55 }
 0xd4b   : > { %v3921_v5 = vpop.eup %3920 }
 0xd4c   : > { %v3923_v60 = vpop.eup %3922  ;;  %v2803_v22 = vmul.f32 0.5, %v3921_v5 }
 0xd4d   : > { %v2807_v39 = vmul.f32 0.5, %v3923_v60  ;;  %v3925_v6 = vpop.eup %3924  ;;  %v4025_v60 = vld [vmem:[%s4407_s28] ss:$16 sps:$4 sm:$0xff]  }
 0xd4e   : > { %v2804_v27 = vadd.f32 0.5, %v2803_v22  ;;  %v3927_v2 = vpop.eup %3926  ;;  %v4026_v22 = vld [vmem:[%s4407_s28 + $0x8] ss:$16 sps:$4 sm:$0xff]  }
 0xd4f   : > { %v2808_v14 = vadd.f32 0.5, %v2807_v39  ;;  %v2812_v35 = vmul.f32 0.5, %v3927_v2  ;;  %v4027_v39 = vld [vmem:[%s4407_s28 + $0x24] ss:$16 sps:$4 sm:$0xff]   ;;  %v4037_v2 = vld [vmem:[%s4407_s28 + $0x60] ss:$16 sps:$4 sm:$0xff]  }
 0xd50   : > { %v2815_v7 = vmul.f32 %v3925_v6, %v2804_v27  ;;  %v4028_v27 = vld [vmem:[%s4407_s28 + $0x2c] ss:$16 sps:$4 sm:$0xff]   ;;  %v4029_v6 = vld [vmem:[%s4407_s28 + $0x20] ss:$16 sps:$4 sm:$0xff]  }
 0xd51   : > { %v2814_v9 = vmul.f32 %v2808_v14, %v5509_v47  ;;  %v2813_v36 = vadd.f32 0.5, %v2812_v35  ;;  %v4030_v14 = vld [vmem:[%s4407_s28 + $0x28] ss:$16 sps:$4 sm:$0xff]  }
 0xd52   : > { %v4038_v35 = vld [vmem:[%s4407_s28 + $0x68] ss:$16 sps:$4 sm:$0xff]  }
 0xd53   : > { %v2816_v34 = vadd.f32 %v2815_v7, %v2814_v9  ;;  %v4031_v7 = vld [vmem:[%s4407_s28 + $0x44] ss:$16 sps:$4 sm:$0xff]   ;;  %v4032_v9 = vld [vmem:[%s4407_s28 + $0x4c] ss:$16 sps:$4 sm:$0xff]  }
 0xd55   : > { %3928 = vtanh.f32 %v2816_v34  ;;  %v5555_v42 = vsel %vm2703_vm14, %v2816_v34, %v5509_v47  ;;  %v4034_v34 = vld [vmem:[%s4407_s28 + $0x48] ss:$16 sps:$4 sm:$0xff]  }
 0xd5f   : > { %v3929_v37 = vpop.eup %3928 }
 0xd60   : > { %v2818_v54 = vmul.f32 %v3929_v37, %v2813_v36  ;;  %v4039_v36 = vld [vmem:[%s4407_s28 + $0x84] ss:$16 sps:$4 sm:$0xff]   ;;  %v4040_v37 = vld [vmem:[%s4407_s28 + $0x8c] ss:$16 sps:$4 sm:$0xff]  }
 0xd62   : > { %v2821_v40 = vsel %vm2703_vm14, %v2818_v54, 0.0  ;;  %v5558_v41 = vsel %vm2703_vm14, %v2818_v54, %v5512_v19  ;;  %v4041_v54 = vld [vmem:[%s4407_s28 + $0x80] ss:$16 sps:$4 sm:$0xff]  }
 0xd63   : > { %3625 = vst [vmem:[%s4782_s26 + $0x60] sm:$0xff] %v2821_v40  ;;  %v2844_v43 = vpack.c.bf16 %v5558_v41, %v5558_v41  ;;  %v4042_v40 = vld [vmem:[%s4407_s28 + $0x88] ss:$16 sps:$4 sm:$0xff]  }
 0xd65   : > { %2878 = vmatmul.mubr.bf16.vlgmr.msra.gmra.mrb[84].mxu0 %v2844_v43  ;;  %2919 = vmatmul.mubr.bf16.vlgmr.msra.gmra.mrb[84].mxu1 %v2844_v43  ;;  %v4044_v43 = vld [vmem:[%s4407_s28 + $0xac] ss:$16 sps:$4 sm:$0xff]  }
 0xd66   : > { %2976 = vmatpush1.bf16.msra.mxu0 %v5241_v12  ;;  %3017 = vmatpush1.bf16.msra.mxu1 %v5245_v18  ;;  %v4024_v12 = vld [vmem:[%s4407_s28 + $0x4] ss:$16 sps:$4 sm:$0xff]   ;;  %v2840_v18 = vld [vmem:[%s2839_s27] sm:$0xff] }
 0xd67   : > { %2977 = vmatprep.subr.bf16.mxu0 %v5249_v59  ;;  %3018 = vmatprep.subr.bf16.mxu1 %v5253_v13 }
 0xd68   : > { %3007 = vmatprep.mubr.bf16.mxu0 %v4229_v3  ;;  %3048 = vmatprep.mubr.bf16.mxu1 %v4229_v3 }
 0xd6a   : > { %2978 = vmatpush1.bf16.msra.mxu0 %v5259_v20  ;;  %3019 = vmatpush1.bf16.msra.mxu1 %v5263_v24  ;;  %v2841_v24 = vld [vmem:[%s2839_s27 + $0x8] sm:$0xff] }
 0xd6b   : > { %2979 = vmatprep.subr.bf16.mxu0 %v5267_v25  ;;  %3020 = vmatprep.subr.bf16.mxu1 %v5271_v33 }
 0xd6e   : > { %2980 = vmatpush1.bf16.msra.mxu0 %v5275_v53  ;;  %3021 = vmatpush1.bf16.msra.mxu1 %v5279_v57 }
 0xd6f   : > { %2981 = vmatprep.subr.bf16.mxu0 %v5283_v56  ;;  %3022 = vmatprep.subr.bf16.mxu1 %v5287_v17 }
 0xd72   : > { %2982 = vmatpush1.bf16.msra.mxu0 %v5291_v58  ;;  %3023 = vmatpush1.bf16.msra.mxu1 %v5295_v62 }
 0xd73   : > { %2983 = vmatprep.subr.bf16.mxu0 %v5299_v23  ;;  %3024 = vmatprep.subr.bf16.mxu1 %v5303_v1  ;;  %v2842_v23 = vld [vmem:[%s2839_s27 + $0x10] sm:$0xff] }
 0xd76   : > { %2984 = vmatpush1.bf16.msra.mxu0 %v5307_v61  ;;  %3025 = vmatpush1.bf16.msra.mxu1 %v5311_v0  ;;  %v2843_v0 = vld [vmem:[%s2839_s27 + $0x18] sm:$0xff]  ;;  %s472_s27 = scalar_lea.vmem [#allocation11], %s3523_s29 }
 0xd77   : > { %2985 = vmatprep.subr.bf16.mxu0 %v5315_v16  ;;  %3026 = vmatprep.subr.bf16.mxu1 %v5319_v15  ;;  %s3278_s15 = sshll.u32 %s472_s27, 4  ;;  %s5682_s15 = int_to_ptr.vmem [resolvable:$true] %s3278_s15 }
 0xd7a   : > { %2986 = vmatpush1.bf16.msra.mxu0 %v5323_v51  ;;  %3027 = vmatpush1.bf16.msra.mxu1 %v5327_v28 }
 0xd7b   : > { %2987 = vmatprep.subr.bf16.mxu0 %v5331_v29  ;;  %3028 = vmatprep.subr.bf16.mxu1 %v5335_v30 }
 0xd7e   : > { %2988 = vmatpush1.bf16.msra.mxu0 %v5339_v31  ;;  %3029 = vmatpush1.bf16.msra.mxu1 %v5395_v4 }
 0xd7f   : > { %2989 = vmatprep.subr.bf16.mxu0 %v5344_v26  ;;  %3030 = vmatprep.subr.bf16.mxu1 %v5400_v10 }
 0xd82   : > { %2990 = vmatpush1.bf16.msra.mxu0 %v5404_v63  ;;  %3031 = vmatpush1.bf16.msra.mxu1 %v5408_v38 }
 0xd83   : > { %3105 = vmatprep.subr.bf16.mxu0 %v4024_v12  ;;  %3146 = vmatprep.subr.bf16.mxu1 %v5352_v32  ;;  %v4045_v12 = vld [vmem:[%s4407_s28 + $0xa0] ss:$16 sps:$4 sm:$0xff]  }
 0xe38   : > { %v2879_v59 = vpop.f32.mrb[84].mxu0  ;;  %v2920_v13 = vpop.f32.mrb[84].mxu1 }
 0xe39   : > { %v2927_v20 = vadd.f32 %v2879_v59, %v2840_v18  ;;  %v2881_v25 = vpop.f32.mrb[85].mxu0  ;;  %v2922_v33 = vpop.f32.mrb[85].mxu1  ;;  %v2929_v61 = vadd.f32 %v2920_v13, %v2842_v23  ;;  %v4046_v18 = vld [vmem:[%s4407_s28 + $0xa8] ss:$16 sps:$4 sm:$0xff]   ;;  %v4047_v59 = vld [vmem:[%s4407_s28 + $0xc4] ss:$16 sps:$4 sm:$0xff]  }
 0xe3a   : > { %v2928_v53 = vadd.f32 %v2881_v25, %v2841_v24  ;;  %v2883_v57 = vpop.f32.mrb[86].mxu0  ;;  %v2924_v56 = vpop.f32.mrb[86].mxu1  ;;  %v2930_v16 = vadd.f32 %v2922_v33, %v2843_v0  ;;  %v4048_v13 = vld [vmem:[%s4407_s28 + $0xcc] ss:$16 sps:$4 sm:$0xff]   ;;  %v4050_v24 = vld [vmem:[%s4407_s28 + $0xe4] ss:$16 sps:$4 sm:$0xff]  }
 0xe3b   : > { %v2931_v17 = vmul.f32 0.5, %v2927_v20  ;;  %v2884_v58 = vpop.f32.mrb[87].mxu0  ;;  %v2925_v62 = vpop.f32.mrb[87].mxu1  ;;  %v4049_v20 = vld [vmem:[%s4407_s28 + $0xc0] ss:$16 sps:$4 sm:$0xff]   ;;  %v2970_v25 = vld [vmem:[%s2969_s13] sm:$0xff] }
 0xe3c   : > { %v2935_v1 = vmul.f32 0.5, %v2928_v53  ;;  %v2940_v15 = vmul.f32 0.5, %v2930_v16  ;;  %v2971_v56 = vld [vmem:[%s2969_s13 + $0x8] sm:$0xff]  ;;  %v2973_v16 = vld [vmem:[%s2969_s13 + $0x18] sm:$0xff] }
 0xe3d   : > { %3930 = vtanh.f32 %v2931_v17 }
 0xe3e   : > { %3932 = vtanh.f32 %v2935_v1 }
 0xe3f   : > { %3934 = vtanh.f32 %v2929_v61  ;;  %v2972_v61 = vld [vmem:[%s2969_s13 + $0x10] sm:$0xff]  ;;  %s3265_s13 = sshll.u32 %s465_s16, 4  ;;  %s5664_s13 = int_to_ptr.vmem [resolvable:$true] %s3265_s13 }
 0xe40   : > { %3936 = vtanh.f32 %v2940_v15  ;;  %s4081_s2 = scalar_lea.vmem %s5664_s13, 128 }
 0xe41   : > { %p4082_p11 = scmp.ne.s32.totalorder %s5664_s13, %s4081_s2 }
 0xe43   : > { %p4083_p6 = pnand %p4082_p11, %p5809_p0 }
 0xe45   : > { %p4084_p13 = pneg %p4083_p6 }
 0xe47   : > { %v3931_v51 = vpop.eup %3930 }
 0xe48   : > { %v3933_v28 = vpop.eup %3932  ;;  %v2933_v29 = vmul.f32 0.5, %v3931_v51 }
 0xe49   : > { %v2937_v30 = vmul.f32 0.5, %v3933_v28  ;;  %v3935_v26 = vpop.eup %3934 }
 0xe4a   : > { %v2934_v31 = vadd.f32 0.5, %v2933_v29  ;;  %v3937_v21 = vpop.eup %3936 }
 0xe4b   : > { %v2938_v32 = vadd.f32 0.5, %v2937_v30  ;;  %v2942_v48 = vmul.f32 0.5, %v3937_v21 }
 0xe4c   : > { %v2945_v47 = vmul.f32 %v3935_v26, %v2934_v31 }
 0xe4d   : > { %v2944_v19 = vmul.f32 %v2938_v32, %v5555_v42  ;;  %v2943_v8 = vadd.f32 0.5, %v2942_v48 }
 0xe4f   : > { %v2946_v45 = vadd.f32 %v2945_v47, %v2944_v19 }
 0xe51   : > { %3938 = vtanh.f32 %v2946_v45  ;;  %v5601_v46 = vsel %vm2833_vm15, %v2946_v45, %v5555_v42  ;;  %v4035_v42 = vld [vmem:[%s4407_s28 + $0x64] ss:$16 sps:$4 sm:$0xff]  }
 0xe5b   : > { %v3939_v49 = vpop.eup %3938 }
 0xe5c   : > { %v2948_v50 = vmul.f32 %v3939_v49, %v2943_v8 }
 0xe5e   : > { %v2951_v52 = vsel %vm2833_vm15, %v2948_v50, 0.0  ;;  %v5604_v55 = vsel %vm2833_vm15, %v2948_v50, %v5558_v41  ;;  %v4043_v41 = vld [vmem:[%s4407_s28 + $0xa4] ss:$16 sps:$4 sm:$0xff]  }
 0xe5f   : > { %3628 = vst [vmem:[%s4782_s26 + $0x68] sm:$0xff] %v2951_v52  ;;  %v2974_v5 = vpack.c.bf16 %v5604_v55, %v5604_v55 }
 0xe61   : > { %3008 = vmatmul.mubr.bf16.vlgmr.msra.gmra.mrb[88].mxu0 %v2974_v5  ;;  %3049 = vmatmul.mubr.bf16.vlgmr.msra.gmra.mrb[88].mxu1 %v2974_v5 }
 0xe62   : > { %3106 = vmatpush1.bf16.msra.mxu0 %v4025_v60  ;;  %3147 = vmatpush1.bf16.msra.mxu1 %v4026_v22 }
 0xe63   : > { %3107 = vmatprep.subr.bf16.mxu0 %v4027_v39  ;;  %3148 = vmatprep.subr.bf16.mxu1 %v4028_v27 }
 0xe64   : > { %3137 = vmatprep.mubr.bf16.mxu0 %v4229_v3  ;;  %3178 = vmatprep.mubr.bf16.mxu1 %v4229_v3  ;;  %v4036_v3 = vld [vmem:[%s4407_s28 + $0x6c] ss:$16 sps:$4 sm:$0xff]   ;;  %s3094_s28 = scalar_select %p975_p8, 120, 0 }
 0xe66   : > { %3108 = vmatpush1.bf16.msra.mxu0 %v4029_v6  ;;  %3149 = vmatpush1.bf16.msra.mxu1 %v4030_v14  ;;  %s3095_s17 = sshra.s32 %s3094_s28, 3  ;;  %s3662_s28 = sshll.u32 %s4215_s12, 11 }
 0xe67   : > { %3109 = vmatprep.subr.bf16.mxu0 %v4031_v7  ;;  %3150 = vmatprep.subr.bf16.mxu1 %v4032_v9  ;;  %s3661_s21 = sshll.u32 %s3095_s17, 5  ;;  %s3249_s17 = sshll.u32 %s4782_s26, 4  ;;  %s5671_s17 = int_to_ptr.vmem [resolvable:$true] %s3249_s17 }
 0xe68   : > { %s3099_s20 = scalar_lea.vmem [#allocation4], %s3661_s21  ;;  %s5669_s29 = scalar_lea.hbm %s5786_s7, %s3662_s28 }
 0xe69   : > { %v3101_v7 = vld [vmem:[%s3099_s20 + $0x8] sm:$0xff] }
 0xe6a   : > { %3110 = vmatpush1.bf16.msra.mxu0 %v4033_v11  ;;  %3151 = vmatpush1.bf16.msra.mxu1 %v4034_v34 }
 0xe6b   : > { %3111 = vmatprep.subr.bf16.mxu0 %v4035_v42  ;;  %3152 = vmatprep.subr.bf16.mxu1 %v4036_v3 }
 0xe6e   : > { %3112 = vmatpush1.bf16.msra.mxu0 %v4037_v2  ;;  %3153 = vmatpush1.bf16.msra.mxu1 %v4038_v35 }
 0xe6f   : > { %3113 = vmatprep.subr.bf16.mxu0 %v4039_v36  ;;  %3154 = vmatprep.subr.bf16.mxu1 %v4040_v37  ;;  %v3102_v36 = vld [vmem:[%s3099_s20 + $0x10] sm:$0xff] }
 0xe72   : > { %3114 = vmatpush1.bf16.msra.mxu0 %v4041_v54  ;;  %3155 = vmatpush1.bf16.msra.mxu1 %v4042_v40  ;;  %v3103_v40 = vld [vmem:[%s3099_s20 + $0x18] sm:$0xff] }
 0xe73   : > { %3115 = vmatprep.subr.bf16.mxu0 %v4043_v41  ;;  %3156 = vmatprep.subr.bf16.mxu1 %v4044_v43 }
 0xe76   : > { %3116 = vmatpush1.bf16.msra.mxu0 %v4045_v12  ;;  %3157 = vmatpush1.bf16.msra.mxu1 %v4046_v18 }
 0xe77   : > { %3117 = vmatprep.subr.bf16.mxu0 %v4047_v59  ;;  %3158 = vmatprep.subr.bf16.mxu1 %v4048_v13 }
 0xe7a   : > { %3118 = vmatpush1.bf16.msra.mxu0 %v4049_v20  ;;  %3159 = vmatpush1.bf16.msra.mxu1 %v5395_v4 }
 0xe7b   : > { %3119 = vmatprep.subr.bf16.mxu0 %v4050_v24  ;;  %3160 = vmatprep.subr.bf16.mxu1 %v5400_v10 }
 0xe7e   : > { %3120 = vmatpush1.bf16.msra.mxu0 %v5404_v63  ;;  %3161 = vmatpush1.bf16.msra.mxu1 %v5408_v38 }
 0xf34   : > { %v3009_v33 = vpop.f32.mrb[88].mxu0  ;;  %v3050_v53 = vpop.f32.mrb[88].mxu1 }
 0xf35   : > { %v3057_v57 = vadd.f32 %v3009_v33, %v2970_v25  ;;  %v3011_v17 = vpop.f32.mrb[89].mxu0  ;;  %v3052_v4 = vpop.f32.mrb[89].mxu1  ;;  %v3059_v0 = vadd.f32 %v3050_v53, %v2972_v61 }
 0xf36   : > { %v3058_v58 = vadd.f32 %v3011_v17, %v2971_v56  ;;  %v3013_v62 = vpop.f32.mrb[90].mxu0  ;;  %v3054_v23 = vpop.f32.mrb[90].mxu1  ;;  %v3060_v15 = vadd.f32 %v3052_v4, %v2973_v16 }
 0xf37   : > { %v3061_v10 = vmul.f32 0.5, %v3057_v57  ;;  %v3014_v1 = vpop.f32.mrb[91].mxu0  ;;  %v3055_v63 = vpop.f32.mrb[91].mxu1 }
 0xf38   : > { %v3065_v38 = vmul.f32 0.5, %v3058_v58  ;;  %v3070_v51 = vmul.f32 0.5, %v3060_v15  ;;  %v3092_v53 = vpop.permute.xlu1 %3091 }
 0xf39   : > { %3940 = vtanh.f32 %v3061_v10  ;;  %vm3093_vm1 = vcmp.eq.s32.totalorder %v3092_v53, 1 }
 0xf3a   : > { %3942 = vtanh.f32 %v3065_v38 }
 0xf3b   : > { %3944 = vtanh.f32 %v3059_v0 }
 0xf3c   : > { %3946 = vtanh.f32 %v3070_v51 }
 0xf43   : > { %v3941_v28 = vpop.eup %3940 }
 0xf44   : > { %v3943_v29 = vpop.eup %3942  ;;  %v3063_v30 = vmul.f32 0.5, %v3941_v28 }
 0xf45   : > { %v3067_v31 = vmul.f32 0.5, %v3943_v29  ;;  %v3945_v32 = vpop.eup %3944 }
 0xf46   : > { %v3064_v26 = vadd.f32 0.5, %v3063_v30  ;;  %v3947_v8 = vpop.eup %3946 }
 0xf47   : > { %v3068_v47 = vadd.f32 0.5, %v3067_v31  ;;  %v3072_v49 = vmul.f32 0.5, %v3947_v8 }
 0xf48   : > { %v3075_v19 = vmul.f32 %v3945_v32, %v3064_v26 }
 0xf49   : > { %v3074_v45 = vmul.f32 %v3068_v47, %v5601_v46  ;;  %v3073_v50 = vadd.f32 0.5, %v3072_v49 }
 0xf4b   : > { %v3076_v21 = vadd.f32 %v3075_v19, %v3074_v45 }
 0xf4d   : > { %3948 = vtanh.f32 %v3076_v21  ;;  %v3080_v48 = vsel %vm2963_vm0, %v3076_v21, %v5601_v46  ;;  %v3100_v46 = vld [vmem:[%s3099_s20] sm:$0xff]  ;;  %s5680_s20 = scalar_lea.hbm %s5788_s9, %s3640_s25 }
 0xf57   : > { %v3949_v52 = vpop.eup %3948 }
 0xf58   : > { %v3078_v5 = vmul.f32 %v3949_v52, %v3073_v50 }
 0xf5a   : > { %v3081_v60 = vsel %vm2963_vm0, %v3078_v5, 0.0  ;;  %v5646_v22 = vsel %vm2963_vm0, %v3078_v5, %v5604_v55 }
 0xf5b   : > { %3631 = vst [vmem:[%s4782_s26 + $0x70] sm:$0xff] %v3081_v60  ;;  %v3104_v39 = vpack.c.bf16 %v5646_v22, %v5646_v22 }
 0xf5d   : > { %3138 = vmatmul.mubr.bf16.vlgmr.msra.gmra.mrb[92].mxu0 %v3104_v39  ;;  %3179 = vmatmul.mubr.bf16.vlgmr.msra.gmra.mrb[92].mxu1 %v3104_v39 }
0x1030   : > { %v3139_v27 = vpop.f32.mrb[92].mxu0  ;;  %v3180_v6 = vpop.f32.mrb[92].mxu1 }
0x1031   : > { %v3187_v14 = vadd.f32 %v3139_v27, %v3100_v46  ;;  %v3141_v9 = vpop.f32.mrb[93].mxu0  ;;  %v3182_v11 = vpop.f32.mrb[93].mxu1  ;;  %v3189_v54 = vadd.f32 %v3180_v6, %v3102_v36 }
0x1032   : > { %v3188_v55 = vadd.f32 %v3141_v9, %v3101_v7  ;;  %v3143_v34 = vpop.f32.mrb[94].mxu0  ;;  %v3184_v42 = vpop.f32.mrb[94].mxu1  ;;  %v3190_v41 = vadd.f32 %v3182_v11, %v3103_v40 }
0x1033   : > { %v3191_v3 = vmul.f32 0.5, %v3187_v14  ;;  %v3144_v2 = vpop.f32.mrb[95].mxu0  ;;  %v3185_v35 = vpop.f32.mrb[95].mxu1 }
0x1034   : > { %v3195_v37 = vmul.f32 0.5, %v3188_v55  ;;  %v3200_v43 = vmul.f32 0.5, %v3190_v41 }
0x1035   : > { %3950 = vtanh.f32 %v3191_v3 }
0x1036   : > { %3952 = vtanh.f32 %v3195_v37 }
0x1037   : > { %3954 = vtanh.f32 %v3189_v54 }
0x1038   : > { %3956 = vtanh.f32 %v3200_v43 }
0x103f   : > { %v3951_v12 = vpop.eup %3950 }
0x1040   : > { %v3953_v18 = vpop.eup %3952  ;;  %v3193_v59 = vmul.f32 0.5, %v3951_v12 }
0x1041   : > { %v3197_v13 = vmul.f32 0.5, %v3953_v18  ;;  %v3955_v24 = vpop.eup %3954 }
0x1042   : > { %v3194_v20 = vadd.f32 0.5, %v3193_v59  ;;  %v3957_v4 = vpop.eup %3956 }
0x1043   : > { %v3198_v25 = vadd.f32 0.5, %v3197_v13  ;;  %v3202_v58 = vmul.f32 0.5, %v3957_v4 }
0x1044   : > { %v3205_v33 = vmul.f32 %v3955_v24, %v3194_v20 }
0x1045   : > { %v3204_v57 = vmul.f32 %v3198_v25, %v3080_v48  ;;  %v3203_v62 = vadd.f32 0.5, %v3202_v58 }
0x1047   : > { %v3206_v56 = vadd.f32 %v3205_v33, %v3204_v57 }
0x1049   : > { %3958 = vtanh.f32 %v3206_v56  ;;  %v3210_v17 = vsel %vm3093_vm1, %v3206_v56, %v3080_v48 }
0x104a   : > { %3222 = vst [vmem:[%s472_s27] sm:$0xff] %v3210_v17  ;;  %s4230_s27 = smov [#allocation9]  }
0x104b   : > { %s4085_s28 = sshll.u32 %s4230_s27, 4  ;;  %s4086_s28 = int_to_ptr.vmem [resolvable:$false] %s4085_s28 }
0x104c   : > { %s4087_s3 = scalar_lea.vmem %s4086_s28, 256  ;;  %p4088_p2 = scmp.lt.s32.totalorder %s5664_s13, %s4086_s28 }
0x104d   : > { %p4089_p5 = scmp.lt.s32.totalorder %s4087_s3, %s4081_s2 }
0x104f   : > { %p4090_p4 = por %p4089_p5, %p4088_p2 }
0x1051   : > { %p4091_p7 = pnand %p4090_p4, %p4084_p13 }
0x1053   : > { %v3959_v23 = vpop.eup %3958 }
0x1054   : > { %v3208_v10 = vmul.f32 %v3959_v23, %v3203_v62 }
0x1056   : > { %v3211_v1 = vsel %vm3093_vm1, %v3208_v10, 0.0  ;;  %v3209_v63 = vsel %vm3093_vm1, %v3208_v10, %v5646_v22 }
0x1057   : > { %3634 = vst [vmem:[%s4782_s26 + $0x78] sm:$0xff] %v3211_v1  ;;  %3220 = vst [vmem:[%s465_s16] sm:$0xff] %v3209_v63 }
0x1058   : > { %4094 = shalt.err (!%p4091_p7)
}
0x1059   : > { %s4095_s26 = scalar_lea.hbm %s5662_s0, 128  ;;  %s4099_s16 = scalar_lea.hbm %s5787_s8, 256 }
0x105a   : > { %p4096_p10 = scmp.ne.s32.totalorder %s5662_s0, %s4095_s26  ;;  %p4100_p3 = scmp.lt.u32.totalorder %s5662_s0, %s5787_s8 }
0x105b   : > { %p4101_p9 = scmp.lt.u32.totalorder %s4099_s16, %s4095_s26  ;;  %p4103_p11 = scmp.lt.u32.totalorder %s4095_s26, %s5662_s0 }
0x105c   : > { %p4097_p12 = pnand %p4096_p10, %p5809_p0 }
0x105d   : > { %p4102_p8 = por %p4101_p9, %p4100_p3 }
0x105e   : > { %p4098_p1 = pneg %p4097_p12 }
0x105f   : > { %p4104_p6 = por %p4103_p11, %p4102_p8 }
0x1061   : > { %p4105_p13 = pnand %p4104_p6, %p4098_p1 }
0x1063   : > { %4108 = shalt.err (!%p4105_p13)
}
0x1064   : > { %3666 = dma.vmem_to_hbm [thread:$0]  (%p5809_p0), %s5664_s13, 128, %s5662_s0, %s5684_s1  }
0x1065   : > { %s3224_s3 = scalar_lea.sflag [#allocation7], %s4403_s18  ;;  %s4109_s2 = scalar_lea.vmem %s5671_s17, 2048 }
0x1066   : > { %p4110_p2 = scmp.ne.s32.totalorder %s5671_s17, %s4109_s2  ;;  %s4231_s27 = smov [#allocation8]  }
0x1067   : > { %s4113_s28 = sshll.u32 %s4231_s27, 4  ;;  %s4114_s28 = int_to_ptr.vmem [resolvable:$false] %s4113_s28 }
0x1068   : > { %p4111_p5 = pnand %p4110_p2, %p5809_p0  ;;  %s4115_s26 = scalar_lea.vmem %s4114_s28, 4096 }
0x1069   : > { %p4116_p7 = scmp.lt.s32.totalorder %s5671_s17, %s4114_s28  ;;  %p4117_p10 = scmp.lt.s32.totalorder %s4115_s26, %s4109_s2 }
0x106a   : > { %p4112_p4 = pneg %p4111_p5 }
0x106b   : > { %p4118_p12 = por %p4117_p10, %p4116_p7 }
0x106d   : > { %p4119_p1 = pnand %p4118_p12, %p4112_p4 }
0x106f   : > { %4122 = shalt.err (!%p4119_p1)
}
0x1070   : > { %s4123_s0 = scalar_lea.hbm %s5669_s29, 2048  ;;  %s4127_s25 = scalar_lea.hbm %s5786_s7, 4096 }
0x1071   : > { %p4124_p3 = scmp.ne.s32.totalorder %s5669_s29, %s4123_s0  ;;  %p4128_p11 = scmp.lt.u32.totalorder %s5669_s29, %s5786_s7 }
0x1072   : > { %p4129_p6 = scmp.lt.u32.totalorder %s4127_s25, %s4123_s0  ;;  %p4131_p2 = scmp.lt.u32.totalorder %s4123_s0, %s5669_s29 }
0x1073   : > { %p4125_p9 = pnand %p4124_p3, %p5809_p0 }
0x1074   : > { %p4130_p13 = por %p4129_p6, %p4128_p11 }
0x1075   : > { %p4126_p8 = pneg %p4125_p9 }
0x1076   : > { %p4132_p5 = por %p4131_p2, %p4130_p13 }
0x1078   : > { %p4133_p4 = pnand %p4132_p5, %p4126_p8 }
0x107a   : > { %4136 = shalt.err (!%p4133_p4)
}
0x107b   : > { %s4232_s21 = smov 128   ;;  %s4233_s2 = smov 8  }
0x107c   : > { %3665 = dma.vmem_to_hbm [thread:$0]  (%p5809_p0), %s5671_s17, 2048, %s5669_s29, %s3224_s3, %s4232_s21, %s4232_s21, %s4233_s2  }
0x107d   : > { %s4137_s27 = scalar_lea.vmem %s5682_s15, 128  ;;  %s4234_s28 = smov [#allocation11]  }
0x107e   : > { %p4138_p7 = scmp.ne.s32.totalorder %s5682_s15, %s4137_s27  ;;  %s4141_s26 = sshll.u32 %s4234_s28, 4  ;;  %s4142_s26 = int_to_ptr.vmem [resolvable:$false] %s4141_s26 }
0x107f   : > { %s4143_s0 = scalar_lea.vmem %s4142_s26, 256  ;;  %p4144_p1 = scmp.lt.s32.totalorder %s5682_s15, %s4142_s26 }
0x1080   : > { %p4139_p10 = pnand %p4138_p7, %p5809_p0  ;;  %p4145_p3 = scmp.lt.s32.totalorder %s4143_s0, %s4137_s27 }
0x1082   : > { %p4140_p12 = pneg %p4139_p10  ;;  %p4146_p9 = por %p4145_p3, %p4144_p1 }
0x1084   : > { %p4147_p8 = pnand %p4146_p9, %p4140_p12 }
0x1086   : > { %4150 = shalt.err (!%p4147_p8)
}
0x1087   : > { %s4151_s18 = scalar_lea.hbm %s5680_s20, 128  ;;  %s4155_s3 = scalar_lea.hbm %s5788_s9, 256 }
0x1088   : > { %p4152_p11 = scmp.ne.s32.totalorder %s5680_s20, %s4151_s18  ;;  %p4156_p2 = scmp.lt.u32.totalorder %s5680_s20, %s5788_s9 }
0x1089   : > { %p4157_p5 = scmp.lt.u32.totalorder %s4155_s3, %s4151_s18  ;;  %p4159_p7 = scmp.lt.u32.totalorder %s4151_s18, %s5680_s20 }
0x108a   : > { %p4153_p6 = pnand %p4152_p11, %p5809_p0 }
0x108b   : > { %p4158_p4 = por %p4157_p5, %p4156_p2 }
0x108c   : > { %p4154_p13 = pneg %p4153_p6 }
0x108d   : > { %p4160_p10 = por %p4159_p7, %p4158_p4 }
0x108f   : > { %p4161_p12 = pnand %p4160_p10, %p4154_p13 }
0x1091   : > { %4164 = shalt.err (!%p4161_p12)
}
0x1092   : > { %3667 = dma.vmem_to_hbm [thread:$0]  (%p5809_p0), %s5682_s15, 128, %s5680_s20, %s5684_s1  }
0x1093 PF: > { %s3290_s25 = sand.u32 1, %s4203_s30   ;;  %p5810_p1 = scmp.ne.s32.totalorder %s5802_s24, 0 }
0x1094   : > { %p5811_p3 = scmp.ge.s32.totalorder %s4223_s14, 2  ;;  %s3291_s16 = scalar_lea.sflag [#allocation7], %s3290_s25 }
0x1096   : > { %p3676_p9 = pnand %p5811_p3, %p5810_p1 }
0x1098   : > { %4194 = dma.done.wait (!%p3676_p9), %s3291_s16, 2048  }
0x1099   : > { %4196 = vsyncadd (!%p3676_p9), %s3291_s16, 4294965248  ;;  %s5812_s12 = sadd.s32 4294967294, %s4223_s14  }
0x109a   : > { %s3299_s21 = sand.u32 1, %s5812_s12  }
0x109b   : > { %s3300_s2 = scalar_lea.sflag [#allocation10], %s3299_s21 }
0x109c   : > { %4198 = dma.done.wait (!%p3676_p9), %s3300_s2, 256  }
0x109d   : > { %4200 = vsyncadd (!%p3676_p9), %s3300_s2, 4294967040  ;;  %s29_s14 = sadd.s32 1, %s4223_s14   ;;  %s5813_s12 = sld [smem:[#allocation15_spill]] }
0x109e   : > { %p26_p0 = scmp.ge.s32.totalorder %s29_s14, 4   ;;  %s5814_s13 = sld [smem:[#allocation16_spill]] }
0x109f   : > { %s5815_s30 = smov %s4207_s10  ;;  %s5816_s10 = smov %s4211_s11 }
0x10a0   : > { %s5817_s11 = smov %s4347_s23  ;;  %28 = sbr.rel (!%p26_p0) target bundleno = 13 (0xd), region = 179 }
0x10a7   :  { %3314 = vsyncpa [#allocation6], 1 }
0x10a8   :  { %3316 = vsyncpa [#allocation6 + $0x1], 1 }
0x10a9   :  { %3317 = vsyncpa [#allocation7], 1 }
0x10aa   :  { %3319 = vsyncpa [#allocation7 + $0x1], 1 }
0x10ab   :  { %3320 = vsyncpa [#allocation10], 1 }
0x10ac   :  { %3322 = vsyncpa [#allocation10 + $0x1], 1 }

</bundles_post_ra>
